<compile_context>
chip_gen: v7x
topology: tpu7x:2x2x1
jax: 0.10.0
libtpu: 0.0.40
codegen_flags: <defaults>
</compile_context>

<pallas_src>
import functools

import jax
import jax.numpy as jnp
from jax.experimental import pallas as pl
from jax.experimental.pallas import tpu as pltpu

RATIO = 0.8           # Lowe ratio-test coefficient used in Matching.forward
_PAD_SENTINEL = 1e30  # sq1 value for padded train rows -> they never win


def _knn_ratio_kernel(d1_ref, sq1_ref, d0t_ref, sq0_ref, mask_ref, score_ref,
                      best_ref, second_ref, idx_ref):
    """One (N0-tile, N1-tile) step of brute-force 2-NN + ratio test.

    d1_ref:    (tk, D)  -2 * train descriptors (MXU LHS)
    sq1_ref:   (tk, 1)  ||d1||^2 column (sentinel 1e30 on padded rows)
    d0t_ref:   (D, tm)  query descriptors, pre-transposed (MXU RHS)
    sq0_ref:   (1, tm)  ||d0||^2 lane-major row (finalize only)
    mask_ref:  (1, tm)  i32  best trainIdx if ratio test passes else -1
    score_ref: (1, tm)  f32  best-match L2 distance (m.distance)
    best/second/idx_ref: (1, tm) running top-2 accumulators (VMEM scratch)

    NOTE: the top-2 merge min(max(r1,b1), min(r2,b2)) is only correct because
    successive k-tiles are DISJOINT in train indices (no overlap/duplication).
    """
    k = pl.program_id(1)
    tk = d1_ref.shape[0]

    @pl.when(k == 0)
    def _():
        best_ref[...] = jnp.full(best_ref.shape, jnp.inf, dtype=best_ref.dtype)
        second_ref[...] = jnp.full(second_ref.shape, jnp.inf, dtype=second_ref.dtype)
        idx_ref[...] = jnp.full(idx_ref.shape, -1, dtype=idx_ref.dtype)

    # part[j, i] = ||d1_j||^2 - 2 <d1_j, d0_i>   (||d0_i||^2 is constant per
    # query column -> does not affect ordering; added only at finalize).
    dots = jnp.dot(d1_ref[...], d0t_ref[...],
                   preferred_element_type=jnp.float32)            # (tk, tm)
    part = dots + sq1_ref[...]                                    # column bias add

    # Sublane row-index iota; jnp broadcasting expands it as needed.
    row = jax.lax.broadcasted_iota(jnp.int32, (tk, 1), 0)         # (tk, 1)

    # Tile best + its (lowest) row index, as a global train index.  All
    # reductions run along sublanes (axis 0); results are lane-dense (1, tm).
    b1 = jnp.min(part, axis=0, keepdims=True)                     # (1, tm)
    i1_loc = jnp.min(jnp.where(part <= b1, row, tk),
                     axis=0, keepdims=True)                       # (1, tm)
    i1 = (i1_loc + k * tk).astype(jnp.int32)

    # Tile second best: mask out only the single best row of this tile.
    b2 = jnp.min(jnp.where(row == i1_loc, jnp.inf, part),
                 axis=0, keepdims=True)                           # (1, tm)

    # Merge tile top-2 with running top-2 (all (1, tm) lane-dense selects).
    r1 = best_ref[...]
    r2 = second_ref[...]
    ri = idx_ref[...]
    take_new = b1 < r1          # strict: exact ties keep the earlier (lower) index
    best_ref[...] = jnp.minimum(r1, b1)
    idx_ref[...] = jnp.where(take_new, i1, ri)
    second_ref[...] = jnp.minimum(jnp.maximum(r1, b1), jnp.minimum(r2, b2))

    @pl.when(k == pl.num_programs(1) - 1)
    def _():
        sq0 = sq0_ref[...]                                        # (1, tm)
        d1_sq = jnp.maximum(best_ref[...] + sq0, 0.0)
        d2_sq = jnp.maximum(second_ref[...] + sq0, 0.0)
        # sqrt is monotone: m < RATIO * n  <=>  m^2 < RATIO^2 * n^2
        keep = d1_sq < (RATIO * RATIO) * d2_sq
        mask_ref[...] = jnp.where(keep, idx_ref[...], jnp.int32(-1))
        score_ref[...] = jnp.sqrt(d1_sq)                          # distance units


def _round_up(x, m):
    return (x + m - 1) // m * m


@functools.partial(jax.jit, static_argnames=("use_bf16",))
def knn_ratio_match(desc0, desc1, *, use_bf16=False):
    """Brute-force 2-NN + Lowe ratio test.

    Returns (mask[int32, N0], matching_score[f32, N0]).  Arbitrary keypoint
    counts are supported: queries are zero-padded (outputs sliced off) and
    padded train rows get a +1e30 sq1 sentinel so they can never win.
    """
    n0, d = desc0.shape
    n1, d1d = desc1.shape
    assert d == d1d

    # ---- query (lane-major) tile: keep >=2 parallel blocks at realistic N0 ----
    n0p = _round_up(max(n0, 1), 128)
    if n0p <= 256:
        tm = n0p
    elif n0p % 256 == 0:
        tm = 256
    else:
        tm = 128

    # ---- train (sublane-major) tile: make desc1 fully VMEM-resident when it
    # comfortably fits (constant block index -> single DMA, 1 reduction step);
    # otherwise stream 1024-row tiles. ----
    bytes_per = 2 if use_bf16 else 4
    lane_w = _round_up(d, 128)
    resident_bytes = 2 * _round_up(max(n1, 1), 8) * lane_w * bytes_per  # dbl-buffered
    if resident_bytes <= 12 * 1024 * 1024:
        n1p = _round_up(max(n1, 1), 8)
        tk = n1p
    else:
        tk = 1024
        n1p = _round_up(n1, tk)

    f32 = jnp.float32
    mm_dtype = jnp.bfloat16 if use_bf16 else f32
    desc0 = desc0.astype(f32)
    desc1 = desc1.astype(f32)

    # Queries: zero-pad rows (their outputs are discarded by the final slice).
    d0p = jnp.pad(desc0, ((0, n0p - n0), (0, 0)))
    d0t = d0p.T.astype(mm_dtype)                                  # (D, n0p)  MXU RHS
    sq0 = jnp.sum(d0p * d0p, axis=1)[None, :]                     # (1, n0p)  lane-major

    # Train: zero-pad rows; -2 scale folded here; sentinel keeps pads from winning.
    d1p = jnp.pad(desc1, ((0, n1p - n1), (0, 0)))
    d1m2 = (-2.0 * d1p).astype(mm_dtype)                          # (n1p, D)  MXU LHS
    sq1 = jnp.sum(d1p * d1p, axis=1)
    sq1 = jnp.where(jnp.arange(n1p) < n1, sq1, _PAD_SENTINEL)[:, None]  # (n1p, 1) f32

    mask2d, score2d = pl.pallas_call(
        _knn_ratio_kernel,
        out_shape=(
            jax.ShapeDtypeStruct((1, n0p), jnp.int32),
            jax.ShapeDtypeStruct((1, n0p), jnp.float32),
        ),
        grid_spec=pltpu.PrefetchScalarGridSpec(
            num_scalar_prefetch=0,
            grid=(n0p // tm, n1p // tk),                          # reduction axis last
            in_specs=[
                pl.BlockSpec((tk, d), lambda i, k: (k, 0)),       # -2*desc1 tile
                pl.BlockSpec((tk, 1), lambda i, k: (k, 0)),       # ||d1||^2 column
                pl.BlockSpec((d, tm), lambda i, k: (0, i)),       # desc0.T tile
                pl.BlockSpec((1, tm), lambda i, k: (0, i)),       # ||d0||^2 row
            ],
            out_specs=[
                pl.BlockSpec((1, tm), lambda i, k: (0, i)),
                pl.BlockSpec((1, tm), lambda i, k: (0, i)),
            ],
            scratch_shapes=[
                pltpu.VMEM((1, tm), jnp.float32),   # running best (partial sq dist)
                pltpu.VMEM((1, tm), jnp.float32),   # running second best
                pltpu.VMEM((1, tm), jnp.int32),     # running best trainIdx
            ],
        ),
        compiler_params=pltpu.CompilerParams(
            dimension_semantics=("parallel", "arbitrary"),
            vmem_limit_bytes=40 * 1024 * 1024),
    )(d1m2, sq1, d0t, sq0)

    return mask2d[0, :n0], score2d[0, :n0]


def matching_forward(kpts0, desc0, kpts1, desc1):
    """Mirrors Matching.forward output tuple (kpts0, kpts1, mask, matching_score)
    for a float-descriptor detector (superpoint/r2d2/sekd) + brute-force knn."""
    mask, matching_score = knn_ratio_match(desc0, desc1)
    # keypoints pass through unchanged on the superpoint/r2d2/sekd branch
    return kpts0, kpts1, mask, matching_score


def _reference(desc0, desc1):
    """Pure-JAX reference for sanity checking."""
    dist = jnp.sqrt(jnp.maximum(
        jnp.sum(desc0 ** 2, 1)[:, None] + jnp.sum(desc1 ** 2, 1)[None, :]
        - 2.0 * desc0 @ desc1.T, 0.0))
    order = jnp.argsort(dist, axis=1)
    i1 = order[:, 0]
    m = jnp.take_along_axis(dist, i1[:, None], axis=1)[:, 0]
    n = jnp.take_along_axis(dist, order[:, 1][:, None], axis=1)[:, 0]
    mask = jnp.where(m < RATIO * n, i1, -1).astype(jnp.int32)
    return mask, m


if __name__ == "__main__":
    key = jax.random.PRNGKey(0)
    k0, k1, k2, k3 = jax.random.split(key, 4)

    # ~ORB/SIFT nfeatures=500 scale, SuperPoint-style 256-d unit-norm descriptors.
    # Deliberately non-multiples of the tile sizes to exercise the padding path.
    N0, N1, D = 500, 490, 256

    desc0 = jax.random.normal(k0, (N0, D), dtype=jnp.float32)
    desc0 = desc0 / jnp.linalg.norm(desc0, axis=1, keepdims=True)
    desc1 = jax.random.normal(k1, (N1, D), dtype=jnp.float32)
    desc1 = desc1 / jnp.linalg.norm(desc1, axis=1, keepdims=True)
    kpts0 = jax.random.uniform(k2, (N0, 2), dtype=jnp.float32) * 16.0
    kpts1 = jax.random.uniform(k3, (N1, 2), dtype=jnp.float32) * 16.0

    out_kpts0, out_kpts1, mask, score = matching_forward(kpts0, desc0, kpts1, desc1)
    jax.block_until_ready((out_kpts0, out_kpts1, mask, score))

    ref_mask, ref_score = _reference(desc0, desc1)
    assert mask.shape == (N0,) and score.shape == (N0,)
    assert mask.dtype == jnp.int32
    assert bool(jnp.all(mask < N1))           # padded train rows never selected
    assert bool(jnp.all(mask == ref_mask))
    assert bool(jnp.max(jnp.abs(score - ref_score)) < 1e-4)

    print("KERNEL_OK")
</pallas_src>

<mosaic_0001>
module attributes {stable_mosaic.version = 11 : i64} {
  func.func @_knn_ratio_kernel(%arg0: i32, %arg1: i32, %arg2: memref<496x256xf32, #tpu.memory_space<vmem>>, %arg3: memref<496x1xf32, #tpu.memory_space<vmem>>, %arg4: memref<256x256xf32, #tpu.memory_space<vmem>>, %arg5: memref<1x256xf32, #tpu.memory_space<vmem>>, %arg6: memref<1x256xi32, #tpu.memory_space<vmem>>, %arg7: memref<1x256xf32, #tpu.memory_space<vmem>>, %arg8: memref<1x256xf32, #tpu.memory_space<vmem>>, %arg9: memref<1x256xf32, #tpu.memory_space<vmem>>, %arg10: memref<1x256xi32, #tpu.memory_space<vmem>>) attributes {dimension_semantics = [#tpu.dimension_semantics<parallel>, #tpu.dimension_semantics<arbitrary>], iteration_bounds = array<i64: 2, 1>, scalar_prefetch = 0 : i64, scratch_operands = 3 : i64, tpu.core_type = #tpu.core_type<tc>, window_params = [{transform_indices = @transform_0, window_bounds = array<i64: 496, 256>}, {transform_indices = @transform_1, window_bounds = array<i64: 496, 1>}, {transform_indices = @transform_2, window_bounds = array<i64: 256, 256>}, {transform_indices = @transform_3, window_bounds = array<i64: 1, 256>}, {transform_indices = @transform_4, window_bounds = array<i64: 1, 256>}, {transform_indices = @transform_5, window_bounds = array<i64: 1, 256>}]} {
    %c0_i32 = arith.constant 0 : i32
    %0 = arith.cmpi eq, %arg1, %c0_i32 : i32
    %1 = arith.extui %0 : i1 to i32
    %c0_i32_0 = arith.constant 0 : i32
    %2 = arith.cmpi ne, %1, %c0_i32_0 : i32
    scf.if %2 {
      %cst_25 = arith.constant 0x7F800000 : f32
      %45 = vector.broadcast %cst_25 : f32 to vector<1x256xf32>
      %c0_26 = arith.constant 0 : index
      %c0_27 = arith.constant 0 : index
      %46 = vector.load %arg8[%c0_26, %c0_27] : memref<1x256xf32, #tpu.memory_space<vmem>>, vector<1x256xf32>
      tpu.vector_store %arg8[%c0_26, %c0_27], %45 {strides = array<i32>} : memref<1x256xf32, #tpu.memory_space<vmem>>, vector<1x256xf32>,
      %cst_28 = arith.constant 0x7F800000 : f32
      %47 = vector.broadcast %cst_28 : f32 to vector<1x256xf32>
      %c0_29 = arith.constant 0 : index
      %c0_30 = arith.constant 0 : index
      %48 = vector.load %arg9[%c0_29, %c0_30] : memref<1x256xf32, #tpu.memory_space<vmem>>, vector<1x256xf32>
      tpu.vector_store %arg9[%c0_29, %c0_30], %47 {strides = array<i32>} : memref<1x256xf32, #tpu.memory_space<vmem>>, vector<1x256xf32>,
      %c-1_i32 = arith.constant -1 : i32
      %49 = vector.broadcast %c-1_i32 : i32 to vector<1x256xi32>
      %c0_31 = arith.constant 0 : index
      %c0_32 = arith.constant 0 : index
      %50 = vector.load %arg10[%c0_31, %c0_32] : memref<1x256xi32, #tpu.memory_space<vmem>>, vector<1x256xi32>
      tpu.vector_store %arg10[%c0_31, %c0_32], %49 {strides = array<i32>} : memref<1x256xi32, #tpu.memory_space<vmem>>, vector<1x256xi32>,
    } else {
    }
    %c0 = arith.constant 0 : index
    %c0_1 = arith.constant 0 : index
    %3 = vector.load %arg2[%c0, %c0_1] : memref<496x256xf32, #tpu.memory_space<vmem>>, vector<496x256xf32>
    %c0_2 = arith.constant 0 : index
    %c0_3 = arith.constant 0 : index
    %4 = vector.load %arg4[%c0_2, %c0_3] : memref<256x256xf32, #tpu.memory_space<vmem>>, vector<256x256xf32>
    %cst = arith.constant dense<0.000000e+00> : vector<496x256xf32>
    %5 = tpu.matmul %3, %4, %cst {dimension_numbers = #tpu.dot_dimension_numbers<[1], [0], [0], [1], [0, 0, 1, 1], [], []>} : vector<496x256xf32>, vector<256x256xf32>, vector<496x256xf32> -> vector<496x256xf32>
    %c0_4 = arith.constant 0 : index
    %c0_5 = arith.constant 0 : index
    %6 = vector.load %arg3[%c0_4, %c0_5] : memref<496x1xf32, #tpu.memory_space<vmem>>, vector<496x1xf32>
    %7 = vector.broadcast %6 : vector<496x1xf32> to vector<496x256xf32>
    %8 = arith.addf %5, %7 : vector<496x256xf32>
    %9 = tpu.iota {dimensions = array<i32: 0>} : vector<496x1xi32>
    %cst_6 = arith.constant dense<0x7F800000> : vector<256xf32>
    %10 = vector.multi_reduction <minimumf>, %8, %cst_6 [0] : vector<496x256xf32> to vector<256xf32>
    %11 = vector.shape_cast %10 : vector<256xf32> to vector<1x256xf32>
    %12 = vector.broadcast %11 : vector<1x256xf32> to vector<496x256xf32>
    %13 = arith.cmpf ole, %8, %12 : vector<496x256xf32>
    %c496_i32 = arith.constant 496 : i32
    %14 = vector.shape_cast %9 : vector<496x1xi32> to vector<496x1xi32>
    %15 = vector.broadcast %14 : vector<496x1xi32> to vector<496x256xi32>
    %16 = vector.broadcast %c496_i32 : i32 to vector<496x256xi32>
    %17 = arith.select %13, %15, %16 : vector<496x256xi1>, vector<496x256xi32>
    %cst_7 = arith.constant dense<2147483647> : vector<256xi32>
    %18 = vector.multi_reduction <minsi>, %17, %cst_7 [0] : vector<496x256xi32> to vector<256xi32>
    %19 = vector.shape_cast %18 : vector<256xi32> to vector<1x256xi32>
    %c496_i32_8 = arith.constant 496 : i32
    %20 = arith.muli %arg1, %c496_i32_8 : i32
    %21 = vector.broadcast %20 : i32 to vector<1x256xi32>
    %22 = arith.addi %19, %21 : vector<1x256xi32>
    %23 = vector.broadcast %9 : vector<496x1xi32> to vector<496x256xi32>
    %24 = vector.broadcast %19 : vector<1x256xi32> to vector<496x256xi32>
    %25 = arith.cmpi eq, %23, %24 : vector<496x256xi32>
    %cst_9 = arith.constant 0x7F800000 : f32
    %26 = vector.broadcast %cst_9 : f32 to vector<496x256xf32>
    %27 = arith.select %25, %26, %8 : vector<496x256xi1>, vector<496x256xf32>
    %cst_10 = arith.constant dense<0x7F800000> : vector<256xf32>
    %28 = vector.multi_reduction <minimumf>, %27, %cst_10 [0] : vector<496x256xf32> to vector<256xf32>
    %29 = vector.shape_cast %28 : vector<256xf32> to vector<1x256xf32>
    %c0_11 = arith.constant 0 : index
    %c0_12 = arith.constant 0 : index
    %30 = vector.load %arg8[%c0_11, %c0_12] : memref<1x256xf32, #tpu.memory_space<vmem>>, vector<1x256xf32>
    %c0_13 = arith.constant 0 : index
    %c0_14 = arith.constant 0 : index
    %31 = vector.load %arg9[%c0_13, %c0_14] : memref<1x256xf32, #tpu.memory_space<vmem>>, vector<1x256xf32>
    %c0_15 = arith.constant 0 : index
    %c0_16 = arith.constant 0 : index
    %32 = vector.load %arg10[%c0_15, %c0_16] : memref<1x256xi32, #tpu.memory_space<vmem>>, vector<1x256xi32>
    %33 = arith.cmpf olt, %11, %30 : vector<1x256xf32>
    %34 = arith.minimumf %30, %11 : vector<1x256xf32>
    %c0_17 = arith.constant 0 : index
    %c0_18 = arith.constant 0 : index
    %35 = vector.load %arg8[%c0_17, %c0_18] : memref<1x256xf32, #tpu.memory_space<vmem>>, vector<1x256xf32>
    tpu.vector_store %arg8[%c0_17, %c0_18], %34 {strides = array<i32>} : memref<1x256xf32, #tpu.memory_space<vmem>>, vector<1x256xf32>,
    %36 = arith.select %33, %22, %32 : vector<1x256xi1>, vector<1x256xi32>
    %c0_19 = arith.constant 0 : index
    %c0_20 = arith.constant 0 : index
    %37 = vector.load %arg10[%c0_19, %c0_20] : memref<1x256xi32, #tpu.memory_space<vmem>>, vector<1x256xi32>
    tpu.vector_store %arg10[%c0_19, %c0_20], %36 {strides = array<i32>} : memref<1x256xi32, #tpu.memory_space<vmem>>, vector<1x256xi32>,
    %38 = arith.maximumf %30, %11 : vector<1x256xf32>
    %39 = arith.minimumf %31, %29 : vector<1x256xf32>
    %40 = arith.minimumf %38, %39 : vector<1x256xf32>
    %c0_21 = arith.constant 0 : index
    %c0_22 = arith.constant 0 : index
    %41 = vector.load %arg9[%c0_21, %c0_22] : memref<1x256xf32, #tpu.memory_space<vmem>>, vector<1x256xf32>
    tpu.vector_store %arg9[%c0_21, %c0_22], %40 {strides = array<i32>} : memref<1x256xf32, #tpu.memory_space<vmem>>, vector<1x256xf32>,
    %c0_i32_23 = arith.constant 0 : i32
    %42 = arith.cmpi eq, %arg1, %c0_i32_23 : i32
    %43 = arith.extui %42 : i1 to i32
    %c0_i32_24 = arith.constant 0 : i32
    %44 = arith.cmpi ne, %43, %c0_i32_24 : i32
    scf.if %44 {
      %c0_25 = arith.constant 0 : index
      %c0_26 = arith.constant 0 : index
      %45 = vector.load %arg5[%c0_25, %c0_26] : memref<1x256xf32, #tpu.memory_space<vmem>>, vector<1x256xf32>
      %c0_27 = arith.constant 0 : index
      %c0_28 = arith.constant 0 : index
      %46 = vector.load %arg8[%c0_27, %c0_28] : memref<1x256xf32, #tpu.memory_space<vmem>>, vector<1x256xf32>
      %47 = arith.addf %46, %45 : vector<1x256xf32>
      %cst_29 = arith.constant 0.000000e+00 : f32
      %48 = vector.broadcast %cst_29 : f32 to vector<1x256xf32>
      %49 = arith.maximumf %47, %48 : vector<1x256xf32>
      %c0_30 = arith.constant 0 : index
      %c0_31 = arith.constant 0 : index
      %50 = vector.load %arg9[%c0_30, %c0_31] : memref<1x256xf32, #tpu.memory_space<vmem>>, vector<1x256xf32>
      %51 = arith.addf %50, %45 : vector<1x256xf32>
      %cst_32 = arith.constant 0.000000e+00 : f32
      %52 = vector.broadcast %cst_32 : f32 to vector<1x256xf32>
      %53 = arith.maximumf %51, %52 : vector<1x256xf32>
      %cst_33 = arith.constant 6.400000e-01 : f32
      %54 = vector.broadcast %cst_33 : f32 to vector<1x256xf32>
      %55 = arith.mulf %54, %53 : vector<1x256xf32>
      %56 = arith.cmpf olt, %49, %55 : vector<1x256xf32>
      %c0_34 = arith.constant 0 : index
      %c0_35 = arith.constant 0 : index
      %57 = vector.load %arg10[%c0_34, %c0_35] : memref<1x256xi32, #tpu.memory_space<vmem>>, vector<1x256xi32>
      %c-1_i32 = arith.constant -1 : i32
      %58 = vector.broadcast %c-1_i32 : i32 to vector<1x256xi32>
      %59 = arith.select %56, %57, %58 : vector<1x256xi1>, vector<1x256xi32>
      %c0_36 = arith.constant 0 : index
      %c0_37 = arith.constant 0 : index
      %60 = vector.load %arg6[%c0_36, %c0_37] : memref<1x256xi32, #tpu.memory_space<vmem>>, vector<1x256xi32>
      tpu.vector_store %arg6[%c0_36, %c0_37], %59 {strides = array<i32>} : memref<1x256xi32, #tpu.memory_space<vmem>>, vector<1x256xi32>,
      %61 = math.sqrt %49 : vector<1x256xf32>
      %c0_38 = arith.constant 0 : index
      %c0_39 = arith.constant 0 : index
      %62 = vector.load %arg7[%c0_38, %c0_39] : memref<1x256xf32, #tpu.memory_space<vmem>>, vector<1x256xf32>
      tpu.vector_store %arg7[%c0_38, %c0_39], %61 {strides = array<i32>} : memref<1x256xf32, #tpu.memory_space<vmem>>, vector<1x256xf32>,
    } else {
    }
    return
  }
  func.func @transform_0(%arg0: i32, %arg1: i32) -> (i32, i32) {
    %c0_i32 = arith.constant 0 : i32
    %c0_i32_0 = arith.constant 0 : i32
    return %arg1, %c0_i32 : i32, i32
  }
  func.func @transform_1(%arg0: i32, %arg1: i32) -> (i32, i32) {
    %c0_i32 = arith.constant 0 : i32
    %c0_i32_0 = arith.constant 0 : i32
    return %arg1, %c0_i32 : i32, i32
  }
  func.func @transform_2(%arg0: i32, %arg1: i32) -> (i32, i32) {
    %c0_i32 = arith.constant 0 : i32
    %c0_i32_0 = arith.constant 0 : i32
    return %c0_i32, %arg0 : i32, i32
  }
  func.func @transform_3(%arg0: i32, %arg1: i32) -> (i32, i32) {
    %c0_i32 = arith.constant 0 : i32
    %c0_i32_0 = arith.constant 0 : i32
    return %c0_i32, %arg0 : i32, i32
  }
  func.func @transform_4(%arg0: i32, %arg1: i32) -> (i32, i32) {
    %c0_i32 = arith.constant 0 : i32
    %c0_i32_0 = arith.constant 0 : i32
    return %c0_i32, %arg0 : i32, i32
  }
  func.func @transform_5(%arg0: i32, %arg1: i32) -> (i32, i32) {
    %c0_i32 = arith.constant 0 : i32
    %c0_i32_0 = arith.constant 0 : i32
    return %c0_i32, %arg0 : i32, i32
  }
}

</mosaic_0001>

<bundles_post_ra>
// kernel: knn_ratio_match.1
= control target key start
LH: loop header
LB: loop body
LE: loop exit
PB: predicated region body
PF: predicated region fallthrough
CT: control target
= control target key end

     0   :  { %11 = vsyncpa [#allocation7], 0  ;;  %s6544_s0 = inlined_call_operand.vmem [shape: f32[496,256], index: 0, kind: input, shape index: {}]   ;;  %s6545_s1 = inlined_call_operand.vmem [shape: f32[496,1], index: 1, kind: input, shape index: {}]   ;;  %s6546_s2 = inlined_call_operand.vmem [shape: f32[256,512], index: 2, kind: input, shape index: {}]   ;;  %s6547_s3 = inlined_call_operand.vmem [shape: f32[1,512], index: 3, kind: input, shape index: {}]   ;;  %s6548_s4 = inlined_call_operand.hbm [shape: s32[1,512], index: 4, kind: output, shape index: {0}]   ;;  %s6549_s5 = inlined_call_operand.hbm [shape: f32[1,512], index: 5, kind: output, shape index: {1}]  }
   0x1   :  { %13 = vsyncpa [#allocation7 + $0x1], 0 }
   0x2   :  { %14 = vsyncpa [#allocation9], 0 }
   0x3   :  { %16 = vsyncpa [#allocation9 + $0x1], 0  ;;  %s3188_s18 = smov 0   ;;  %s3190_s19 = smov 0  }
   0x4   :  { %s3192_s20 = smov 0   ;;  %s3194_s21 = smov 0  }
   0x5   :  { %s3196_s22 = smov 0   ;;  %s3198_s23 = smov 0  }
   0x6 LB: > { %s2851_s24 = sadd.s32 4294967295, %s3150_s23   ;;  %s2852_s25 = sadd.s32 4294967294, %s3150_s23   ;;  %s3150_s23 = sphi %s3198_s23, %s22_s23   ;;  %s3146_s22 = sphi %s3196_s22, %s7675_s22   ;;  %s3142_s21 = sphi %s3194_s21, %s7674_s21   ;;  %s3138_s20 = sphi %s3192_s20, %s7673_s20   ;;  %s3134_s19 = sphi %s3190_s19, %s7672_s19   ;;  %s3130_s18 = sphi %s3188_s18, %s7671_s18  }
   0x7   : > { %s34_s26 = sadd.s32 1, %s3146_s22  ;;  %s93_s27 = sadd.s32 1, %s3138_s20 }
   0x8   : > { %p36_p0 = scmp.ge.s32.totalorder %s34_s26, 2  ;;  %p100_p1 = scmp.ne.s32.totalorder %s3138_s20, %s3134_s19 }
   0x9   : > { %p101_p2 = scmp.eq.s32.totalorder %s3150_s23, 0  ;;  %p156_p3 = scmp.eq.s32.totalorder %s2851_s24, 1 }
   0xa   : > { %s7677_s26 = smov (%p36_p0, %s34_s26), 0  ;;  %p161_p6 = scmp.ne.s32.totalorder %s3134_s19, %s3130_s18 }
   0xb   : > { %p102_p4 = por %p101_p2, %p100_p1  ;;  %p3227_p5 = por %p156_p3, %p100_p1 }
   0xc   : > { %s90_s29 = ssub.s32 %s3146_s22, %s7677_s26  ;;  %p162_p8 = scmp.eq.s32.totalorder %s2852_s25, 1 }
   0xd   : > { %p91_p7 = scmp.eq.s32.totalorder %s90_s29, 0  ;;  %p2856_p10 = scmp.ge.s32.totalorder %s3150_s23, 2 }
   0xe   : > { %p3238_p9 = por %p162_p8, %p161_p6 }
   0xf   : > { %s3236_s30 = scalar_select %p91_p7, %s3138_s20, %s93_s27  }
  0x10   : > { %223 = sbr.rel (%p2856_p10) target bundleno = 59 (0x3b), region = 24 }
  0x17   : > { %226 = sbr.rel (!%p102_p4) target bundleno = 59 (0x3b), region = 28  ;;  %s228_s7 = sand.u32 (%p102_p4), 1, %s3138_s20  }
  0x18   : > { %s2873_s8 = sshll.u32 (%p102_p4), %s3146_s22, 4  ;;  %s2857_s9 = sshll.u32 (%p102_p4), %s228_s7, 9 }
  0x19   : > { %s3250_s12 = scalar_lea.vmem (%p102_p4), %s6546_s2, %s2873_s8  ;;  %s3255_s13 = scalar_lea.vmem (%p102_p4), [#allocation5], %s2857_s9 }
  0x1a   : > { %v246_v0 = vld [vmem:[%s3250_s12] sm:$0xff] (%p102_p4)  ;;  %v248_v1 = vld [vmem:[%s3250_s12 + $0x8] sm:$0xff] (%p102_p4) }
  0x1b   : > { %v250_v2 = vld [vmem:[%s3250_s12 + $0x20] sm:$0xff] (%p102_p4)  ;;  %247 = vst [vmem:[%s3255_s13] sm:$0xff] (%p102_p4), %v246_v0  ;;  %249 = vst [vmem:[%s3255_s13 + $0x8] sm:$0xff] (%p102_p4), %v248_v1  ;;  %v252_v3 = vld [vmem:[%s3250_s12 + $0x28] sm:$0xff] (%p102_p4) }
  0x1c   : > { %251 = vst [vmem:[%s3255_s13 + $0x10] sm:$0xff] (%p102_p4), %v250_v2  ;;  %v254_v4 = vld [vmem:[%s3250_s12 + $0x40] sm:$0xff] (%p102_p4)  ;;  %v256_v5 = vld [vmem:[%s3250_s12 + $0x48] sm:$0xff] (%p102_p4)  ;;  %253 = vst [vmem:[%s3255_s13 + $0x18] sm:$0xff] (%p102_p4), %v252_v3 }
  0x1d   : > { %255 = vst [vmem:[%s3255_s13 + $0x20] sm:$0xff] (%p102_p4), %v254_v4  ;;  %257 = vst [vmem:[%s3255_s13 + $0x28] sm:$0xff] (%p102_p4), %v256_v5  ;;  %v258_v6 = vld [vmem:[%s3250_s12 + $0x60] sm:$0xff] (%p102_p4)  ;;  %v260_v7 = vld [vmem:[%s3250_s12 + $0x68] sm:$0xff] (%p102_p4) }
  0x1e   : > { %v262_v8 = vld [vmem:[%s3250_s12 + $0x80] sm:$0xff]  ;;  %259 = vst [vmem:[%s3255_s13 + $0x30] sm:$0xff] %v258_v6  ;;  %261 = vst [vmem:[%s3255_s13 + $0x38] sm:$0xff] %v260_v7  ;;  %v264_v9 = vld [vmem:[%s3250_s12 + $0x88] sm:$0xff] }
  0x1f   : > { %263 = vst [vmem:[%s3255_s13 + $0x40] sm:$0xff] %v262_v8  ;;  %v266_v10 = vld [vmem:[%s3250_s12 + $0xa0] sm:$0xff]  ;;  %v268_v11 = vld [vmem:[%s3250_s12 + $0xa8] sm:$0xff]  ;;  %265 = vst [vmem:[%s3255_s13 + $0x48] sm:$0xff] %v264_v9 }
  0x20   : > { %267 = vst [vmem:[%s3255_s13 + $0x50] sm:$0xff] %v266_v10  ;;  %269 = vst [vmem:[%s3255_s13 + $0x58] sm:$0xff] %v268_v11  ;;  %v270_v12 = vld [vmem:[%s3250_s12 + $0xc0] sm:$0xff]  ;;  %v272_v13 = vld [vmem:[%s3250_s12 + $0xc8] sm:$0xff] }
  0x21   : > { %v274_v14 = vld [vmem:[%s3250_s12 + $0xe0] sm:$0xff]  ;;  %271 = vst [vmem:[%s3255_s13 + $0x60] sm:$0xff] %v270_v12  ;;  %273 = vst [vmem:[%s3255_s13 + $0x68] sm:$0xff] %v272_v13  ;;  %v276_v15 = vld [vmem:[%s3250_s12 + $0xe8] sm:$0xff] }
  0x22   : > { %275 = vst [vmem:[%s3255_s13 + $0x70] sm:$0xff] %v274_v14  ;;  %v278_v16 = vld [vmem:[%s3250_s12 + $0x100] sm:$0xff]  ;;  %v280_v17 = vld [vmem:[%s3250_s12 + $0x108] sm:$0xff]  ;;  %277 = vst [vmem:[%s3255_s13 + $0x78] sm:$0xff] %v276_v15 }
  0x23   : > { %279 = vst [vmem:[%s3255_s13 + $0x80] sm:$0xff] %v278_v16  ;;  %281 = vst [vmem:[%s3255_s13 + $0x88] sm:$0xff] %v280_v17  ;;  %v282_v18 = vld [vmem:[%s3250_s12 + $0x120] sm:$0xff]  ;;  %v284_v19 = vld [vmem:[%s3250_s12 + $0x128] sm:$0xff] }
  0x24   : > { %v286_v20 = vld [vmem:[%s3250_s12 + $0x140] sm:$0xff]  ;;  %283 = vst [vmem:[%s3255_s13 + $0x90] sm:$0xff] %v282_v18  ;;  %285 = vst [vmem:[%s3255_s13 + $0x98] sm:$0xff] %v284_v19  ;;  %v288_v21 = vld [vmem:[%s3250_s12 + $0x148] sm:$0xff] }
  0x25   : > { %287 = vst [vmem:[%s3255_s13 + $0xa0] sm:$0xff] %v286_v20  ;;  %v290_v22 = vld [vmem:[%s3250_s12 + $0x160] sm:$0xff]  ;;  %v292_v23 = vld [vmem:[%s3250_s12 + $0x168] sm:$0xff]  ;;  %289 = vst [vmem:[%s3255_s13 + $0xa8] sm:$0xff] %v288_v21 }
  0x26   : > { %291 = vst [vmem:[%s3255_s13 + $0xb0] sm:$0xff] %v290_v22  ;;  %293 = vst [vmem:[%s3255_s13 + $0xb8] sm:$0xff] %v292_v23  ;;  %v294_v24 = vld [vmem:[%s3250_s12 + $0x180] sm:$0xff]  ;;  %v296_v25 = vld [vmem:[%s3250_s12 + $0x188] sm:$0xff] }
  0x27   : > { %v298_v26 = vld [vmem:[%s3250_s12 + $0x1a0] sm:$0xff]  ;;  %295 = vst [vmem:[%s3255_s13 + $0xc0] sm:$0xff] %v294_v24  ;;  %297 = vst [vmem:[%s3255_s13 + $0xc8] sm:$0xff] %v296_v25  ;;  %v300_v27 = vld [vmem:[%s3250_s12 + $0x1a8] sm:$0xff] }
  0x28   : > { %299 = vst [vmem:[%s3255_s13 + $0xd0] sm:$0xff] %v298_v26  ;;  %v302_v28 = vld [vmem:[%s3250_s12 + $0x1c0] sm:$0xff]  ;;  %v304_v29 = vld [vmem:[%s3250_s12 + $0x1c8] sm:$0xff]  ;;  %301 = vst [vmem:[%s3255_s13 + $0xd8] sm:$0xff] %v300_v27 }
  0x29   : > { %303 = vst [vmem:[%s3255_s13 + $0xe0] sm:$0xff] %v302_v28  ;;  %305 = vst [vmem:[%s3255_s13 + $0xe8] sm:$0xff] %v304_v29  ;;  %v306_v30 = vld [vmem:[%s3250_s12 + $0x1e0] sm:$0xff]  ;;  %v308_v31 = vld [vmem:[%s3250_s12 + $0x1e8] sm:$0xff] }
  0x2a   : > { %v310_v32 = vld [vmem:[%s3250_s12 + $0x200] sm:$0xff]  ;;  %307 = vst [vmem:[%s3255_s13 + $0xf0] sm:$0xff] %v306_v30  ;;  %309 = vst [vmem:[%s3255_s13 + $0xf8] sm:$0xff] %v308_v31  ;;  %v312_v33 = vld [vmem:[%s3250_s12 + $0x208] sm:$0xff] }
  0x2b   : > { %311 = vst [vmem:[%s3255_s13 + $0x100] sm:$0xff] %v310_v32  ;;  %v314_v34 = vld [vmem:[%s3250_s12 + $0x220] sm:$0xff]  ;;  %v316_v35 = vld [vmem:[%s3250_s12 + $0x228] sm:$0xff]  ;;  %313 = vst [vmem:[%s3255_s13 + $0x108] sm:$0xff] %v312_v33 }
  0x2c   : > { %315 = vst [vmem:[%s3255_s13 + $0x110] sm:$0xff] %v314_v34  ;;  %317 = vst [vmem:[%s3255_s13 + $0x118] sm:$0xff] %v316_v35  ;;  %v318_v36 = vld [vmem:[%s3250_s12 + $0x240] sm:$0xff]  ;;  %v320_v37 = vld [vmem:[%s3250_s12 + $0x248] sm:$0xff] }
  0x2d   : > { %v322_v38 = vld [vmem:[%s3250_s12 + $0x260] sm:$0xff]  ;;  %319 = vst [vmem:[%s3255_s13 + $0x120] sm:$0xff] %v318_v36  ;;  %321 = vst [vmem:[%s3255_s13 + $0x128] sm:$0xff] %v320_v37  ;;  %v324_v39 = vld [vmem:[%s3250_s12 + $0x268] sm:$0xff] }
  0x2e   : > { %323 = vst [vmem:[%s3255_s13 + $0x130] sm:$0xff] %v322_v38  ;;  %v326_v40 = vld [vmem:[%s3250_s12 + $0x280] sm:$0xff]  ;;  %v328_v41 = vld [vmem:[%s3250_s12 + $0x288] sm:$0xff]  ;;  %325 = vst [vmem:[%s3255_s13 + $0x138] sm:$0xff] %v324_v39 }
  0x2f   : > { %327 = vst [vmem:[%s3255_s13 + $0x140] sm:$0xff] %v326_v40  ;;  %329 = vst [vmem:[%s3255_s13 + $0x148] sm:$0xff] %v328_v41  ;;  %v330_v42 = vld [vmem:[%s3250_s12 + $0x2a0] sm:$0xff]  ;;  %v332_v43 = vld [vmem:[%s3250_s12 + $0x2a8] sm:$0xff] }
  0x30   : > { %v334_v44 = vld [vmem:[%s3250_s12 + $0x2c0] sm:$0xff]  ;;  %331 = vst [vmem:[%s3255_s13 + $0x150] sm:$0xff] %v330_v42  ;;  %333 = vst [vmem:[%s3255_s13 + $0x158] sm:$0xff] %v332_v43  ;;  %v336_v45 = vld [vmem:[%s3250_s12 + $0x2c8] sm:$0xff] }
  0x31   : > { %335 = vst [vmem:[%s3255_s13 + $0x160] sm:$0xff] %v334_v44  ;;  %v338_v46 = vld [vmem:[%s3250_s12 + $0x2e0] sm:$0xff]  ;;  %v340_v47 = vld [vmem:[%s3250_s12 + $0x2e8] sm:$0xff]  ;;  %337 = vst [vmem:[%s3255_s13 + $0x168] sm:$0xff] %v336_v45 }
  0x32   : > { %339 = vst [vmem:[%s3255_s13 + $0x170] sm:$0xff] %v338_v46  ;;  %341 = vst [vmem:[%s3255_s13 + $0x178] sm:$0xff] %v340_v47  ;;  %v342_v48 = vld [vmem:[%s3250_s12 + $0x300] sm:$0xff]  ;;  %v344_v49 = vld [vmem:[%s3250_s12 + $0x308] sm:$0xff] }
  0x33   : > { %v346_v50 = vld [vmem:[%s3250_s12 + $0x320] sm:$0xff]  ;;  %343 = vst [vmem:[%s3255_s13 + $0x180] sm:$0xff] %v342_v48  ;;  %345 = vst [vmem:[%s3255_s13 + $0x188] sm:$0xff] %v344_v49  ;;  %v348_v51 = vld [vmem:[%s3250_s12 + $0x328] sm:$0xff] }
  0x34   : > { %347 = vst [vmem:[%s3255_s13 + $0x190] sm:$0xff] %v346_v50  ;;  %v350_v52 = vld [vmem:[%s3250_s12 + $0x340] sm:$0xff]  ;;  %v352_v53 = vld [vmem:[%s3250_s12 + $0x348] sm:$0xff]  ;;  %349 = vst [vmem:[%s3255_s13 + $0x198] sm:$0xff] %v348_v51 }
  0x35   : > { %351 = vst [vmem:[%s3255_s13 + $0x1a0] sm:$0xff] %v350_v52  ;;  %353 = vst [vmem:[%s3255_s13 + $0x1a8] sm:$0xff] %v352_v53  ;;  %v354_v54 = vld [vmem:[%s3250_s12 + $0x360] sm:$0xff]  ;;  %v356_v55 = vld [vmem:[%s3250_s12 + $0x368] sm:$0xff] }
  0x36   : > { %v358_v56 = vld [vmem:[%s3250_s12 + $0x380] sm:$0xff]  ;;  %355 = vst [vmem:[%s3255_s13 + $0x1b0] sm:$0xff] %v354_v54  ;;  %357 = vst [vmem:[%s3255_s13 + $0x1b8] sm:$0xff] %v356_v55  ;;  %v360_v57 = vld [vmem:[%s3250_s12 + $0x388] sm:$0xff] }
  0x37   : > { %359 = vst [vmem:[%s3255_s13 + $0x1c0] sm:$0xff] %v358_v56  ;;  %v362_v58 = vld [vmem:[%s3250_s12 + $0x3a0] sm:$0xff]  ;;  %v364_v59 = vld [vmem:[%s3250_s12 + $0x3a8] sm:$0xff]  ;;  %361 = vst [vmem:[%s3255_s13 + $0x1c8] sm:$0xff] %v360_v57 }
  0x38   : > { %363 = vst [vmem:[%s3255_s13 + $0x1d0] sm:$0xff] %v362_v58  ;;  %365 = vst [vmem:[%s3255_s13 + $0x1d8] sm:$0xff] %v364_v59  ;;  %v366_v60 = vld [vmem:[%s3250_s12 + $0x3c0] sm:$0xff]  ;;  %v368_v61 = vld [vmem:[%s3250_s12 + $0x3c8] sm:$0xff] }
  0x39   : > { %v370_v62 = vld [vmem:[%s3250_s12 + $0x3e0] sm:$0xff]  ;;  %367 = vst [vmem:[%s3255_s13 + $0x1e0] sm:$0xff] %v366_v60  ;;  %369 = vst [vmem:[%s3255_s13 + $0x1e8] sm:$0xff] %v368_v61  ;;  %v372_v63 = vld [vmem:[%s3250_s12 + $0x3e8] sm:$0xff] }
  0x3a   : > { %371 = vst [vmem:[%s3255_s13 + $0x1f0] sm:$0xff] %v370_v62  ;;  %373 = vst [vmem:[%s3255_s13 + $0x1f8] sm:$0xff] %v372_v63 }
  0x3b PF: > { %p2860_p11 = scmp.ge.s32.totalorder %s3150_s23, 1  ;;  %p386_p12 = scmp.lt.s32.totalorder %s3150_s23, 3 }
  0x3d   : > { %p387_p13 = pnand %p2860_p11, %p386_p12 }
  0x3f   : > { %390 = sbr.rel (%p387_p13) target bundleno = 815 (0x32f), region = 55 }
  0x46   : > { %s3385_s14 = sand.u32 1, %s3134_s19   ;;  %v662_v0 = vld [vmem:[%s6545_s1 + $0x10] sm:$0xff]  ;;  %v660_v1 = vld [vmem:[%s6545_s1] sm:$0xff]  ;;  %v3152_v2 = vmov 0   ;;  %v473_v3 = vld [vmem:[%s6544_s0 + $0x8] sm:$0xff]  ;;  %s2864_s13 = sshll.u32 %s3142_s21, 1 }
  0x47   : > { %s2861_s25 = sshll.u32 %s3385_s14, 9  ;;  %3037 = vset.pattern.permute.xlu1 %v3152_v2  ;;  %3036 = vset.pattern.permute.xlu0 %v3152_v2  ;;  %v535_v4 = vld [vmem:[%s6544_s0 + $0x1f8] sm:$0xff]  ;;  %v661_v19 = vld [vmem:[%s6545_s1 + $0x8] sm:$0xff]  ;;  %v664_v49 = vld [vmem:[%s6545_s1 + $0x20] sm:$0xff]  ;;  %p5663_p0 = scmp.lt.s32.totalorder %s2864_s13, 3 }
  0x48   : > { %734 = vperm.xlu1 %3037, %v662_v0   ;;  %724 = vperm.xlu0 %3036, %v660_v1   ;;  %s3400_s9 = scalar_lea.vmem [#allocation5], %s2861_s25  ;;  %v663_v18 = vld [vmem:[%s6545_s1 + $0x18] sm:$0xff]  ;;  %v665_v26 = vld [vmem:[%s6545_s1 + $0x28] sm:$0xff]  ;;  %v666_v53 = vld [vmem:[%s6545_s1 + $0x30] sm:$0xff]  ;;  %s2862_s25 = sshll.u32 %s3385_s14, 1 }
  0x49   : > { %v597_v5 = vld [vmem:[%s3400_s9 + $0x8] sm:$0xff]  ;;  %v599_v6 = vld [vmem:[%s3400_s9 + $0x18] sm:$0xff]  ;;  %v596_v7 = vld [vmem:[%s3400_s9] sm:$0xff]  ;;  %1096 = vmatprep.mubr.f32.mxu0 %v473_v3  ;;  %1282 = vmatprep.mubr.f32.mxu1 %v535_v4  ;;  %s7679_s13 = smov (!%p5663_p0, %s2864_s13), 3  ;;  %s5942_s27 = scalar_lea.vmem [#allocation8], %s2862_s25 }
  0x4a   : > { %v2876_v8 = vpack.c.bf16 %v599_v6, %v597_v5  ;;  %v598_v9 = vld [vmem:[%s3400_s9 + $0x10] sm:$0xff]  ;;  %v601_v10 = vld [vmem:[%s3400_s9 + $0x28] sm:$0xff]  ;;  %v603_v11 = vld [vmem:[%s3400_s9 + $0x38] sm:$0xff]  ;;  %s457_s24 = scalar_lea.vmem %s6547_s3, %s7679_s13  ;;  %s2874_s29 = sshll.u32 %s3142_s21, 5 }
  0x4b   : > { %v2878_v12 = vpack.c.bf16 %v598_v9, %v596_v7  ;;  %v2880_v13 = vpack.c.bf16 %v603_v11, %v601_v10  ;;  %v600_v14 = vld [vmem:[%s3400_s9 + $0x20] sm:$0xff]  ;;  %v602_v15 = vld [vmem:[%s3400_s9 + $0x30] sm:$0xff]  ;;  %v605_v16 = vld [vmem:[%s3400_s9 + $0x48] sm:$0xff]  ;;  %s6047_s8 = scalar_lea.hbm %s6549_s5, %s2874_s29  ;;  %s2707_s10 = sshll.u32 %s5942_s27, 4  ;;  %s2708_s10 = int_to_ptr.vmem [resolvable:$true] %s2707_s10 }
  0x4c   : > { %2877 = vmatprep.subr.bf16.mxu0 %v2876_v8  ;;  %2940 = vmatprep.subr.bf16.mxu1 %v2876_v8  ;;  %v607_v17 = vld [vmem:[%s3400_s9 + $0x58] sm:$0xff]  ;;  %v2882_v20 = vpack.c.bf16 %v602_v15, %v600_v14  ;;  %v604_v22 = vld [vmem:[%s3400_s9 + $0x40] sm:$0xff]  ;;  %v606_v23 = vld [vmem:[%s3400_s9 + $0x50] sm:$0xff]  ;;  %s2679_s11 = scalar_lea.sflag [#allocation9], %s3385_s14  ;;  %s3040_s12 = scalar_lea.vmem %s2708_s10, 32 }
  0x4d   : > { %2879 = vmatpush1.bf16.msra.mxu0 %v2878_v12  ;;  %2956 = vmatpush1.bf16.msra.mxu1 %v2878_v12  ;;  %v2884_v21 = vpack.c.bf16 %v607_v17, %v605_v16  ;;  %v609_v24 = vld [vmem:[%s3400_s9 + $0x68] sm:$0xff]  ;;  %v611_v25 = vld [vmem:[%s3400_s9 + $0x78] sm:$0xff]  ;;  %v2886_v27 = vpack.c.bf16 %v606_v23, %v604_v22  ;;  %v608_v29 = vld [vmem:[%s3400_s9 + $0x60] sm:$0xff]  ;;  %p3041_p1 = scmp.ne.s32.totalorder %s2708_s10, %s3040_s12  ;;  %s3156_s13 = smov [#allocation8]  }
  0x4e   : > { %2881 = vmatprep.subr.bf16.mxu0 %v2880_v13  ;;  %2941 = vmatprep.subr.bf16.mxu1 %v2880_v13  ;;  %v2888_v28 = vpack.c.bf16 %v611_v25, %v609_v24  ;;  %v610_v30 = vld [vmem:[%s3400_s9 + $0x70] sm:$0xff]  ;;  %v613_v31 = vld [vmem:[%s3400_s9 + $0x88] sm:$0xff]  ;;  %v615_v32 = vld [vmem:[%s3400_s9 + $0x98] sm:$0xff]  ;;  %s3044_s15 = sshll.u32 %s3156_s13, 4  ;;  %s3045_s15 = int_to_ptr.vmem [resolvable:$false] %s3044_s15 }
  0x4f   : > { %739 = vperm.xlu1 %3037, %v663_v18   ;;  %729 = vperm.xlu0 %3036, %v661_v19   ;;  %v2890_v33 = vpack.c.bf16 %v610_v30, %v608_v29  ;;  %v2892_v34 = vpack.c.bf16 %v615_v32, %v613_v31  ;;  %v612_v35 = vld [vmem:[%s3400_s9 + $0x80] sm:$0xff]  ;;  %v614_v36 = vld [vmem:[%s3400_s9 + $0x90] sm:$0xff]  ;;  %v617_v37 = vld [vmem:[%s3400_s9 + $0xa8] sm:$0xff]  ;;  %p3042_p2 = pnand %p3041_p1, %p3227_p5  ;;  %s3046_s16 = scalar_lea.vmem %s3045_s15, 64 }
  0x50   : > { %v619_v38 = vld [vmem:[%s3400_s9 + $0xb8] sm:$0xff]  ;;  %v2894_v39 = vpack.c.bf16 %v614_v36, %v612_v35  ;;  %v616_v41 = vld [vmem:[%s3400_s9 + $0xa0] sm:$0xff]  ;;  %v618_v42 = vld [vmem:[%s3400_s9 + $0xb0] sm:$0xff]  ;;  %p3047_p4 = scmp.lt.s32.totalorder %s2708_s10, %s3045_s15  ;;  %p3048_p6 = scmp.lt.s32.totalorder %s3046_s16, %s3040_s12 }
  0x51   : > { %2883 = vmatpush1.bf16.msra.mxu0 %v2882_v20  ;;  %2957 = vmatpush1.bf16.msra.mxu1 %v2882_v20  ;;  %v2896_v40 = vpack.c.bf16 %v619_v38, %v617_v37  ;;  %v621_v43 = vld [vmem:[%s3400_s9 + $0xc8] sm:$0xff]  ;;  %v623_v44 = vld [vmem:[%s3400_s9 + $0xd8] sm:$0xff]  ;;  %v2898_v45 = vpack.c.bf16 %v618_v42, %v616_v41  ;;  %v620_v47 = vld [vmem:[%s3400_s9 + $0xc0] sm:$0xff]  ;;  %p3043_p3 = pneg %p3042_p2 }
  0x52   : > { %2885 = vmatprep.subr.bf16.mxu0 %v2884_v21  ;;  %2942 = vmatprep.subr.bf16.mxu1 %v2884_v21  ;;  %v2900_v46 = vpack.c.bf16 %v623_v44, %v621_v43  ;;  %v622_v48 = vld [vmem:[%s3400_s9 + $0xd0] sm:$0xff]  ;;  %v625_v50 = vld [vmem:[%s3400_s9 + $0xe8] sm:$0xff]  ;;  %v627_v51 = vld [vmem:[%s3400_s9 + $0xf8] sm:$0xff]  ;;  %p3049_p7 = por %p3048_p6, %p3047_p4 }
  0x53   : > { %749 = vperm.xlu1 %3037, %v665_v26   ;;  %744 = vperm.xlu0 %3036, %v664_v49   ;;  %v667_v52 = vld [vmem:[%s6545_s1 + $0x38] sm:$0xff]  ;;  %v2902_v54 = vpack.c.bf16 %v622_v48, %v620_v47  ;;  %v2904_v55 = vpack.c.bf16 %v627_v51, %v625_v50  ;;  %v624_v56 = vld [vmem:[%s3400_s9 + $0xe0] sm:$0xff]  ;;  %v629_v58 = vld [vmem:[%s3400_s9 + $0x108] sm:$0xff] }
  0x54   : > { %v626_v57 = vld [vmem:[%s3400_s9 + $0xf0] sm:$0xff]  ;;  %v631_v59 = vld [vmem:[%s3400_s9 + $0x118] sm:$0xff]  ;;  %v669_v60 = vld [vmem:[%s6545_s1 + $0x48] sm:$0xff]  ;;  %p3050_p8 = pnand %p3049_p7, %p3043_p3 }
  0x55   : > { %2887 = vmatpush1.bf16.msra.mxu0 %v2886_v27  ;;  %2958 = vmatpush1.bf16.msra.mxu1 %v2886_v27  ;;  %v668_v61 = vld [vmem:[%s6545_s1 + $0x40] sm:$0xff]  ;;  %v2906_v62 = vpack.c.bf16 %v626_v57, %v624_v56  ;;  %v2908_v63 = vpack.c.bf16 %v631_v59, %v629_v58  ;;  %v630_v1 = vld [vmem:[%s3400_s9 + $0x110] sm:$0xff]  ;;  %v633_v2 = vld [vmem:[%s3400_s9 + $0x128] sm:$0xff] }
  0x56   : > { %2889 = vmatprep.subr.bf16.mxu0 %v2888_v28  ;;  %2943 = vmatprep.subr.bf16.mxu1 %v2888_v28  ;;  %v628_v0 = vld [vmem:[%s3400_s9 + $0x100] sm:$0xff]  ;;  %v635_v3 = vld [vmem:[%s3400_s9 + $0x138] sm:$0xff]  ;;  %v670_v5 = vld [vmem:[%s6545_s1 + $0x50] sm:$0xff] }
  0x57   : > { %759 = vperm.xlu1 %3037, %v667_v52   ;;  %754 = vperm.xlu0 %3036, %v666_v53   ;;  %v671_v4 = vld [vmem:[%s6545_s1 + $0x58] sm:$0xff]  ;;  %v2910_v6 = vpack.c.bf16 %v630_v1, %v628_v0  ;;  %v2912_v7 = vpack.c.bf16 %v635_v3, %v633_v2  ;;  %v632_v8 = vld [vmem:[%s3400_s9 + $0x120] sm:$0xff]  ;;  %v637_v10 = vld [vmem:[%s3400_s9 + $0x148] sm:$0xff] }
  0x58   : > { %v634_v9 = vld [vmem:[%s3400_s9 + $0x130] sm:$0xff]  ;;  %v639_v11 = vld [vmem:[%s3400_s9 + $0x158] sm:$0xff]  ;;  %v673_v12 = vld [vmem:[%s6545_s1 + $0x68] sm:$0xff] }
  0x59   : > { %2891 = vmatpush1.bf16.msra.mxu0 %v2890_v33  ;;  %2959 = vmatpush1.bf16.msra.mxu1 %v2890_v33  ;;  %v672_v13 = vld [vmem:[%s6545_s1 + $0x60] sm:$0xff]  ;;  %v2914_v14 = vpack.c.bf16 %v634_v9, %v632_v8  ;;  %v2916_v15 = vpack.c.bf16 %v639_v11, %v637_v10  ;;  %v638_v17 = vld [vmem:[%s3400_s9 + $0x150] sm:$0xff]  ;;  %v641_v18 = vld [vmem:[%s3400_s9 + $0x168] sm:$0xff] }
  0x5a   : > { %2893 = vmatprep.subr.bf16.mxu0 %v2892_v34  ;;  %2944 = vmatprep.subr.bf16.mxu1 %v2892_v34  ;;  %v636_v16 = vld [vmem:[%s3400_s9 + $0x140] sm:$0xff]  ;;  %v643_v19 = vld [vmem:[%s3400_s9 + $0x178] sm:$0xff]  ;;  %v674_v21 = vld [vmem:[%s6545_s1 + $0x70] sm:$0xff] }
  0x5b   : > { %769 = vperm.xlu1 %3037, %v669_v60   ;;  %764 = vperm.xlu0 %3036, %v668_v61   ;;  %v675_v20 = vld [vmem:[%s6545_s1 + $0x78] sm:$0xff]  ;;  %v2918_v22 = vpack.c.bf16 %v638_v17, %v636_v16  ;;  %v2920_v23 = vpack.c.bf16 %v643_v19, %v641_v18  ;;  %v640_v24 = vld [vmem:[%s3400_s9 + $0x160] sm:$0xff]  ;;  %v645_v26 = vld [vmem:[%s3400_s9 + $0x188] sm:$0xff] }
  0x5c   : > { %v642_v25 = vld [vmem:[%s3400_s9 + $0x170] sm:$0xff]  ;;  %v647_v27 = vld [vmem:[%s3400_s9 + $0x198] sm:$0xff]  ;;  %v677_v28 = vld [vmem:[%s6545_s1 + $0x88] sm:$0xff] }
  0x5d   : > { %2895 = vmatpush1.bf16.msra.mxu0 %v2894_v39  ;;  %2960 = vmatpush1.bf16.msra.mxu1 %v2894_v39  ;;  %v676_v29 = vld [vmem:[%s6545_s1 + $0x80] sm:$0xff]  ;;  %v2922_v30 = vpack.c.bf16 %v642_v25, %v640_v24  ;;  %v2924_v31 = vpack.c.bf16 %v647_v27, %v645_v26  ;;  %v646_v33 = vld [vmem:[%s3400_s9 + $0x190] sm:$0xff]  ;;  %v649_v34 = vld [vmem:[%s3400_s9 + $0x1a8] sm:$0xff] }
  0x5e   : > { %2897 = vmatprep.subr.bf16.mxu0 %v2896_v40  ;;  %2945 = vmatprep.subr.bf16.mxu1 %v2896_v40  ;;  %v644_v32 = vld [vmem:[%s3400_s9 + $0x180] sm:$0xff]  ;;  %v651_v35 = vld [vmem:[%s3400_s9 + $0x1b8] sm:$0xff]  ;;  %v678_v37 = vld [vmem:[%s6545_s1 + $0x90] sm:$0xff] }
  0x5f   : > { %779 = vperm.xlu1 %3037, %v671_v4   ;;  %774 = vperm.xlu0 %3036, %v670_v5   ;;  %v679_v36 = vld [vmem:[%s6545_s1 + $0x98] sm:$0xff]  ;;  %v2926_v38 = vpack.c.bf16 %v646_v33, %v644_v32  ;;  %v2928_v39 = vpack.c.bf16 %v651_v35, %v649_v34  ;;  %v648_v40 = vld [vmem:[%s3400_s9 + $0x1a0] sm:$0xff]  ;;  %v653_v42 = vld [vmem:[%s3400_s9 + $0x1c8] sm:$0xff] }
  0x60   : > { %v650_v41 = vld [vmem:[%s3400_s9 + $0x1b0] sm:$0xff]  ;;  %v655_v43 = vld [vmem:[%s3400_s9 + $0x1d8] sm:$0xff]  ;;  %v681_v44 = vld [vmem:[%s6545_s1 + $0xa8] sm:$0xff] }
  0x61   : > { %2899 = vmatpush1.bf16.msra.mxu0 %v2898_v45  ;;  %2961 = vmatpush1.bf16.msra.mxu1 %v2898_v45  ;;  %v680_v45 = vld [vmem:[%s6545_s1 + $0xa0] sm:$0xff]  ;;  %v2932_v47 = vpack.c.bf16 %v655_v43, %v653_v42  ;;  %v654_v49 = vld [vmem:[%s3400_s9 + $0x1d0] sm:$0xff]  ;;  %v657_v50 = vld [vmem:[%s3400_s9 + $0x1e8] sm:$0xff] }
  0x62   : > { %2901 = vmatprep.subr.bf16.mxu0 %v2900_v46  ;;  %2946 = vmatprep.subr.bf16.mxu1 %v2900_v46  ;;  %v2930_v46 = vpack.c.bf16 %v650_v41, %v648_v40  ;;  %v652_v48 = vld [vmem:[%s3400_s9 + $0x1c0] sm:$0xff]  ;;  %v659_v51 = vld [vmem:[%s3400_s9 + $0x1f8] sm:$0xff]  ;;  %v682_v53 = vld [vmem:[%s6545_s1 + $0xb0] sm:$0xff] }
  0x63   : > { %789 = vperm.xlu1 %3037, %v673_v12   ;;  %784 = vperm.xlu0 %3036, %v672_v13   ;;  %v683_v52 = vld [vmem:[%s6545_s1 + $0xb8] sm:$0xff]  ;;  %v656_v56 = vld [vmem:[%s3400_s9 + $0x1e0] sm:$0xff]  ;;  %v534_v0 = vld [vmem:[%s6544_s0 + $0x1f0] sm:$0xff] }
  0x64   : > { %v658_v57 = vld [vmem:[%s3400_s9 + $0x1f0] sm:$0xff]  ;;  %v685_v58 = vld [vmem:[%s6545_s1 + $0xc8] sm:$0xff]  ;;  %v684_v59 = vld [vmem:[%s6545_s1 + $0xc0] sm:$0xff] }
  0x65   : > { %2903 = vmatpush1.bf16.msra.mxu0 %v2902_v54  ;;  %2962 = vmatpush1.bf16.msra.mxu1 %v2902_v54  ;;  %v2934_v54 = vpack.c.bf16 %v654_v49, %v652_v48  ;;  %v2938_v60 = vpack.c.bf16 %v658_v57, %v656_v56  ;;  %v687_v61 = vld [vmem:[%s6545_s1 + $0xd8] sm:$0xff]  ;;  %v537_v2 = vld [vmem:[%s6544_s0 + $0x208] sm:$0xff]  ;;  %v688_v4 = vld [vmem:[%s6545_s1 + $0xe0] sm:$0xff] }
  0x66   : > { %2905 = vmatprep.subr.bf16.mxu0 %v2904_v55  ;;  %2947 = vmatprep.subr.bf16.mxu1 %v2904_v55  ;;  %v2936_v55 = vpack.c.bf16 %v659_v51, %v657_v50  ;;  %v475_v1 = vld [vmem:[%s6544_s0 + $0x18] sm:$0xff]  ;;  %v689_v3 = vld [vmem:[%s6545_s1 + $0xe8] sm:$0xff]  ;;  %v474_v5 = vld [vmem:[%s6544_s0 + $0x10] sm:$0xff] }
  0x67   : > { %799 = vperm.xlu1 %3037, %v675_v20   ;;  %794 = vperm.xlu0 %3036, %v674_v21   ;;  %v539_v8 = vld [vmem:[%s6544_s0 + $0x218] sm:$0xff]  ;;  %v690_v10 = vld [vmem:[%s6545_s1 + $0xf0] sm:$0xff]  ;;  %v476_v11 = vld [vmem:[%s6544_s0 + $0x20] sm:$0xff] }
  0x68   : > { %v691_v9 = vld [vmem:[%s6545_s1 + $0xf8] sm:$0xff]  ;;  %v538_v12 = vld [vmem:[%s6544_s0 + $0x210] sm:$0xff]  ;;  %v692_v16 = vld [vmem:[%s6545_s1 + $0x100] sm:$0xff] }
  0x69   : > { %2907 = vmatpush1.bf16.msra.mxu0 %v2906_v62  ;;  %2963 = vmatpush1.bf16.msra.mxu1 %v2906_v62  ;;  %v686_v62 = vld [vmem:[%s6545_s1 + $0xd0] sm:$0xff]  ;;  %v479_v13 = vld [vmem:[%s6544_s0 + $0x38] sm:$0xff]  ;;  %v540_v18 = vld [vmem:[%s6544_s0 + $0x220] sm:$0xff] }
  0x6a   : > { %2909 = vmatprep.subr.bf16.mxu0 %v2908_v63  ;;  %2948 = vmatprep.subr.bf16.mxu1 %v2908_v63  ;;  %v472_v63 = vld [vmem:[%s6544_s0] sm:$0xff]  ;;  %v478_v17 = vld [vmem:[%s6544_s0 + $0x30] sm:$0xff]  ;;  %v481_v19 = vld [vmem:[%s6544_s0 + $0x48] sm:$0xff] }
  0x6b   : > { %809 = vperm.xlu1 %3037, %v677_v28   ;;  %804 = vperm.xlu0 %3036, %v676_v29   ;;  %v543_v20 = vld [vmem:[%s6544_s0 + $0x238] sm:$0xff]  ;;  %v542_v24 = vld [vmem:[%s6544_s0 + $0x230] sm:$0xff]  ;;  %v545_v26 = vld [vmem:[%s6544_s0 + $0x248] sm:$0xff] }
  0x6c   : > { %v695_v21 = vld [vmem:[%s6545_s1 + $0x118] sm:$0xff]  ;;  %v697_v27 = vld [vmem:[%s6545_s1 + $0x128] sm:$0xff]  ;;  %v696_v28 = vld [vmem:[%s6545_s1 + $0x120] sm:$0xff] }
  0x6d   : > { %2911 = vmatpush1.bf16.msra.mxu0 %v2910_v6  ;;  %2964 = vmatpush1.bf16.msra.mxu1 %v2910_v6  ;;  %v536_v6 = vld [vmem:[%s6544_s0 + $0x200] sm:$0xff]  ;;  %v483_v25 = vld [vmem:[%s6544_s0 + $0x58] sm:$0xff]  ;;  %v482_v29 = vld [vmem:[%s6544_s0 + $0x50] sm:$0xff] }
  0x6e   : > { %2913 = vmatprep.subr.bf16.mxu0 %v2912_v7  ;;  %2949 = vmatprep.subr.bf16.mxu1 %v2912_v7  ;;  %v477_v7 = vld [vmem:[%s6544_s0 + $0x28] sm:$0xff]  ;;  %v547_v32 = vld [vmem:[%s6544_s0 + $0x258] sm:$0xff]  ;;  %v698_v34 = vld [vmem:[%s6545_s1 + $0x130] sm:$0xff] }
  0x6f   : > { %819 = vperm.xlu1 %3037, %v679_v36   ;;  %814 = vperm.xlu0 %3036, %v678_v37   ;;  %v699_v33 = vld [vmem:[%s6545_s1 + $0x138] sm:$0xff]  ;;  %v484_v35 = vld [vmem:[%s6544_s0 + $0x60] sm:$0xff]  ;;  %v546_v36 = vld [vmem:[%s6544_s0 + $0x250] sm:$0xff] }
  0x70   : > { %v487_v37 = vld [vmem:[%s6544_s0 + $0x78] sm:$0xff]  ;;  %v700_v40 = vld [vmem:[%s6545_s1 + $0x140] sm:$0xff]  ;;  %v486_v41 = vld [vmem:[%s6544_s0 + $0x70] sm:$0xff] }
  0x71   : > { %2915 = vmatpush1.bf16.msra.mxu0 %v2914_v14  ;;  %2965 = vmatpush1.bf16.msra.mxu1 %v2914_v14  ;;  %v541_v14 = vld [vmem:[%s6544_s0 + $0x228] sm:$0xff]  ;;  %v548_v42 = vld [vmem:[%s6544_s0 + $0x260] sm:$0xff]  ;;  %v550_v48 = vld [vmem:[%s6544_s0 + $0x270] sm:$0xff] }
  0x72   : > { %2917 = vmatprep.subr.bf16.mxu0 %v2916_v15  ;;  %2950 = vmatprep.subr.bf16.mxu1 %v2916_v15  ;;  %v693_v15 = vld [vmem:[%s6545_s1 + $0x108] sm:$0xff]  ;;  %v491_v49 = vld [vmem:[%s6544_s0 + $0x98] sm:$0xff] }
  0x73   : > { %829 = vperm.xlu1 %3037, %v681_v44   ;;  %824 = vperm.xlu0 %3036, %v680_v45   ;;  %v489_v43 = vld [vmem:[%s6544_s0 + $0x88] sm:$0xff]  ;;  %v551_v44 = vld [vmem:[%s6544_s0 + $0x278] sm:$0xff] }
  0x74   : > { %v703_v45 = vld [vmem:[%s6545_s1 + $0x158] sm:$0xff]  ;;  %v553_v50 = vld [vmem:[%s6544_s0 + $0x288] sm:$0xff] }
  0x75   : > { %2919 = vmatpush1.bf16.msra.mxu0 %v2918_v22  ;;  %2966 = vmatpush1.bf16.msra.mxu1 %v2918_v22  ;;  %v694_v22 = vld [vmem:[%s6545_s1 + $0x110] sm:$0xff]  ;;  %v705_v51 = vld [vmem:[%s6545_s1 + $0x168] sm:$0xff]  ;;  %v555_v56 = vld [vmem:[%s6544_s0 + $0x298] sm:$0xff] }
  0x76   : > { %2921 = vmatprep.subr.bf16.mxu0 %v2920_v23  ;;  %2951 = vmatprep.subr.bf16.mxu1 %v2920_v23  ;;  %v480_v23 = vld [vmem:[%s6544_s0 + $0x40] sm:$0xff]  ;;  %v707_v57 = vld [vmem:[%s6545_s1 + $0x178] sm:$0xff] }
  0x77   : > { %839 = vperm.xlu1 %3037, %v683_v52   ;;  %834 = vperm.xlu0 %3036, %v682_v53   ;;  %v704_v52 = vld [vmem:[%s6545_s1 + $0x160] sm:$0xff]  ;;  %v490_v53 = vld [vmem:[%s6544_s0 + $0x90] sm:$0xff] }
  0x79   : > { %2923 = vmatpush1.bf16.msra.mxu0 %v2922_v30  ;;  %2967 = vmatpush1.bf16.msra.mxu1 %v2922_v30  ;;  %v544_v30 = vld [vmem:[%s6544_s0 + $0x240] sm:$0xff] }
  0x7a   : > { %2925 = vmatprep.subr.bf16.mxu0 %v2924_v31  ;;  %2952 = vmatprep.subr.bf16.mxu1 %v2924_v31  ;;  %v485_v31 = vld [vmem:[%s6544_s0 + $0x68] sm:$0xff] }
  0x7b   : > { %849 = vperm.xlu1 %3037, %v685_v58   ;;  %844 = vperm.xlu0 %3036, %v684_v59   ;;  %v706_v58 = vld [vmem:[%s6545_s1 + $0x170] sm:$0xff]  ;;  %v492_v59 = vld [vmem:[%s6544_s0 + $0xa0] sm:$0xff] }
  0x7d   : > { %2927 = vmatpush1.bf16.msra.mxu0 %v2926_v38  ;;  %2968 = vmatpush1.bf16.msra.mxu1 %v2926_v38  ;;  %v549_v38 = vld [vmem:[%s6544_s0 + $0x268] sm:$0xff] }
  0x7e   : > { %2929 = vmatprep.subr.bf16.mxu0 %v2928_v39  ;;  %2953 = vmatprep.subr.bf16.mxu1 %v2928_v39  ;;  %v701_v39 = vld [vmem:[%s6545_s1 + $0x148] sm:$0xff] }
  0x7f   : > { %859 = vperm.xlu1 %3037, %v687_v61   ;;  %854 = vperm.xlu0 %3036, %v686_v62   ;;  %v495_v61 = vld [vmem:[%s6544_s0 + $0xb8] sm:$0xff]  ;;  %v557_v62 = vld [vmem:[%s6544_s0 + $0x2a8] sm:$0xff] }
  0x81   : > { %2931 = vmatpush1.bf16.msra.mxu0 %v2930_v46  ;;  %2969 = vmatpush1.bf16.msra.mxu1 %v2930_v46  ;;  %v702_v46 = vld [vmem:[%s6545_s1 + $0x150] sm:$0xff] }
  0x82   : > { %2933 = vmatprep.subr.bf16.mxu0 %v2932_v47  ;;  %2954 = vmatprep.subr.bf16.mxu1 %v2932_v47  ;;  %v488_v47 = vld [vmem:[%s6544_s0 + $0x80] sm:$0xff] }
  0x83   : > { %869 = vperm.xlu1 %3037, %v689_v3   ;;  %864 = vperm.xlu0 %3036, %v688_v4   ;;  %v497_v3 = vld [vmem:[%s6544_s0 + $0xc8] sm:$0xff]  ;;  %v559_v4 = vld [vmem:[%s6544_s0 + $0x2b8] sm:$0xff] }
  0x85   : > { %2935 = vmatpush1.bf16.msra.mxu0 %v2934_v54  ;;  %2970 = vmatpush1.bf16.msra.mxu1 %v2934_v54  ;;  %v552_v54 = vld [vmem:[%s6544_s0 + $0x280] sm:$0xff] }
  0x86   : > { %2937 = vmatprep.subr.bf16.mxu0 %v2936_v55  ;;  %2955 = vmatprep.subr.bf16.mxu1 %v2936_v55  ;;  %v493_v55 = vld [vmem:[%s6544_s0 + $0xa8] sm:$0xff] }
  0x87   : > { %879 = vperm.xlu1 %3037, %v691_v9   ;;  %874 = vperm.xlu0 %3036, %v690_v10   ;;  %v499_v9 = vld [vmem:[%s6544_s0 + $0xd8] sm:$0xff]  ;;  %v561_v10 = vld [vmem:[%s6544_s0 + $0x2c8] sm:$0xff] }
  0x89   : > { %2939 = vmatpush1.bf16.msra.mxu0 %v2938_v60  ;;  %2971 = vmatpush1.bf16.msra.mxu1 %v2938_v60  ;;  %v554_v60 = vld [vmem:[%s6544_s0 + $0x290] sm:$0xff] }
  0x8b   : > { %889 = vperm.xlu1 %3037, %v693_v15   ;;  %884 = vperm.xlu0 %3036, %v692_v16   ;;  %v501_v15 = vld [vmem:[%s6544_s0 + $0xe8] sm:$0xff]  ;;  %v563_v16 = vld [vmem:[%s6544_s0 + $0x2d8] sm:$0xff] }
  0x8c   : > { %1097 = vmatmul.mubr.f32.vlgmr.msra.gmra.mrb[0].mxu0 %v472_v63  ;;  %1283 = vmatmul.mubr.f32.vlgmr.msra.gmra.mrb[0].mxu1 %v534_v0  ;;  %v709_v63 = vld [vmem:[%s6545_s1 + $0x188] sm:$0xff]  ;;  %v708_v0 = vld [vmem:[%s6545_s1 + $0x180] sm:$0xff] }
  0x8d   : > { %1102 = vmatprep.mubr.f32.mxu0 %v475_v1  ;;  %1288 = vmatprep.mubr.f32.mxu1 %v537_v2  ;;  %v494_v1 = vld [vmem:[%s6544_s0 + $0xb0] sm:$0xff]  ;;  %v556_v2 = vld [vmem:[%s6544_s0 + $0x2a0] sm:$0xff] }
  0x8f   : > { %899 = vperm.xlu1 %3037, %v695_v21   ;;  %894 = vperm.xlu0 %3036, %v694_v22   ;;  %v503_v21 = vld [vmem:[%s6544_s0 + $0xf8] sm:$0xff]  ;;  %v565_v22 = vld [vmem:[%s6544_s0 + $0x2e8] sm:$0xff] }
  0x90   : > { %1103 = vmatmul.mubr.f32.gmra.mrb[2].mxu0 %v474_v5  ;;  %1289 = vmatmul.mubr.f32.gmra.mrb[2].mxu1 %v536_v6  ;;  %v711_v5 = vld [vmem:[%s6545_s1 + $0x198] sm:$0xff]  ;;  %v710_v6 = vld [vmem:[%s6545_s1 + $0x190] sm:$0xff] }
  0x91   : > { %1108 = vmatprep.mubr.f32.mxu0 %v477_v7  ;;  %1294 = vmatprep.mubr.f32.mxu1 %v539_v8  ;;  %v496_v7 = vld [vmem:[%s6544_s0 + $0xc0] sm:$0xff]  ;;  %v558_v8 = vld [vmem:[%s6544_s0 + $0x2b0] sm:$0xff] }
  0x93   : > { %909 = vperm.xlu1 %3037, %v697_v27   ;;  %904 = vperm.xlu0 %3036, %v696_v28   ;;  %v505_v27 = vld [vmem:[%s6544_s0 + $0x108] sm:$0xff]  ;;  %v567_v28 = vld [vmem:[%s6544_s0 + $0x2f8] sm:$0xff] }
  0x94   : > { %1109 = vmatmul.mubr.f32.gmra.mrb[4].mxu0 %v476_v11  ;;  %1295 = vmatmul.mubr.f32.gmra.mrb[4].mxu1 %v538_v12  ;;  %v713_v11 = vld [vmem:[%s6545_s1 + $0x1a8] sm:$0xff]  ;;  %v712_v12 = vld [vmem:[%s6545_s1 + $0x1a0] sm:$0xff] }
  0x95   : > { %1114 = vmatprep.mubr.f32.mxu0 %v479_v13  ;;  %1300 = vmatprep.mubr.f32.mxu1 %v541_v14  ;;  %v498_v13 = vld [vmem:[%s6544_s0 + $0xd0] sm:$0xff]  ;;  %v560_v14 = vld [vmem:[%s6544_s0 + $0x2c0] sm:$0xff] }
  0x97   : > { %919 = vperm.xlu1 %3037, %v699_v33   ;;  %914 = vperm.xlu0 %3036, %v698_v34   ;;  %v507_v33 = vld [vmem:[%s6544_s0 + $0x118] sm:$0xff]  ;;  %v569_v34 = vld [vmem:[%s6544_s0 + $0x308] sm:$0xff] }
  0x98   : > { %1115 = vmatmul.mubr.f32.gmra.mrb[6].mxu0 %v478_v17  ;;  %1301 = vmatmul.mubr.f32.gmra.mrb[6].mxu1 %v540_v18  ;;  %v715_v17 = vld [vmem:[%s6545_s1 + $0x1b8] sm:$0xff]  ;;  %v714_v18 = vld [vmem:[%s6545_s1 + $0x1b0] sm:$0xff] }
  0x99   : > { %1120 = vmatprep.mubr.f32.mxu0 %v481_v19  ;;  %1306 = vmatprep.mubr.f32.mxu1 %v543_v20  ;;  %v500_v19 = vld [vmem:[%s6544_s0 + $0xe0] sm:$0xff]  ;;  %v562_v20 = vld [vmem:[%s6544_s0 + $0x2d0] sm:$0xff] }
  0x9b   : > { %929 = vperm.xlu1 %3037, %v701_v39   ;;  %924 = vperm.xlu0 %3036, %v700_v40   ;;  %v509_v39 = vld [vmem:[%s6544_s0 + $0x128] sm:$0xff]  ;;  %v571_v40 = vld [vmem:[%s6544_s0 + $0x318] sm:$0xff] }
  0x9c   : > { %1121 = vmatmul.mubr.f32.gmra.mrb[8].mxu0 %v480_v23  ;;  %1307 = vmatmul.mubr.f32.gmra.mrb[8].mxu1 %v542_v24  ;;  %v717_v23 = vld [vmem:[%s6545_s1 + $0x1c8] sm:$0xff]  ;;  %v716_v24 = vld [vmem:[%s6545_s1 + $0x1c0] sm:$0xff] }
  0x9d   : > { %1126 = vmatprep.mubr.f32.mxu0 %v483_v25  ;;  %1312 = vmatprep.mubr.f32.mxu1 %v545_v26  ;;  %v502_v25 = vld [vmem:[%s6544_s0 + $0xf0] sm:$0xff]  ;;  %v564_v26 = vld [vmem:[%s6544_s0 + $0x2e0] sm:$0xff] }
  0x9f   : > { %939 = vperm.xlu1 %3037, %v703_v45   ;;  %934 = vperm.xlu0 %3036, %v702_v46   ;;  %v510_v45 = vld [vmem:[%s6544_s0 + $0x130] sm:$0xff]  ;;  %v572_v46 = vld [vmem:[%s6544_s0 + $0x320] sm:$0xff] }
  0xa0   : > { %1127 = vmatmul.mubr.f32.gmra.mrb[10].mxu0 %v482_v29  ;;  %1313 = vmatmul.mubr.f32.gmra.mrb[10].mxu1 %v544_v30  ;;  %v719_v29 = vld [vmem:[%s6545_s1 + $0x1d8] sm:$0xff]  ;;  %v718_v30 = vld [vmem:[%s6545_s1 + $0x1d0] sm:$0xff] }
  0xa1   : > { %1132 = vmatprep.mubr.f32.mxu0 %v485_v31  ;;  %1318 = vmatprep.mubr.f32.mxu1 %v547_v32  ;;  %v504_v31 = vld [vmem:[%s6544_s0 + $0x100] sm:$0xff]  ;;  %v566_v32 = vld [vmem:[%s6544_s0 + $0x2f0] sm:$0xff] }
  0xa3   : > { %949 = vperm.xlu1 %3037, %v705_v51   ;;  %944 = vperm.xlu0 %3036, %v704_v52   ;;  %v515_v51 = vld [vmem:[%s6544_s0 + $0x158] sm:$0xff]  ;;  %v577_v52 = vld [vmem:[%s6544_s0 + $0x348] sm:$0xff] }
  0xa4   : > { %1133 = vmatmul.mubr.f32.gmra.mrb[12].mxu0 %v484_v35  ;;  %1319 = vmatmul.mubr.f32.gmra.mrb[12].mxu1 %v546_v36  ;;  %v721_v35 = vld [vmem:[%s6545_s1 + $0x1e8] sm:$0xff]  ;;  %v720_v36 = vld [vmem:[%s6545_s1 + $0x1e0] sm:$0xff] }
  0xa5   : > { %1138 = vmatprep.mubr.f32.mxu0 %v487_v37  ;;  %1324 = vmatprep.mubr.f32.mxu1 %v549_v38  ;;  %v506_v37 = vld [vmem:[%s6544_s0 + $0x110] sm:$0xff]  ;;  %v568_v38 = vld [vmem:[%s6544_s0 + $0x300] sm:$0xff] }
  0xa7   : > { %959 = vperm.xlu1 %3037, %v707_v57   ;;  %954 = vperm.xlu0 %3036, %v706_v58   ;;  %v516_v57 = vld [vmem:[%s6544_s0 + $0x160] sm:$0xff]  ;;  %v578_v58 = vld [vmem:[%s6544_s0 + $0x350] sm:$0xff] }
  0xa8   : > { %1139 = vmatmul.mubr.f32.gmra.mrb[14].mxu0 %v486_v41  ;;  %1325 = vmatmul.mubr.f32.gmra.mrb[14].mxu1 %v548_v42  ;;  %v508_v41 = vld [vmem:[%s6544_s0 + $0x120] sm:$0xff]  ;;  %v570_v42 = vld [vmem:[%s6544_s0 + $0x310] sm:$0xff] }
  0xa9   : > { %1144 = vmatprep.mubr.f32.mxu0 %v489_v43  ;;  %1330 = vmatprep.mubr.f32.mxu1 %v551_v44  ;;  %v511_v43 = vld [vmem:[%s6544_s0 + $0x138] sm:$0xff]  ;;  %v573_v44 = vld [vmem:[%s6544_s0 + $0x328] sm:$0xff] }
  0xab   : > { %969 = vperm.xlu1 %3037, %v709_v63   ;;  %964 = vperm.xlu0 %3036, %v708_v0   ;;  %v521_v63 = vld [vmem:[%s6544_s0 + $0x188] sm:$0xff]  ;;  %v583_v0 = vld [vmem:[%s6544_s0 + $0x378] sm:$0xff] }
  0xac   : > { %1145 = vmatmul.mubr.f32.gmra.mrb[16].mxu0 %v488_v47  ;;  %1331 = vmatmul.mubr.f32.gmra.mrb[16].mxu1 %v550_v48  ;;  %v513_v47 = vld [vmem:[%s6544_s0 + $0x148] sm:$0xff]  ;;  %v575_v48 = vld [vmem:[%s6544_s0 + $0x338] sm:$0xff] }
  0xad   : > { %1150 = vmatprep.mubr.f32.mxu0 %v491_v49  ;;  %1336 = vmatprep.mubr.f32.mxu1 %v553_v50  ;;  %v512_v49 = vld [vmem:[%s6544_s0 + $0x140] sm:$0xff]  ;;  %v574_v50 = vld [vmem:[%s6544_s0 + $0x330] sm:$0xff] }
  0xaf   : > { %979 = vperm.xlu1 %3037, %v711_v5   ;;  %974 = vperm.xlu0 %3036, %v710_v6   ;;  %v522_v5 = vld [vmem:[%s6544_s0 + $0x190] sm:$0xff]  ;;  %v584_v6 = vld [vmem:[%s6544_s0 + $0x380] sm:$0xff] }
  0xb0   : > { %1151 = vmatmul.mubr.f32.gmra.mrb[18].mxu0 %v490_v53  ;;  %1337 = vmatmul.mubr.f32.gmra.mrb[18].mxu1 %v552_v54  ;;  %v514_v53 = vld [vmem:[%s6544_s0 + $0x150] sm:$0xff]  ;;  %v576_v54 = vld [vmem:[%s6544_s0 + $0x340] sm:$0xff] }
  0xb1   : > { %1156 = vmatprep.mubr.f32.mxu0 %v493_v55  ;;  %1342 = vmatprep.mubr.f32.mxu1 %v555_v56  ;;  %v517_v55 = vld [vmem:[%s6544_s0 + $0x168] sm:$0xff]  ;;  %v579_v56 = vld [vmem:[%s6544_s0 + $0x358] sm:$0xff] }
  0xb3   : > { %989 = vperm.xlu1 %3037, %v713_v11   ;;  %984 = vperm.xlu0 %3036, %v712_v12   ;;  %v527_v11 = vld [vmem:[%s6544_s0 + $0x1b8] sm:$0xff]  ;;  %v589_v12 = vld [vmem:[%s6544_s0 + $0x3a8] sm:$0xff] }
  0xb4   : > { %1157 = vmatmul.mubr.f32.gmra.mrb[20].mxu0 %v492_v59  ;;  %1343 = vmatmul.mubr.f32.gmra.mrb[20].mxu1 %v554_v60  ;;  %v519_v59 = vld [vmem:[%s6544_s0 + $0x178] sm:$0xff]  ;;  %v581_v60 = vld [vmem:[%s6544_s0 + $0x368] sm:$0xff] }
  0xb5   : > { %1162 = vmatprep.mubr.f32.mxu0 %v495_v61  ;;  %1348 = vmatprep.mubr.f32.mxu1 %v557_v62  ;;  %v518_v61 = vld [vmem:[%s6544_s0 + $0x170] sm:$0xff]  ;;  %v580_v62 = vld [vmem:[%s6544_s0 + $0x360] sm:$0xff] }
  0xb7   : > { %999 = vperm.xlu1 %3037, %v715_v17   ;;  %994 = vperm.xlu0 %3036, %v714_v18   ;;  %v528_v17 = vld [vmem:[%s6544_s0 + $0x1c0] sm:$0xff]  ;;  %v590_v18 = vld [vmem:[%s6544_s0 + $0x3b0] sm:$0xff] }
  0xb8   : > { %1163 = vmatmul.mubr.f32.gmra.mrb[22].mxu0 %v494_v1  ;;  %1349 = vmatmul.mubr.f32.gmra.mrb[22].mxu1 %v556_v2  ;;  %v520_v1 = vld [vmem:[%s6544_s0 + $0x180] sm:$0xff]  ;;  %v582_v2 = vld [vmem:[%s6544_s0 + $0x370] sm:$0xff] }
  0xb9   : > { %1168 = vmatprep.mubr.f32.mxu0 %v497_v3  ;;  %1354 = vmatprep.mubr.f32.mxu1 %v559_v4  ;;  %v523_v3 = vld [vmem:[%s6544_s0 + $0x198] sm:$0xff]  ;;  %v585_v4 = vld [vmem:[%s6544_s0 + $0x388] sm:$0xff] }
  0xbb   : > { %1009 = vperm.xlu1 %3037, %v717_v23   ;;  %1004 = vperm.xlu0 %3036, %v716_v24   ;;  %v533_v23 = vld [vmem:[%s6544_s0 + $0x1e8] sm:$0xff]  ;;  %v595_v24 = vld [vmem:[%s6544_s0 + $0x3d8] sm:$0xff] }
  0xbc   : > { %1169 = vmatmul.mubr.f32.gmra.mrb[24].mxu0 %v496_v7  ;;  %1355 = vmatmul.mubr.f32.gmra.mrb[24].mxu1 %v558_v8  ;;  %v525_v7 = vld [vmem:[%s6544_s0 + $0x1a8] sm:$0xff]  ;;  %v587_v8 = vld [vmem:[%s6544_s0 + $0x398] sm:$0xff] }
  0xbd   : > { %1174 = vmatprep.mubr.f32.mxu0 %v499_v9  ;;  %1360 = vmatprep.mubr.f32.mxu1 %v561_v10  ;;  %v524_v9 = vld [vmem:[%s6544_s0 + $0x1a0] sm:$0xff]  ;;  %v586_v10 = vld [vmem:[%s6544_s0 + $0x390] sm:$0xff] }
  0xbf   : > { %1019 = vperm.xlu1 %3037, %v719_v29   ;;  %1014 = vperm.xlu0 %3036, %v718_v30  }
  0xc0   : > { %1175 = vmatmul.mubr.f32.gmra.mrb[26].mxu0 %v498_v13  ;;  %1361 = vmatmul.mubr.f32.gmra.mrb[26].mxu1 %v560_v14  ;;  %v526_v13 = vld [vmem:[%s6544_s0 + $0x1b0] sm:$0xff]  ;;  %v588_v14 = vld [vmem:[%s6544_s0 + $0x3a0] sm:$0xff] }
  0xc1   : > { %1180 = vmatprep.mubr.f32.mxu0 %v501_v15  ;;  %1366 = vmatprep.mubr.f32.mxu1 %v563_v16  ;;  %v529_v15 = vld [vmem:[%s6544_s0 + $0x1c8] sm:$0xff]  ;;  %v591_v16 = vld [vmem:[%s6544_s0 + $0x3b8] sm:$0xff] }
  0xc3   : > { %1029 = vperm.xlu1 %3037, %v721_v35   ;;  %1024 = vperm.xlu0 %3036, %v720_v36  }
  0xc4   : > { %1181 = vmatmul.mubr.f32.gmra.mrb[28].mxu0 %v500_v19  ;;  %1367 = vmatmul.mubr.f32.gmra.mrb[28].mxu1 %v562_v20  ;;  %v531_v19 = vld [vmem:[%s6544_s0 + $0x1d8] sm:$0xff]  ;;  %v593_v20 = vld [vmem:[%s6544_s0 + $0x3c8] sm:$0xff] }
  0xc5   : > { %1186 = vmatprep.mubr.f32.mxu0 %v503_v21  ;;  %1372 = vmatprep.mubr.f32.mxu1 %v565_v22  ;;  %v530_v21 = vld [vmem:[%s6544_s0 + $0x1d0] sm:$0xff]  ;;  %v592_v22 = vld [vmem:[%s6544_s0 + $0x3c0] sm:$0xff] }
  0xc8   : > { %1187 = vmatmul.mubr.f32.gmra.mrb[30].mxu0 %v502_v25  ;;  %1373 = vmatmul.mubr.f32.gmra.mrb[30].mxu1 %v564_v26  ;;  %v532_v25 = vld [vmem:[%s6544_s0 + $0x1e0] sm:$0xff]  ;;  %v594_v26 = vld [vmem:[%s6544_s0 + $0x3d0] sm:$0xff] }
  0xc9   : > { %1192 = vmatprep.mubr.f32.mxu0 %v505_v27  ;;  %1378 = vmatprep.mubr.f32.mxu1 %v567_v28  ;;  %v4012_v27 = vpop.permute.xlu0 %724  ;;  %v4014_v28 = vpop.permute.xlu1 %734 }
  0xcc   : > { %1193 = vmatmul.mubr.f32.gmra.mrb[32].mxu0 %v504_v31  ;;  %1379 = vmatmul.mubr.f32.gmra.mrb[32].mxu1 %v566_v32 }
  0xcd   : > { %1198 = vmatprep.mubr.f32.mxu0 %v507_v33  ;;  %1384 = vmatprep.mubr.f32.mxu1 %v569_v34 }
  0xce   : > { %v4016_v29 = vpop.permute.xlu0 %729  ;;  %v4018_v30 = vpop.permute.xlu1 %739 }
  0xd0   : > { %1199 = vmatmul.mubr.f32.gmra.mrb[34].mxu0 %v506_v37  ;;  %1385 = vmatmul.mubr.f32.gmra.mrb[34].mxu1 %v568_v38 }
  0xd1   : > { %1204 = vmatprep.mubr.f32.mxu0 %v509_v39  ;;  %1390 = vmatprep.mubr.f32.mxu1 %v571_v40 }
  0xd2   : > { %v4020_v31 = vpop.permute.xlu0 %744  ;;  %v4022_v32 = vpop.permute.xlu1 %749 }
  0xd4   : > { %1205 = vmatmul.mubr.f32.gmra.mrb[36].mxu0 %v508_v41  ;;  %1391 = vmatmul.mubr.f32.gmra.mrb[36].mxu1 %v570_v42 }
  0xd5   : > { %1210 = vmatprep.mubr.f32.mxu0 %v511_v43  ;;  %1396 = vmatprep.mubr.f32.mxu1 %v573_v44 }
  0xd6   : > { %v4024_v33 = vpop.permute.xlu0 %754  ;;  %v4026_v34 = vpop.permute.xlu1 %759 }
  0xd8   : > { %1211 = vmatmul.mubr.f32.gmra.mrb[38].mxu0 %v510_v45  ;;  %1397 = vmatmul.mubr.f32.gmra.mrb[38].mxu1 %v572_v46 }
  0xd9   : > { %1216 = vmatprep.mubr.f32.mxu0 %v513_v47  ;;  %1402 = vmatprep.mubr.f32.mxu1 %v575_v48 }
  0xda   : > { %v4028_v35 = vpop.permute.xlu0 %764  ;;  %v4030_v36 = vpop.permute.xlu1 %769 }
  0xdb   : > { %6969 = vst [vmem:[#allocation12_spill] sm:$0xff] %v4028_v35  ;;  %6970 = vst [vmem:[#allocation13_spill] sm:$0xff] %v4030_v36 }
  0xdc   : > { %1217 = vmatmul.mubr.f32.gmra.mrb[40].mxu0 %v512_v49  ;;  %1403 = vmatmul.mubr.f32.gmra.mrb[40].mxu1 %v574_v50 }
  0xdd   : > { %1222 = vmatprep.mubr.f32.mxu0 %v515_v51  ;;  %1408 = vmatprep.mubr.f32.mxu1 %v577_v52 }
  0xde   : > { %v4032_v37 = vpop.permute.xlu0 %774  ;;  %v4034_v38 = vpop.permute.xlu1 %779 }
  0xdf   : > { %6971 = vst [vmem:[#allocation14_spill] sm:$0xff] %v4032_v37  ;;  %6972 = vst [vmem:[#allocation15_spill] sm:$0xff] %v4034_v38 }
  0xe0   : > { %1223 = vmatmul.mubr.f32.gmra.mrb[42].mxu0 %v514_v53  ;;  %1409 = vmatmul.mubr.f32.gmra.mrb[42].mxu1 %v576_v54 }
  0xe1   : > { %1228 = vmatprep.mubr.f32.mxu0 %v517_v55  ;;  %1414 = vmatprep.mubr.f32.mxu1 %v579_v56 }
  0xe2   : > { %v4036_v39 = vpop.permute.xlu0 %784  ;;  %v4038_v40 = vpop.permute.xlu1 %789 }
  0xe3   : > { %6973 = vst [vmem:[#allocation16_spill] sm:$0xff] %v4036_v39  ;;  %6974 = vst [vmem:[#allocation17_spill] sm:$0xff] %v4038_v40 }
  0xe4   : > { %1229 = vmatmul.mubr.f32.gmra.mrb[44].mxu0 %v516_v57  ;;  %1415 = vmatmul.mubr.f32.gmra.mrb[44].mxu1 %v578_v58 }
  0xe5   : > { %1234 = vmatprep.mubr.f32.mxu0 %v519_v59  ;;  %1420 = vmatprep.mubr.f32.mxu1 %v581_v60 }
  0xe6   : > { %v4040_v41 = vpop.permute.xlu0 %794  ;;  %v4042_v42 = vpop.permute.xlu1 %799 }
  0xe7   : > { %6975 = vst [vmem:[#allocation18_spill] sm:$0xff] %v4040_v41  ;;  %6976 = vst [vmem:[#allocation19_spill] sm:$0xff] %v4042_v42 }
  0xe8   : > { %1235 = vmatmul.mubr.f32.gmra.mrb[46].mxu0 %v518_v61  ;;  %1421 = vmatmul.mubr.f32.gmra.mrb[46].mxu1 %v580_v62 }
  0xe9   : > { %1240 = vmatprep.mubr.f32.mxu0 %v521_v63  ;;  %1426 = vmatprep.mubr.f32.mxu1 %v583_v0 }
  0xea   : > { %v4044_v43 = vpop.permute.xlu0 %804  ;;  %v4046_v44 = vpop.permute.xlu1 %809 }
  0xeb   : > { %6977 = vst [vmem:[#allocation20_spill] sm:$0xff] %v4044_v43  ;;  %6978 = vst [vmem:[#allocation21_spill] sm:$0xff] %v4046_v44 }
  0xec   : > { %1241 = vmatmul.mubr.f32.gmra.mrb[48].mxu0 %v520_v1  ;;  %1427 = vmatmul.mubr.f32.gmra.mrb[48].mxu1 %v582_v2 }
  0xed   : > { %1246 = vmatprep.mubr.f32.mxu0 %v523_v3  ;;  %1432 = vmatprep.mubr.f32.mxu1 %v585_v4 }
  0xee   : > { %v4048_v45 = vpop.permute.xlu0 %814  ;;  %v4050_v46 = vpop.permute.xlu1 %819 }
  0xef   : > { %6979 = vst [vmem:[#allocation22_spill] sm:$0xff] %v4048_v45  ;;  %6980 = vst [vmem:[#allocation23_spill] sm:$0xff] %v4050_v46 }
  0xf0   : > { %1247 = vmatmul.mubr.f32.gmra.mrb[50].mxu0 %v522_v5  ;;  %1433 = vmatmul.mubr.f32.gmra.mrb[50].mxu1 %v584_v6 }
  0xf1   : > { %1252 = vmatprep.mubr.f32.mxu0 %v525_v7  ;;  %1438 = vmatprep.mubr.f32.mxu1 %v587_v8 }
  0xf2   : > { %v4052_v47 = vpop.permute.xlu0 %824  ;;  %v4054_v48 = vpop.permute.xlu1 %829 }
  0xf3   : > { %6981 = vst [vmem:[#allocation24_spill] sm:$0xff] %v4052_v47  ;;  %6982 = vst [vmem:[#allocation25_spill] sm:$0xff] %v4054_v48 }
  0xf4   : > { %1253 = vmatmul.mubr.f32.gmra.mrb[52].mxu0 %v524_v9  ;;  %1439 = vmatmul.mubr.f32.gmra.mrb[52].mxu1 %v586_v10 }
  0xf5   : > { %1258 = vmatprep.mubr.f32.mxu0 %v527_v11  ;;  %1444 = vmatprep.mubr.f32.mxu1 %v589_v12 }
  0xf6   : > { %v4056_v49 = vpop.permute.xlu0 %834  ;;  %v4058_v50 = vpop.permute.xlu1 %839 }
  0xf7   : > { %6983 = vst [vmem:[#allocation26_spill] sm:$0xff] %v4056_v49  ;;  %6984 = vst [vmem:[#allocation27_spill] sm:$0xff] %v4058_v50 }
  0xf8   : > { %1259 = vmatmul.mubr.f32.gmra.mrb[54].mxu0 %v526_v13  ;;  %1445 = vmatmul.mubr.f32.gmra.mrb[54].mxu1 %v588_v14 }
  0xf9   : > { %1264 = vmatprep.mubr.f32.mxu0 %v529_v15  ;;  %1450 = vmatprep.mubr.f32.mxu1 %v591_v16 }
  0xfa   : > { %v4060_v51 = vpop.permute.xlu0 %844  ;;  %v4062_v52 = vpop.permute.xlu1 %849 }
  0xfb   : > { %6985 = vst [vmem:[#allocation28_spill] sm:$0xff] %v4060_v51  ;;  %6986 = vst [vmem:[#allocation29_spill] sm:$0xff] %v4062_v52 }
  0xfc   : > { %1265 = vmatmul.mubr.f32.gmra.mrb[56].mxu0 %v528_v17  ;;  %1451 = vmatmul.mubr.f32.gmra.mrb[56].mxu1 %v590_v18 }
  0xfd   : > { %1270 = vmatprep.mubr.f32.mxu0 %v531_v19  ;;  %1456 = vmatprep.mubr.f32.mxu1 %v593_v20 }
  0xfe   : > { %v4064_v53 = vpop.permute.xlu0 %854  ;;  %v4066_v54 = vpop.permute.xlu1 %859 }
  0xff   : > { %6987 = vst [vmem:[#allocation30_spill] sm:$0xff] %v4064_v53  ;;  %6988 = vst [vmem:[#allocation31_spill] sm:$0xff] %v4066_v54 }
 0x100   : > { %1271 = vmatmul.mubr.f32.gmra.mrb[58].mxu0 %v530_v21  ;;  %1457 = vmatmul.mubr.f32.gmra.mrb[58].mxu1 %v592_v22 }
 0x101   : > { %1276 = vmatprep.mubr.f32.mxu0 %v533_v23  ;;  %1462 = vmatprep.mubr.f32.mxu1 %v595_v24 }
 0x102   : > { %v4068_v55 = vpop.permute.xlu0 %864  ;;  %v4070_v56 = vpop.permute.xlu1 %869 }
 0x103   : > { %6989 = vst [vmem:[#allocation32_spill] sm:$0xff] %v4068_v55  ;;  %6990 = vst [vmem:[#allocation33_spill] sm:$0xff] %v4070_v56 }
 0x104   : > { %1277 = vmatmul.mubr.f32.gmra.mrb[60].mxu0 %v532_v25  ;;  %1463 = vmatmul.mubr.f32.gmra.mrb[60].mxu1 %v594_v26 }
 0x106   : > { %v4080_v61 = vpop.permute.xlu0 %874  ;;  %v4090_v2 = vpop.permute.xlu1 %879 }
 0x107   : > { %6991 = vst [vmem:[#allocation34_spill] sm:$0xff] %v4080_v61 }
 0x10a   : > { %v4100_v7 = vpop.permute.xlu0 %884  ;;  %v4110_v12 = vpop.permute.xlu1 %889 }
 0x10e   : > { %v4120_v17 = vpop.permute.xlu0 %894  ;;  %v4130_v22 = vpop.permute.xlu1 %899 }
 0x112   : > { %v4140_v53 = vpop.permute.xlu0 %904  ;;  %v4150_v47 = vpop.permute.xlu1 %909 }
 0x116   : > { %v4160_v54 = vpop.permute.xlu0 %914  ;;  %v4170_v52 = vpop.permute.xlu1 %919 }
 0x11a   : > { %v4180_v37 = vpop.permute.xlu0 %924 }
 0x15f   : > { %v4072_v57 = vpop.f32.mrb[0].mxu0  ;;  %v4074_v58 = vpop.f32.mrb[0].mxu1 }
 0x160   : > { %v4076_v59 = vpop.f32.mrb[1].mxu0  ;;  %v4078_v60 = vpop.f32.mrb[1].mxu1 }
 0x163   : > { %v4082_v62 = vpop.f32.mrb[2].mxu0  ;;  %v4084_v63 = vpop.f32.mrb[2].mxu1 }
 0x164   : > { %v4086_v0 = vpop.f32.mrb[3].mxu0  ;;  %v4088_v1 = vpop.f32.mrb[3].mxu1 }
 0x167   : > { %v4092_v3 = vpop.f32.mrb[4].mxu0  ;;  %v4094_v4 = vpop.f32.mrb[4].mxu1 }
 0x168   : > { %v4096_v5 = vpop.f32.mrb[5].mxu0  ;;  %v4098_v6 = vpop.f32.mrb[5].mxu1 }
 0x16b   : > { %v4102_v8 = vpop.f32.mrb[6].mxu0  ;;  %v4104_v9 = vpop.f32.mrb[6].mxu1 }
 0x16c   : > { %v4106_v10 = vpop.f32.mrb[7].mxu0  ;;  %v4108_v11 = vpop.f32.mrb[7].mxu1 }
 0x16f   : > { %v4112_v13 = vpop.f32.mrb[8].mxu0  ;;  %v4114_v14 = vpop.f32.mrb[8].mxu1 }
 0x170   : > { %v4116_v15 = vpop.f32.mrb[9].mxu0  ;;  %v4118_v16 = vpop.f32.mrb[9].mxu1 }
 0x173   : > { %v4122_v18 = vpop.f32.mrb[10].mxu0  ;;  %v4124_v19 = vpop.f32.mrb[10].mxu1 }
 0x174   : > { %v4126_v20 = vpop.f32.mrb[11].mxu0  ;;  %v4128_v21 = vpop.f32.mrb[11].mxu1 }
 0x177   : > { %v4132_v23 = vpop.f32.mrb[12].mxu0  ;;  %v4134_v24 = vpop.f32.mrb[12].mxu1 }
 0x178   : > { %v4136_v25 = vpop.f32.mrb[13].mxu0  ;;  %v4138_v26 = vpop.f32.mrb[13].mxu1 }
 0x17b   : > { %v4142_v61 = vpop.f32.mrb[14].mxu0  ;;  %v4144_v51 = vpop.f32.mrb[14].mxu1 }
 0x17c   : > { %v4146_v56 = vpop.f32.mrb[15].mxu0  ;;  %v4148_v49 = vpop.f32.mrb[15].mxu1 }
 0x17d   : > { %6992 = vst [vmem:[#allocation35_spill] sm:$0xff] %v4146_v56 }
 0x17f   : > { %v4152_v55 = vpop.f32.mrb[16].mxu0  ;;  %v4154_v50 = vpop.f32.mrb[16].mxu1 }
 0x180   : > { %6993 = vst [vmem:[#allocation36_spill] sm:$0xff] %v4152_v55  ;;  %v4156_v45 = vpop.f32.mrb[17].mxu0  ;;  %v4158_v48 = vpop.f32.mrb[17].mxu1 }
 0x181   : > { %6994 = vst [vmem:[#allocation37_spill] sm:$0xff] %v4156_v45  ;;  %6995 = vst [vmem:[#allocation38_spill] sm:$0xff] %v4158_v48  ;;  %v4190_v55 = vpop.permute.xlu1 %929 }
 0x183   : > { %v4162_v46 = vpop.f32.mrb[18].mxu0  ;;  %v4164_v43 = vpop.f32.mrb[18].mxu1 }
 0x184   : > { %6996 = vst [vmem:[#allocation39_spill] sm:$0xff] %v4162_v46  ;;  %v4166_v44 = vpop.f32.mrb[19].mxu0  ;;  %v4168_v42 = vpop.f32.mrb[19].mxu1 }
 0x185   : > { %6997 = vst [vmem:[#allocation40_spill] sm:$0xff] %v4166_v44  ;;  %6998 = vst [vmem:[#allocation41_spill] sm:$0xff] %v4168_v42 }
 0x187   : > { %v4172_v41 = vpop.f32.mrb[20].mxu0  ;;  %v4174_v40 = vpop.f32.mrb[20].mxu1 }
 0x188   : > { %6999 = vst [vmem:[#allocation42_spill] sm:$0xff] %v4172_v41  ;;  %v4176_v39 = vpop.f32.mrb[21].mxu0  ;;  %v4178_v38 = vpop.f32.mrb[21].mxu1 }
 0x189   : > { %7000 = vst [vmem:[#allocation43_spill] sm:$0xff] %v4176_v39  ;;  %7001 = vst [vmem:[#allocation44_spill] sm:$0xff] %v4178_v38  ;;  %v4200_v38 = vpop.permute.xlu0 %934 }
 0x18a   : > { %7010 = vst [vmem:[#allocation53_spill] sm:$0xff] %v4200_v38 }
 0x18b   : > { %v4182_v36 = vpop.f32.mrb[22].mxu0  ;;  %v4184_v46 = vpop.f32.mrb[22].mxu1 }
 0x18c   : > { %7002 = vst [vmem:[#allocation45_spill] sm:$0xff] %v4182_v36  ;;  %7003 = vst [vmem:[#allocation46_spill] sm:$0xff] %v4184_v46  ;;  %v4186_v45 = vpop.f32.mrb[23].mxu0  ;;  %v4188_v44 = vpop.f32.mrb[23].mxu1 }
 0x18d   : > { %7004 = vst [vmem:[#allocation47_spill] sm:$0xff] %v4186_v45  ;;  %7005 = vst [vmem:[#allocation48_spill] sm:$0xff] %v4188_v44  ;;  %v4210_v44 = vpop.permute.xlu1 %939 }
 0x18e   : > { %7015 = vst [vmem:[#allocation58_spill] sm:$0xff] %v4210_v44 }
 0x18f   : > { %v4192_v35 = vpop.f32.mrb[24].mxu0  ;;  %v4194_v41 = vpop.f32.mrb[24].mxu1 }
 0x190   : > { %7006 = vst [vmem:[#allocation49_spill] sm:$0xff] %v4192_v35  ;;  %7007 = vst [vmem:[#allocation50_spill] sm:$0xff] %v4194_v41  ;;  %v4196_v42 = vpop.f32.mrb[25].mxu0  ;;  %v4198_v39 = vpop.f32.mrb[25].mxu1 }
 0x191   : > { %7008 = vst [vmem:[#allocation51_spill] sm:$0xff] %v4196_v42  ;;  %7009 = vst [vmem:[#allocation52_spill] sm:$0xff] %v4198_v39  ;;  %v4220_v39 = vpop.permute.xlu0 %944 }
 0x193   : > { %v4202_v56 = vpop.f32.mrb[26].mxu0  ;;  %v4204_v36 = vpop.f32.mrb[26].mxu1 }
 0x194   : > { %7011 = vst [vmem:[#allocation54_spill] sm:$0xff] %v4202_v56  ;;  %7012 = vst [vmem:[#allocation55_spill] sm:$0xff] %v4204_v36  ;;  %v4206_v48 = vpop.f32.mrb[27].mxu0  ;;  %v4208_v45 = vpop.f32.mrb[27].mxu1 }
 0x195   : > { %7013 = vst [vmem:[#allocation56_spill] sm:$0xff] %v4206_v48  ;;  %7014 = vst [vmem:[#allocation57_spill] sm:$0xff] %v4208_v45  ;;  %v4230_v45 = vpop.permute.xlu1 %949 }
 0x197   : > { %v4212_v46 = vpop.f32.mrb[28].mxu0  ;;  %v4214_v35 = vpop.f32.mrb[28].mxu1 }
 0x198   : > { %7016 = vst [vmem:[#allocation59_spill] sm:$0xff] %v4212_v46  ;;  %7017 = vst [vmem:[#allocation60_spill] sm:$0xff] %v4214_v35  ;;  %v4216_v41 = vpop.f32.mrb[29].mxu0  ;;  %v4218_v42 = vpop.f32.mrb[29].mxu1 }
 0x199   : > { %7018 = vst [vmem:[#allocation61_spill] sm:$0xff] %v4216_v41  ;;  %7019 = vst [vmem:[#allocation62_spill] sm:$0xff] %v4218_v42  ;;  %v4242_v42 = vadd.f32 %v4084_v63, %v4100_v7 }
 0x19b   : > { %v4222_v38 = vpop.f32.mrb[30].mxu0  ;;  %v4224_v56 = vpop.f32.mrb[30].mxu1  ;;  %7028 = vst [vmem:[#allocation71_spill] sm:$0xff] %v4242_v42 }
 0x19c   : > { %7020 = vst [vmem:[#allocation63_spill] sm:$0xff] %v4222_v38  ;;  %7021 = vst [vmem:[#allocation64_spill] sm:$0xff] %v4224_v56  ;;  %v4226_v36 = vpop.f32.mrb[31].mxu0  ;;  %v4228_v48 = vpop.f32.mrb[31].mxu1  ;;  %v4266_v56 = vadd.f32 %v4104_v9, %v4120_v17 }
 0x19d   : > { %7022 = vst [vmem:[#allocation65_spill] sm:$0xff] %v4226_v36  ;;  %7023 = vst [vmem:[#allocation66_spill] sm:$0xff] %v4228_v48  ;;  %v4244_v38 = vpop.permute.xlu0 %954  ;;  %v4248_v36 = vadd.f32 %v4074_v58, %v4090_v2  ;;  %v4252_v48 = vadd.f32 %v4094_v4, %v4110_v12  ;;  %v4268_v58 = vpop.permute.xlu1 %959 }
 0x19e   : > { %7035 = vst [vmem:[#allocation78_spill] sm:$0xff] %v4266_v56 }
 0x19f   : > { %v4232_v44 = vpop.f32.mrb[32].mxu0  ;;  %v4234_v46 = vpop.f32.mrb[32].mxu1  ;;  %7029 = vst [vmem:[#allocation72_spill] sm:$0xff] %v4248_v36  ;;  %7030 = vst [vmem:[#allocation73_spill] sm:$0xff] %v4252_v48  ;;  %v1561_v63 = vmin.f32 %v4242_v42, %v4248_v36 }
 0x1a0   : > { %7024 = vst [vmem:[#allocation67_spill] sm:$0xff] %v4232_v44  ;;  %7025 = vst [vmem:[#allocation68_spill] sm:$0xff] %v4234_v46  ;;  %v4236_v35 = vpop.f32.mrb[33].mxu0  ;;  %v4238_v41 = vpop.f32.mrb[33].mxu1 }
 0x1a1   : > { %7026 = vst [vmem:[#allocation69_spill] sm:$0xff] %v4236_v35  ;;  %7027 = vst [vmem:[#allocation70_spill] sm:$0xff] %v4238_v41  ;;  %v1563_v4 = vmin.f32 %v1561_v63, %v4252_v48  ;;  %v4290_v63 = vadd.f32 %v4124_v19, %v4140_v53  ;;  %v4296_v48 = vadd.f32 %v4078_v60, %v4090_v2 }
 0x1a2   : > { %v4319_v2 = vadd.f32 %v4108_v11, %v4120_v17  ;;  %v4340_v11 = vadd.f32 %v4072_v57, %v4012_v27  ;;  %v4344_v17 = vadd.f32 %v4076_v59, %v4012_v27  ;;  %v4359_v57 = vadd.f32 %v4106_v10, %v4018_v30 }
 0x1a3   : > { %v4254_v44 = vpop.f32.mrb[34].mxu0  ;;  %v4256_v46 = vpop.f32.mrb[34].mxu1  ;;  %v1565_v36 = vmin.f32 %v1563_v4, %v4266_v56  ;;  %7039 = vst [vmem:[#allocation82_spill] sm:$0xff] %v4290_v63  ;;  %7040 = vst [vmem:[#allocation83_spill] sm:$0xff] %v4296_v48  ;;  %v4313_v56 = vadd.f32 %v4092_v3, %v4014_v28  ;;  %v4364_v27 = vadd.f32 %v4154_v50, %v4170_v52 }
 0x1a4   : > { %7031 = vst [vmem:[#allocation74_spill] sm:$0xff] %v4254_v44  ;;  %7032 = vst [vmem:[#allocation75_spill] sm:$0xff] %v4256_v46  ;;  %v4258_v35 = vpop.f32.mrb[35].mxu0  ;;  %v4260_v41 = vpop.f32.mrb[35].mxu1  ;;  %v4273_v44 = vadd.f32 %v4114_v14, %v4130_v22  ;;  %v4379_v10 = vadd.f32 %v4128_v21, %v4140_v53  ;;  %v4398_v53 = vadd.f32 %v4112_v13, %v4020_v31 }
 0x1a5   : > { %7033 = vst [vmem:[#allocation76_spill] sm:$0xff] %v4258_v35  ;;  %7034 = vst [vmem:[#allocation77_spill] sm:$0xff] %v4260_v41  ;;  %v4281_v41 = vadd.f32 %v4088_v1, %v4100_v7  ;;  %v4292_v14 = vpop.permute.xlu0 %964  ;;  %v4300_v1 = vadd.f32 %v4098_v6, %v4110_v12  ;;  %v4327_v12 = vadd.f32 %v4096_v5, %v4014_v28  ;;  %v4346_v28 = vpop.permute.xlu1 %969 }
 0x1a6   : > { %7036 = vst [vmem:[#allocation79_spill] sm:$0xff] %v4273_v44  ;;  %v1567_v7 = vmin.f32 %v1565_v36, %v4273_v44  ;;  %7043 = vst [vmem:[#allocation86_spill] sm:$0xff] %v4313_v56  ;;  %v4402_v21 = vadd.f32 %v4116_v15, %v4020_v31 }
 0x1a7   : > { %v4275_v46 = vpop.f32.mrb[36].mxu0  ;;  %v4277_v35 = vpop.f32.mrb[36].mxu1  ;;  %7037 = vst [vmem:[#allocation80_spill] sm:$0xff] %v4281_v41  ;;  %7041 = vst [vmem:[#allocation84_spill] sm:$0xff] %v4300_v1  ;;  %v1628_v60 = vmin.f32 %v4281_v41, %v4296_v48  ;;  %v4336_v41 = vadd.f32 %v4144_v51, %v4160_v54  ;;  %v4355_v51 = vadd.f32 %v4082_v62, %v4016_v29 }
 0x1a8   : > { %v4283_v42 = vpop.f32.mrb[37].mxu0  ;;  %v4285_v9 = vpop.f32.mrb[37].mxu1  ;;  %7044 = vst [vmem:[#allocation87_spill] sm:$0xff] %v4319_v2  ;;  %7045 = vst [vmem:[#allocation88_spill] sm:$0xff] %v4327_v12  ;;  %v1569_v3 = vmin.f32 %v1567_v7, %v4290_v63  ;;  %v1532_v62 = vmin.f32 %v4340_v11, %v4313_v56  ;;  %v4407_v48 = vadd.f32 %v4138_v26, %v4150_v47 }
 0x1a9   : > { %7038 = vst [vmem:[#allocation81_spill] sm:$0xff] %v4283_v42  ;;  %v4305_v42 = vadd.f32 %v4134_v24, %v4150_v47  ;;  %v4331_v24 = vadd.f32 %v4102_v8, %v4018_v30  ;;  %7047 = vst [vmem:[#allocation90_spill] sm:$0xff] %v4336_v41  ;;  %v1630_v5 = vmin.f32 %v1628_v60, %v4300_v1 }
 0x1aa   : > { %7048 = vst [vmem:[#allocation91_spill] sm:$0xff] %v4340_v11  ;;  %7049 = vst [vmem:[#allocation92_spill] sm:$0xff] %v4344_v17  ;;  %v4351_v8 = vadd.f32 %v4118_v16, %v4130_v22  ;;  %v4372_v16 = vadd.f32 %v4086_v0, %v4016_v29  ;;  %v4392_v1 = vadd.f32 %v4164_v43, %v4180_v37 }
 0x1ab   : > { %7042 = vst [vmem:[#allocation85_spill] sm:$0xff] %v4305_v42  ;;  %v4307_v4 = vpop.f32.mrb[38].mxu0  ;;  %v4309_v19 = vpop.f32.mrb[38].mxu1  ;;  %7046 = vst [vmem:[#allocation89_spill] sm:$0xff] %v4331_v24  ;;  %v1571_v7 = vmin.f32 %v1569_v3, %v4305_v42  ;;  %v1632_v30 = vmin.f32 %v1630_v5, %v4319_v2  ;;  %v1599_v3 = vmin.f32 %v4344_v17, %v4327_v12 }
 0x1ac   : > { %v4321_v36 = vpop.f32.mrb[39].mxu0  ;;  %v4323_v6 = vpop.f32.mrb[39].mxu1  ;;  %7050 = vst [vmem:[#allocation93_spill] sm:$0xff] %v4351_v8  ;;  %7051 = vst [vmem:[#allocation94_spill] sm:$0xff] %v4355_v51  ;;  %v1533_v29 = vmin.f32 %v4355_v51, %v4331_v24  ;;  %v1600_v43 = vmin.f32 %v4372_v16, %v4359_v57  ;;  %v4418_v12 = vadd.f32 %v4174_v40, %v4190_v55 }
 0x1ad   : > { %7052 = vst [vmem:[#allocation95_spill] sm:$0xff] %v4359_v57  ;;  %7053 = vst [vmem:[#allocation96_spill] sm:$0xff] %v4364_v27  ;;  %v1573_v0 = vmin.f32 %v1571_v7, %v4336_v41  ;;  %v4394_v5 = vpop.permute.xlu0 %974  ;;  %v1634_v2 = vmin.f32 %v1632_v30, %v4351_v8  ;;  %v4413_v7 = vadd.f32 %v4122_v18, %v4022_v32 }
 0x1ae   : > { %7054 = vst [vmem:[#allocation97_spill] sm:$0xff] %v4372_v16  ;;  %7055 = vst [vmem:[#allocation98_spill] sm:$0xff] %v4379_v10  ;;  %v4426_v47 = vadd.f32 %v4126_v20, %v4022_v32  ;;  %v4430_v26 = vadd.f32 %v4132_v23, %v4024_v33  ;;  %v4435_v30 = vadd.f32 %v4148_v49, %v4160_v54  ;;  %v7068_v23 = vld [vmem:[#allocation53_spill] sm:$0xff]  ;;  %v4454_v49 = vpop.permute.xlu1 %979 }
 0x1af   : > { %v4366_v59 = vpop.f32.mrb[40].mxu0  ;;  %v4368_v60 = vpop.f32.mrb[40].mxu1  ;;  %7056 = vst [vmem:[#allocation99_spill] sm:$0xff] %v4392_v1  ;;  %7057 = vst [vmem:[#allocation100_spill] sm:$0xff] %v4398_v53  ;;  %v1562_v13 = vmin.f32 %v4364_v27, %v1573_v0  ;;  %v1636_v18 = vmin.f32 %v1634_v2, %v4379_v10  ;;  %v4443_v8 = vadd.f32 %v4136_v25, %v4024_v33  ;;  %v7069_v2 = vld [vmem:[#allocation46_spill] sm:$0xff] }
 0x1b0   : > { %v4381_v22 = vpop.f32.mrb[41].mxu0  ;;  %v4383_v50 = vpop.f32.mrb[41].mxu1  ;;  %7058 = vst [vmem:[#allocation101_spill] sm:$0xff] %v4402_v21  ;;  %7059 = vst [vmem:[#allocation102_spill] sm:$0xff] %v4407_v48  ;;  %v4447_v32 = vadd.f32 %v4142_v61, %v4026_v34  ;;  %v4452_v10 = vadd.f32 %v7069_v2, %v7068_v23  ;;  %v1534_v54 = vmin.f32 %v1532_v62, %v4398_v53  ;;  %v7071_v33 = vld [vmem:[#allocation38_spill] sm:$0xff] }
 0x1b1   : > { %7060 = vst [vmem:[#allocation103_spill] sm:$0xff] %v4413_v7  ;;  %7061 = vst [vmem:[#allocation104_spill] sm:$0xff] %v4418_v12  ;;  %v1564_v20 = vmin.f32 %v1562_v13, %v4392_v1  ;;  %v1601_v57 = vmin.f32 %v1599_v3, %v4402_v21  ;;  %v1638_v16 = vmin.f32 %v1636_v18, %v4407_v48  ;;  %v7073_v13 = vld [vmem:[#allocation35_spill] sm:$0xff]  ;;  %v7075_v1 = vld [vmem:[#allocation58_spill] sm:$0xff] }
 0x1b2   : > { %7062 = vst [vmem:[#allocation105_spill] sm:$0xff] %v4426_v47  ;;  %7063 = vst [vmem:[#allocation106_spill] sm:$0xff] %v4430_v26  ;;  %v4461_v25 = vadd.f32 %v7071_v33, %v4170_v52  ;;  %v1535_v61 = vmin.f32 %v1533_v29, %v4413_v7  ;;  %v4466_v17 = vadd.f32 %v7073_v13, %v4026_v34  ;;  %v7076_v27 = vld [vmem:[#allocation50_spill] sm:$0xff]  ;;  %v7078_v33 = vld [vmem:[#allocation41_spill] sm:$0xff] }
 0x1b3   : > { %v4420_v31 = vpop.f32.mrb[42].mxu0  ;;  %v4422_v15 = vpop.f32.mrb[42].mxu1  ;;  %7064 = vst [vmem:[#allocation107_spill] sm:$0xff] %v4435_v30  ;;  %7066 = vst [vmem:[#allocation109_spill] sm:$0xff] %v4443_v8  ;;  %v1566_v2 = vmin.f32 %v1564_v20, %v4418_v12  ;;  %v4471_v41 = vadd.f32 %v7076_v27, %v7075_v1  ;;  %v1602_v18 = vmin.f32 %v1600_v43, %v4426_v47  ;;  %v7080_v43 = vld [vmem:[#allocation55_spill] sm:$0xff] }
 0x1b4   : > { %v4437_v40 = vpop.f32.mrb[43].mxu0  ;;  %v4439_v0 = vpop.f32.mrb[43].mxu1  ;;  %7067 = vst [vmem:[#allocation110_spill] sm:$0xff] %v4447_v32  ;;  %7070 = vst [vmem:[#allocation53_spill] sm:$0xff] %v4452_v10  ;;  %v1536_v52 = vmin.f32 %v1534_v54, %v4430_v26  ;;  %v1640_v29 = vmin.f32 %v1638_v16, %v4435_v30  ;;  %v4482_v34 = vadd.f32 %v7078_v33, %v4180_v37  ;;  %v7082_v16 = vld [vmem:[#allocation12_spill] sm:$0xff]  ;;  %v7085_v33 = vld [vmem:[#allocation37_spill] sm:$0xff] }
 0x1b5   : > { %7065 = vst [vmem:[#allocation108_spill] sm:$0xff] %v4437_v40  ;;  %7072 = vst [vmem:[#allocation46_spill] sm:$0xff] %v4461_v25  ;;  %v1603_v27 = vmin.f32 %v1601_v57, %v4443_v8  ;;  %v1537_v48 = vmin.f32 %v1535_v61, %v4447_v32  ;;  %v1568_v21 = vmin.f32 %v1566_v2, %v4452_v10  ;;  %v4495_v54 = vpop.permute.xlu0 %984  ;;  %v7083_v30 = vld [vmem:[#allocation36_spill] sm:$0xff]  ;;  %v7087_v8 = vld [vmem:[#allocation13_spill] sm:$0xff] }
 0x1b6   : > { %7074 = vst [vmem:[#allocation38_spill] sm:$0xff] %v4466_v17  ;;  %7077 = vst [vmem:[#allocation35_spill] sm:$0xff] %v4471_v41  ;;  %v4493_v47 = vadd.f32 %v7080_v43, %v4220_v39  ;;  %v4499_v37 = vadd.f32 %v7083_v30, %v7082_v16  ;;  %v4503_v12 = vadd.f32 %v7085_v33, %v7082_v16  ;;  %v7088_v61 = vld [vmem:[#allocation39_spill] sm:$0xff]  ;;  %v7090_v43 = vld [vmem:[#allocation44_spill] sm:$0xff] }
 0x1b7   : > { %v4473_v62 = vpop.f32.mrb[44].mxu0  ;;  %v4475_v3 = vpop.f32.mrb[44].mxu1  ;;  %7079 = vst [vmem:[#allocation58_spill] sm:$0xff] %v4482_v34  ;;  %v1627_v57 = vmin.f32 %v4461_v25, %v1640_v29  ;;  %v4508_v42 = vadd.f32 %v7088_v61, %v7087_v8  ;;  %v1604_v2 = vmin.f32 %v1602_v18, %v4466_v17  ;;  %v4513_v10 = vadd.f32 %v7090_v43, %v4190_v55  ;;  %v7092_v30 = vld [vmem:[#allocation60_spill] sm:$0xff]  ;;  %v7096_v25 = vld [vmem:[#allocation14_spill] sm:$0xff]  ;;  %v7102_v32 = vld [vmem:[#allocation15_spill] sm:$0xff] }
 0x1b8   : > { %v4484_v13 = vpop.f32.mrb[45].mxu0  ;;  %v4486_v20 = vpop.f32.mrb[45].mxu1  ;;  %7081 = vst [vmem:[#allocation50_spill] sm:$0xff] %v4493_v47  ;;  %7084 = vst [vmem:[#allocation41_spill] sm:$0xff] %v4499_v37  ;;  %v1570_v63 = vmin.f32 %v1568_v21, %v4471_v41  ;;  %v4518_v44 = vadd.f32 %v7092_v30, %v4230_v45  ;;  %v7094_v29 = vld [vmem:[#allocation40_spill] sm:$0xff]  ;;  %v7097_v17 = vld [vmem:[#allocation42_spill] sm:$0xff]  ;;  %v1605_v53 = vmin.f32 %v1603_v27, %v4503_v12 }
 0x1b9   : > { %7086 = vst [vmem:[#allocation55_spill] sm:$0xff] %v4503_v12  ;;  %7089 = vst [vmem:[#allocation12_spill] sm:$0xff] %v4508_v42  ;;  %v4526_v61 = vadd.f32 %v7094_v29, %v7087_v8  ;;  %v1629_v18 = vmin.f32 %v1627_v57, %v4482_v34  ;;  %v4531_v55 = vadd.f32 %v7097_v17, %v7096_v25  ;;  %v7099_v21 = vld [vmem:[#allocation43_spill] sm:$0xff]  ;;  %v7103_v26 = vld [vmem:[#allocation45_spill] sm:$0xff] }
 0x1ba   : > { %7091 = vst [vmem:[#allocation36_spill] sm:$0xff] %v4513_v10  ;;  %7093 = vst [vmem:[#allocation37_spill] sm:$0xff] %v4518_v44  ;;  %v4535_v43 = vadd.f32 %v7099_v21, %v7096_v25  ;;  %v4543_v7 = vadd.f32 %v7103_v26, %v7102_v32  ;;  %v7105_v8 = vld [vmem:[#allocation48_spill] sm:$0xff]  ;;  %v1572_v57 = vmin.f32 %v1570_v63, %v4493_v47  ;;  %v4554_v25 = vpop.permute.xlu1 %989  ;;  %v7109_v26 = vld [vmem:[#allocation47_spill] sm:$0xff] }
 0x1bb   : > { %v4520_v16 = vpop.f32.mrb[46].mxu0  ;;  %v4522_v33 = vpop.f32.mrb[46].mxu1  ;;  %7095 = vst [vmem:[#allocation13_spill] sm:$0xff] %v4526_v61  ;;  %7098 = vst [vmem:[#allocation39_spill] sm:$0xff] %v4531_v55  ;;  %v4547_v29 = vadd.f32 %v7105_v8, %v7068_v23  ;;  %v7107_v17 = vld [vmem:[#allocation64_spill] sm:$0xff]  ;;  %v1538_v21 = vmin.f32 %v1536_v52, %v4499_v37  ;;  %v1539_v24 = vmin.f32 %v1537_v48, %v4508_v42  ;;  %v7138_v37 = vld [vmem:[#allocation61_spill] sm:$0xff] }
 0x1bc   : > { %7100 = vst [vmem:[#allocation44_spill] sm:$0xff] %v4535_v43  ;;  %v4537_v30 = vpop.f32.mrb[47].mxu0  ;;  %v4539_v41 = vpop.f32.mrb[47].mxu1  ;;  %7104 = vst [vmem:[#allocation40_spill] sm:$0xff] %v4543_v7  ;;  %v4552_v34 = vadd.f32 %v7107_v17, %v4244_v38  ;;  %v4561_v56 = vadd.f32 %v7109_v26, %v7102_v32  ;;  %v1631_v23 = vmin.f32 %v1629_v18, %v4513_v10  ;;  %v7111_v63 = vld [vmem:[#allocation52_spill] sm:$0xff]  ;;  %v7115_v10 = vld [vmem:[#allocation75_spill] sm:$0xff] }
 0x1bd   : > { %7101 = vst [vmem:[#allocation60_spill] sm:$0xff] %v4537_v30  ;;  %7106 = vst [vmem:[#allocation14_spill] sm:$0xff] %v4547_v29  ;;  %v4566_v8 = vadd.f32 %v7111_v63, %v7075_v1  ;;  %v1574_v17 = vmin.f32 %v1572_v57, %v4518_v44  ;;  %v7113_v47 = vld [vmem:[#allocation68_spill] sm:$0xff]  ;;  %v1606_v48 = vmin.f32 %v1604_v2, %v4526_v61  ;;  %v4591_v44 = vpop.permute.xlu0 %994  ;;  %v7120_v61 = vld [vmem:[#allocation51_spill] sm:$0xff] }
 0x1be   : > { %7108 = vst [vmem:[#allocation42_spill] sm:$0xff] %v4552_v34  ;;  %7110 = vst [vmem:[#allocation43_spill] sm:$0xff] %v4561_v56  ;;  %v4571_v51 = vadd.f32 %v7113_v47, %v4268_v58  ;;  %v1540_v32 = vmin.f32 %v1538_v21, %v4531_v55  ;;  %v1607_v18 = vmin.f32 %v1605_v53, %v4535_v43  ;;  %v7117_v21 = vld [vmem:[#allocation16_spill] sm:$0xff]  ;;  %v7118_v53 = vld [vmem:[#allocation49_spill] sm:$0xff] }
 0x1bf   : > { %7112 = vst [vmem:[#allocation15_spill] sm:$0xff] %v4566_v8  ;;  %v4573_v52 = vpop.f32.mrb[48].mxu0  ;;  %v4575_v27 = vpop.f32.mrb[48].mxu1  ;;  %v1541_v57 = vmin.f32 %v1539_v24, %v4543_v7  ;;  %v1633_v63 = vmin.f32 %v1631_v23, %v4547_v29  ;;  %v1576_v47 = vmin.f32 %v1574_v17, %v4552_v34  ;;  %v4589_v12 = vadd.f32 %v7115_v10, %v4292_v14  ;;  %v7122_v24 = vld [vmem:[#allocation57_spill] sm:$0xff]  ;;  %v7125_v29 = vld [vmem:[#allocation54_spill] sm:$0xff]  ;;  %v7142_v30 = vld [vmem:[#allocation19_spill] sm:$0xff] }
 0x1c0   : > { %7114 = vst [vmem:[#allocation45_spill] sm:$0xff] %v4571_v51  ;;  %v4580_v26 = vpop.f32.mrb[49].mxu0  ;;  %v4582_v1 = vpop.f32.mrb[49].mxu1  ;;  %v1608_v2 = vmin.f32 %v1606_v48, %v4561_v56  ;;  %v4596_v43 = vadd.f32 %v7118_v53, %v7117_v21  ;;  %v4600_v55 = vadd.f32 %v7120_v61, %v7117_v21  ;;  %v4604_v23 = vadd.f32 %v7122_v24, %v4220_v39  ;;  %v7124_v10 = vld [vmem:[#allocation17_spill] sm:$0xff]  ;;  %v7128_v61 = vld [vmem:[#allocation56_spill] sm:$0xff]  ;;  %v7130_v39 = vld [vmem:[#allocation18_spill] sm:$0xff] }
 0x1c1   : > { %7116 = vst [vmem:[#allocation48_spill] sm:$0xff] %v4589_v12  ;;  %v1635_v17 = vmin.f32 %v1633_v63, %v4566_v8  ;;  %v4609_v34 = vadd.f32 %v7125_v29, %v7124_v10  ;;  %v1575_v48 = vmin.f32 %v4571_v51, %v1576_v47  ;;  %v4614_v53 = vadd.f32 %v4277_v35, %v4346_v28  ;;  %v7131_v24 = vld [vmem:[#allocation59_spill] sm:$0xff]  ;;  %v7133_v29 = vld [vmem:[#allocation62_spill] sm:$0xff]  ;;  %v7135_v47 = vld [vmem:[#allocation29_spill] sm:$0xff] }
 0x1c2   : > { %7119 = vst [vmem:[#allocation64_spill] sm:$0xff] %v4596_v43  ;;  %7121 = vst [vmem:[#allocation47_spill] sm:$0xff] %v4600_v55  ;;  %v4620_v21 = vadd.f32 %v7128_v61, %v7124_v10  ;;  %v4624_v63 = vadd.f32 %v7131_v24, %v7130_v39  ;;  %v4628_v8 = vadd.f32 %v7133_v29, %v4230_v45  ;;  %v4647_v45 = vpop.permute.xlu1 %999  ;;  %v7143_v40 = vld [vmem:[#allocation63_spill] sm:$0xff] }
 0x1c3   : > { %7123 = vst [vmem:[#allocation52_spill] sm:$0xff] %v4604_v23  ;;  %7126 = vst [vmem:[#allocation68_spill] sm:$0xff] %v4609_v34  ;;  %v1248_v56 = vpop.f32.mrb[50].mxu0  ;;  %v4616_v7 = vpop.f32.mrb[50].mxu1  ;;  %v4637_v11 = vadd.f32 %v7138_v37, %v7130_v39  ;;  %v1577_v10 = vmin.f32 %v1575_v48, %v4589_v12  ;;  %v4642_v61 = vadd.f32 %v4309_v19, %v4394_v5  ;;  %v7145_v37 = vld [vmem:[#allocation66_spill] sm:$0xff] }
 0x1c4   : > { %7127 = vst [vmem:[#allocation75_spill] sm:$0xff] %v4614_v53  ;;  %7129 = vst [vmem:[#allocation16_spill] sm:$0xff] %v4620_v21  ;;  %v4631_v51 = vadd.f32 %v1248_v56, %v7135_v47  ;;  %v1250_v35 = vpop.f32.mrb[51].mxu0  ;;  %v4633_v42 = vpop.f32.mrb[51].mxu1  ;;  %v1542_v56 = vmin.f32 %v1540_v32, %v4596_v43  ;;  %v1637_v29 = vmin.f32 %v1635_v17, %v4604_v23 }
 0x1c5   : > { %7132 = vst [vmem:[#allocation49_spill] sm:$0xff] %v4624_v63  ;;  %7134 = vst [vmem:[#allocation51_spill] sm:$0xff] %v4628_v8  ;;  %v4645_v24 = vadd.f32 %v1250_v35, %v7135_v47  ;;  %v4657_v48 = vadd.f32 %v7145_v37, %v4244_v38  ;;  %v1609_v19 = vmin.f32 %v1607_v18, %v4600_v55  ;;  %v7148_v38 = vld [vmem:[#allocation70_spill] sm:$0xff]  ;;  %v7150_v18 = vld [vmem:[#allocation21_spill] sm:$0xff] }
 0x1c6   : > { %7136 = vst [vmem:[#allocation57_spill] sm:$0xff] %v4631_v51  ;;  %7137 = vst [vmem:[#allocation17_spill] sm:$0xff] %v4633_v42  ;;  %v4653_v42 = vadd.f32 %v7143_v40, %v7142_v30  ;;  %v1543_v39 = vmin.f32 %v1541_v57, %v4609_v34  ;;  %v1578_v47 = vmin.f32 %v4614_v53, %v1577_v10  ;;  %v7151_v57 = vld [vmem:[#allocation74_spill] sm:$0xff] }
 0x1c7   : > { %7139 = vst [vmem:[#allocation54_spill] sm:$0xff] %v4637_v11  ;;  %7140 = vst [vmem:[#allocation56_spill] sm:$0xff] %v4642_v61  ;;  %v4664_v35 = vadd.f32 %v4368_v60, %v4454_v49  ;;  %v4666_v32 = vpop.f32.mrb[52].mxu0  ;;  %v1440_v17 = vpop.f32.mrb[52].mxu1  ;;  %v4669_v40 = vmin.f32 %v1608_v2, %v4620_v21  ;;  %v1639_v23 = vmin.f32 %v1637_v29, %v4628_v8 }
 0x1c8   : > { %7141 = vst [vmem:[#allocation18_spill] sm:$0xff] %v4645_v24  ;;  %7144 = vst [vmem:[#allocation59_spill] sm:$0xff] %v4653_v42  ;;  %v4674_v37 = vadd.f32 %v7148_v38, %v4268_v58  ;;  %v4678_v55 = vadd.f32 %v7151_v57, %v7150_v18  ;;  %v4680_v10 = vpop.f32.mrb[53].mxu0  ;;  %v4682_v60 = vpop.f32.mrb[53].mxu1  ;;  %v1544_v53 = vmin.f32 %v1542_v56, %v4624_v63  ;;  %v7154_v57 = vld [vmem:[#allocation65_spill] sm:$0xff] }
 0x1c9   : > { %7146 = vst [vmem:[#allocation62_spill] sm:$0xff] %v4657_v48  ;;  %7147 = vst [vmem:[#allocation29_spill] sm:$0xff] %v4664_v35  ;;  %v1611_v12 = vmin.f32 %v1609_v19, %v4637_v11  ;;  %v1579_v2 = vmin.f32 %v4642_v61, %v1578_v47  ;;  %v4689_v29 = vadd.f32 %v4422_v15, %v4495_v54  ;;  %v4691_v58 = vpop.permute.xlu0 %1004  ;;  %v7156_v56 = vld [vmem:[#allocation77_spill] sm:$0xff]  ;;  %v7158_v19 = vld [vmem:[#allocation20_spill] sm:$0xff] }
 0x1ca   : > { %7149 = vst [vmem:[#allocation61_spill] sm:$0xff] %v4674_v37  ;;  %7152 = vst [vmem:[#allocation19_spill] sm:$0xff] %v4678_v55  ;;  %v1545_v38 = vmin.f32 %v1543_v39, %v4653_v42  ;;  %v4696_v8 = vadd.f32 %v7154_v57, %v7142_v30  ;;  %v1641_v21 = vmin.f32 %v1639_v23, %v4657_v48  ;;  %v7159_v47 = vld [vmem:[#allocation67_spill] sm:$0xff] }
 0x1cb   : > { %7153 = vst [vmem:[#allocation63_spill] sm:$0xff] %v4689_v29  ;;  %v4701_v63 = vadd.f32 %v7156_v56, %v4292_v14  ;;  %v4705_v11 = vadd.f32 %v7159_v47, %v7158_v19  ;;  %v7161_v15 = vld [vmem:[#allocation23_spill] sm:$0xff]  ;;  %v1580_v39 = vmin.f32 %v4664_v35, %v1579_v2  ;;  %v4714_v30 = vadd.f32 %v4475_v3, %v4554_v25  ;;  %v1260_v57 = vpop.f32.mrb[54].mxu0  ;;  %v1446_v23 = vpop.f32.mrb[54].mxu1  ;;  %v7167_v2 = vld [vmem:[#allocation25_spill] sm:$0xff] }
 0x1cc   : > { %7155 = vst [vmem:[#allocation66_spill] sm:$0xff] %v4696_v8  ;;  %v4709_v61 = vadd.f32 %v4307_v4, %v7161_v15  ;;  %v1643_v48 = vmin.f32 %v1641_v21, %v4674_v37  ;;  %v1547_v14 = vmin.f32 %v1545_v38, %v4678_v55  ;;  %v4720_v56 = vadd.f32 %v4285_v9, %v4346_v28  ;;  %v7165_v47 = vld [vmem:[#allocation31_spill] sm:$0xff]  ;;  %v1262_v4 = vpop.f32.mrb[55].mxu0  ;;  %v4725_v34 = vpop.f32.mrb[55].mxu1  ;;  %v7171_v28 = vld [vmem:[#allocation69_spill] sm:$0xff]  ;;  %v7173_v55 = vld [vmem:[#allocation22_spill] sm:$0xff] }
 0x1cd   : > { %7157 = vst [vmem:[#allocation70_spill] sm:$0xff] %v4701_v63  ;;  %7160 = vst [vmem:[#allocation21_spill] sm:$0xff] %v4705_v11  ;;  %v4723_v42 = vadd.f32 %v1260_v57, %v7165_v47  ;;  %v4729_v3 = vadd.f32 %v4420_v31, %v7167_v2  ;;  %v1581_v35 = vmin.f32 %v4689_v29, %v1580_v39  ;;  %v4739_v9 = vpop.permute.xlu1 %1009 }
 0x1ce   : > { %7162 = vst [vmem:[#allocation74_spill] sm:$0xff] %v4709_v61  ;;  %7163 = vst [vmem:[#allocation65_spill] sm:$0xff] %v4714_v30  ;;  %v4734_v21 = vadd.f32 %v4522_v33, %v4591_v44  ;;  %v4737_v38 = vadd.f32 %v1262_v4, %v7165_v47  ;;  %v4743_v57 = vadd.f32 %v7171_v28, %v7158_v19  ;;  %v7176_v4 = vld [vmem:[#allocation27_spill] sm:$0xff] }
 0x1cf   : > { %7164 = vst [vmem:[#allocation77_spill] sm:$0xff] %v4720_v56  ;;  %7166 = vst [vmem:[#allocation20_spill] sm:$0xff] %v4723_v42  ;;  %v1642_v37 = vmin.f32 %v4701_v63, %v1643_v48  ;;  %v4748_v31 = vadd.f32 %v4275_v46, %v7173_v55  ;;  %v4752_v39 = vadd.f32 %v4323_v6, %v4394_v5  ;;  %v1266_v48 = vpop.f32.mrb[56].mxu0  ;;  %v1452_v28 = vpop.f32.mrb[56].mxu1  ;;  %v7179_v46 = vld [vmem:[#allocation81_spill] sm:$0xff] }
 0x1d0   : > { %7168 = vst [vmem:[#allocation67_spill] sm:$0xff] %v4729_v3  ;;  %7169 = vst [vmem:[#allocation23_spill] sm:$0xff] %v4734_v21  ;;  %v1549_v33 = vmin.f32 %v1547_v14, %v4709_v61  ;;  %v1582_v47 = vmin.f32 %v4714_v30, %v1581_v35  ;;  %v4758_v29 = vadd.f32 %v4520_v16, %v7176_v4  ;;  %v7182_v35 = vld [vmem:[#allocation32_spill] sm:$0xff]  ;;  %v4776_v16 = vpop.f32.mrb[57].mxu0  ;;  %v4778_v30 = vpop.f32.mrb[57].mxu1 }
 0x1d1   : > { %7170 = vst [vmem:[#allocation31_spill] sm:$0xff] %v4737_v38  ;;  %7172 = vst [vmem:[#allocation25_spill] sm:$0xff] %v4743_v57  ;;  %v4762_v19 = vadd.f32 %v4575_v27, %v4647_v45  ;;  %v4766_v63 = vadd.f32 %v7179_v46, %v7173_v55  ;;  %v1644_v6 = vmin.f32 %v1642_v37, %v4720_v56  ;;  %v4787_v46 = vpop.permute.xlu0 %1014 }
 0x1d2   : > { %7174 = vst [vmem:[#allocation69_spill] sm:$0xff] %v4748_v31  ;;  %7175 = vst [vmem:[#allocation22_spill] sm:$0xff] %v4752_v39  ;;  %v4771_v5 = vadd.f32 %v4383_v50, %v4454_v49  ;;  %v4774_v14 = vadd.f32 %v1266_v48, %v7182_v35  ;;  %v1546_v27 = vmin.f32 %v1544_v53, %v4705_v11  ;;  %v7185_v48 = vld [vmem:[#allocation24_spill] sm:$0xff] }
 0x1d3   : > { %7177 = vst [vmem:[#allocation27_spill] sm:$0xff] %v4758_v29  ;;  %7178 = vst [vmem:[#allocation111_spill] sm:$0xff] %v4762_v19  ;;  %v1551_v61 = vmin.f32 %v1549_v33, %v4729_v3  ;;  %v1583_v55 = vmin.f32 %v4734_v21, %v1582_v47  ;;  %v4785_v37 = vadd.f32 %v4616_v7, %v4691_v58  ;;  %v7188_v33 = vld [vmem:[#allocation76_spill] sm:$0xff] }
 0x1d4   : > { %7180 = vst [vmem:[#allocation81_spill] sm:$0xff] %v4766_v63  ;;  %7181 = vst [vmem:[#allocation112_spill] sm:$0xff] %v4771_v5  ;;  %v1613_v50 = vmin.f32 %v1611_v12, %v4743_v57  ;;  %v1645_v49 = vmin.f32 %v4752_v39, %v1644_v6  ;;  %v4793_v56 = vadd.f32 %v4366_v59, %v7185_v48  ;;  %v1272_v6 = vpop.f32.mrb[58].mxu0  ;;  %v1458_v39 = vpop.f32.mrb[58].mxu1 }
 0x1d5   : > { %7183 = vst [vmem:[#allocation32_spill] sm:$0xff] %v4774_v14  ;;  %7184 = vst [vmem:[#allocation113_spill] sm:$0xff] %v4785_v37  ;;  %v4797_v53 = vadd.f32 %v4439_v0, %v4495_v54  ;;  %v4801_v47 = vadd.f32 %v7188_v33, %v7150_v18  ;;  %v1553_v7 = vmin.f32 %v1551_v61, %v4758_v29  ;;  %v7191_v54 = vld [vmem:[#allocation26_spill] sm:$0xff]  ;;  %v4815_v18 = vpop.f32.mrb[59].mxu0  ;;  %v4817_v61 = vpop.f32.mrb[59].mxu1 }
 0x1d6   : > { %7186 = vst [vmem:[#allocation24_spill] sm:$0xff] %v4793_v56  ;;  %v1584_v21 = vmin.f32 %v4762_v19, %v1583_v55  ;;  %v4806_v12 = vadd.f32 %v1440_v17, %v4739_v9  ;;  %v1548_v59 = vmin.f32 %v1546_v27, %v4748_v31  ;;  %v1615_v57 = vmin.f32 %v1613_v50, %v4766_v63  ;;  %v7194_v27 = vld [vmem:[#allocation33_spill] sm:$0xff]  ;;  %v4827_v50 = vpop.permute.xlu1 %1019 }
 0x1d7   : > { %7187 = vst [vmem:[#allocation114_spill] sm:$0xff] %v4797_v53  ;;  %7189 = vst [vmem:[#allocation76_spill] sm:$0xff] %v4801_v47  ;;  %v1646_v0 = vmin.f32 %v4771_v5, %v1645_v49  ;;  %v4813_v3 = vadd.f32 %v4473_v62, %v7191_v54  ;;  %v1555_v55 = vmin.f32 %v1553_v7, %v4631_v51 }
 0x1d8   : > { %7190 = vst [vmem:[#allocation115_spill] sm:$0xff] %v4806_v12  ;;  %v1585_v17 = vmin.f32 %v4785_v37, %v1584_v21  ;;  %v4822_v33 = vadd.f32 %v1446_v23, %v4787_v46  ;;  %v4825_v19 = vadd.f32 %v1272_v6, %v7194_v27  ;;  %v1550_v49 = vmin.f32 %v1548_v59, %v4793_v56  ;;  %v7198_v21 = vld [vmem:[#allocation28_spill] sm:$0xff]  ;;  %v1278_v37 = vpop.f32.mrb[60].mxu0 }
 0x1d9   : > { %7192 = vst [vmem:[#allocation26_spill] sm:$0xff] %v4813_v3  ;;  %v4832_v62 = vadd.f32 %v4381_v22, %v7185_v48  ;;  %v1647_v5 = vmin.f32 %v4797_v53, %v1646_v0  ;;  %v4837_v7 = vadd.f32 %v4486_v20, %v4554_v25  ;;  %v4841_v23 = vadd.f32 %v4573_v52, %v7198_v21  ;;  %v1464_v22 = vpop.f32.mrb[60].mxu1  ;;  %v7203_v25 = vld [vmem:[#allocation34_spill] sm:$0xff] }
 0x1da   : > { %7193 = vst [vmem:[#allocation116_spill] sm:$0xff] %v4822_v33  ;;  %7195 = vst [vmem:[#allocation33_spill] sm:$0xff] %v4825_v19  ;;  %v1586_v6 = vmin.f32 %v4806_v12, %v1585_v17  ;;  %v1557_v63 = vmin.f32 %v1555_v55, %v4723_v42  ;;  %v4846_v59 = vadd.f32 %v1452_v28, %v4827_v50  ;;  %v1280_v17 = vpop.f32.mrb[61].mxu0  ;;  %v1466_v55 = vpop.f32.mrb[61].mxu1  ;;  %v7205_v53 = vld [vmem:[#allocation30_spill] sm:$0xff] }
 0x1db   : > { %7196 = vst [vmem:[#allocation117_spill] sm:$0xff] %v4832_v62  ;;  %7197 = vst [vmem:[#allocation118_spill] sm:$0xff] %v4837_v7  ;;  %v1552_v48 = vmin.f32 %v1550_v49, %v4813_v3  ;;  %v4851_v0 = vadd.f32 %v4484_v13, %v7191_v54  ;;  %v4855_v20 = vadd.f32 %v4539_v41, %v4591_v44 }
 0x1dc   : > { %7199 = vst [vmem:[#allocation28_spill] sm:$0xff] %v4841_v23  ;;  %7200 = vst [vmem:[#allocation119_spill] sm:$0xff] %v4846_v59  ;;  %v4858_v52 = vadd.f32 %v1278_v37, %v7203_v25  ;;  %v4862_v28 = vadd.f32 %v4666_v32, %v7205_v53  ;;  %v1587_v12 = vmin.f32 %v4822_v33, %v1586_v6 }
 0x1dd   : > { %7201 = vst [vmem:[#allocation120_spill] sm:$0xff] %v4851_v0  ;;  %7202 = vst [vmem:[#allocation121_spill] sm:$0xff] %v4855_v20  ;;  %v1559_v49 = vmin.f32 %v1557_v63, %v4825_v19  ;;  %v4867_v13 = vadd.f32 %v1280_v17, %v7203_v25  ;;  %v1617_v54 = vmin.f32 %v1615_v57, %v4832_v62 }
 0x1de   : > { %7204 = vst [vmem:[#allocation34_spill] sm:$0xff] %v4858_v52  ;;  %7206 = vst [vmem:[#allocation30_spill] sm:$0xff] %v4862_v28  ;;  %v1648_v41 = vmin.f32 %v4837_v7, %v1647_v5  ;;  %v4873_v44 = vadd.f32 %v4580_v26, %v7198_v21  ;;  %v4877_v37 = vadd.f32 %v4582_v1, %v4647_v45  ;;  %v7211_v21 = vld [vmem:[#allocation17_spill] sm:$0xff] }
 0x1df   : > { %7207 = vst [vmem:[#allocation122_spill] sm:$0xff] %v4867_v13  ;;  %v1612_v32 = vmin.f32 %v4669_v40, %v4696_v8  ;;  %v4883_v63 = vadd.f32 %v4321_v36, %v7161_v15  ;;  %v1554_v6 = vmin.f32 %v1552_v48, %v4841_v23  ;;  %v1588_v57 = vmin.f32 %v4846_v59, %v1587_v12  ;;  %v7214_v36 = vld [vmem:[#allocation108_spill] sm:$0xff]  ;;  %v1025_v48 = vpop.permute.xlu0 %1024  ;;  %v7266_v8 = vld [vmem:[#allocation91_spill] sm:$0xff]  ;;  %v7269_v59 = vld [vmem:[#allocation89_spill] sm:$0xff] }
 0x1e0   : > { %7208 = vst [vmem:[#allocation123_spill] sm:$0xff] %v4873_v44  ;;  %7209 = vst [vmem:[#allocation124_spill] sm:$0xff] %v4877_v37  ;;  %v1619_v5 = vmin.f32 %v1617_v54, %v4851_v0  ;;  %v1649_v26 = vmin.f32 %v4855_v20, %v1648_v41  ;;  %v4891_v25 = vadd.f32 %v7211_v21, %v4691_v58 }
 0x1e1   : > { %7210 = vst [vmem:[#allocation125_spill] sm:$0xff] %v4883_v63  ;;  %v4895_v1 = vadd.f32 %v4680_v10, %v7205_v53  ;;  %v1614_v45 = vmin.f32 %v1612_v32, %v4801_v47  ;;  %v4900_v40 = vadd.f32 %v7214_v36, %v7167_v2  ;;  %v1556_v15 = vmin.f32 %v1554_v6, %v4862_v28 }
 0x1e2   : > { %7212 = vst [vmem:[#allocation17_spill] sm:$0xff] %v4891_v25  ;;  %v1589_v12 = vmin.f32 %v1559_v49, %v1588_v57  ;;  %v1621_v17 = vmin.f32 %v1619_v5, %v4873_v44  ;;  %v1650_v54 = vmin.f32 %v4877_v37, %v1649_v26  ;;  %v4907_v58 = vadd.f32 %v4682_v60, %v4739_v9  ;;  %v7219_v49 = vld [vmem:[#allocation60_spill] sm:$0xff] }
 0x1e3   : > { %7213 = vst [vmem:[#allocation126_spill] sm:$0xff] %v4895_v1  ;;  %7215 = vst [vmem:[#allocation108_spill] sm:$0xff] %v4900_v40  ;;  %v4911_v10 = vadd.f32 %v4776_v16, %v7182_v35  ;;  %v1616_v53 = vmin.f32 %v1614_v45, %v4883_v63  ;;  %v1558_v2 = vmin.f32 %v1556_v15, %v4774_v14  ;;  %v1030_v45 = vpop.permute.xlu1 %1029 }
 0x1e4   : > { %7216 = vst [vmem:[#allocation127_spill] sm:$0xff] %v4907_v58  ;;  %v4915_v41 = vadd.f32 %v1458_v39, %v1025_v48  ;;  %v4919_v32 = vadd.f32 %v7219_v49, %v7176_v4  ;;  %v1651_v6 = vmin.f32 %v4891_v25, %v1650_v54  ;;  %v1623_v57 = vmin.f32 %v1621_v17, %v4895_v1 }
 0x1e5   : > { %7217 = vst [vmem:[#allocation128_spill] sm:$0xff] %v4911_v10  ;;  %v4925_v60 = vadd.f32 %v4725_v34, %v4787_v46  ;;  %v1560_v35 = vmin.f32 %v1558_v2, %v4858_v52  ;;  %v1618_v16 = vmin.f32 %v1616_v53, %v4900_v40  ;;  %v4937_v46 = vadd.f32 %v4815_v18, %v7194_v27 }
 0x1e6   : > { %7218 = vst [vmem:[#allocation129_spill] sm:$0xff] %v4915_v41  ;;  %7220 = vst [vmem:[#allocation60_spill] sm:$0xff] %v4919_v32  ;;  %v1590_v9 = vmin.f32 %v1589_v12, %v4915_v41  ;;  %v1652_v39 = vmin.f32 %v4907_v58, %v1651_v6  ;;  %v1625_v5 = vmin.f32 %v1623_v57, %v4911_v10  ;;  %v7268_v41 = vld [vmem:[#allocation86_spill] sm:$0xff] }
 0x1e7   : > { %7221 = vst [vmem:[#allocation130_spill] sm:$0xff] %v4925_v60  ;;  %v1620_v4 = vmin.f32 %v1618_v16, %v4919_v32  ;;  %7222 = vst [vmem:[#allocation131_spill] sm:$0xff] %v4937_v46  ;;  %v4939_v15 = vadd.f32 %v1464_v22, %v1030_v45  ;;  %v4944_v17 = vadd.f32 %v4778_v30, %v4827_v50  ;;  %v6743_v22 = vlaneseq }
 0x1e8   : > { %v1653_v26 = vmin.f32 %v4925_v60, %v1652_v39  ;;  %v1591_v21 = vmin.f32 %v1560_v35, %v1590_v9  ;;  %v4950_v57 = vadd.f32 %v4817_v61, %v1025_v48  ;;  %v4960_v16 = vadd.f32 %v1466_v55, %v1030_v45 }
 0x1e9   : > { %v1622_v36 = vmin.f32 %v1620_v4, %v4645_v24  ;;  %7223 = vst [vmem:[#allocation132_spill] sm:$0xff] %v4939_v15  ;;  %7224 = vst [vmem:[#allocation133_spill] sm:$0xff] %v4944_v17  ;;  %v4954_v35 = vshrl.u32 %v6743_v22, 7 }
 0x1ea   : > { %v1654_v34 = vmin.f32 %v1625_v5, %v1653_v26  ;;  %v1592_v54 = vmin.f32 %v4939_v15, %v1591_v21  ;;  %7225 = vst [vmem:[#allocation134_spill] sm:$0xff] %v4950_v57  ;;  %7228 = vst [vmem:[#allocation137_spill] sm:$0xff] %v4960_v16  ;;  %v7267_v15 = vld [vmem:[#allocation94_spill] sm:$0xff] }
 0x1eb   : > { %v1624_v12 = vmin.f32 %v1622_v36, %v4737_v38  ;;  %7226 = vst [vmem:[#allocation135_spill] sm:$0xff] %v4954_v35  ;;  %v4958_v50 = vadd.s32 8, %v4954_v35  ;;  %v4963_v39 = vadd.s32 16, %v4954_v35  ;;  %v4966_v61 = vadd.s32 24, %v4954_v35 }
 0x1ec   : > { %v1655_v53 = vmin.f32 %v4944_v17, %v1654_v34  ;;  %v1593_v49 = vrot.slane %v1592_v54, 4  ;;  %v4969_v48 = vadd.s32 32, %v4954_v35  ;;  %v4972_v4 = vadd.s32 248, %v4954_v35 }
 0x1ed   : > { %v1626_v2 = vmin.f32 %v1624_v12, %v4937_v46  ;;  %7227 = vst [vmem:[#allocation136_spill] sm:$0xff] %v4958_v50  ;;  %7229 = vst [vmem:[#allocation138_spill] sm:$0xff] %v4963_v39  ;;  %v4975_v26 = vadd.s32 256, %v4954_v35  ;;  %v4978_v21 = vadd.s32 40, %v4954_v35  ;;  %v4982_v45 = vadd.s32 264, %v4954_v35 }
 0x1ee   : > { %v1594_v18 = vmin.f32 %v1592_v54, %v1593_v49  ;;  %7230 = vst [vmem:[#allocation139_spill] sm:$0xff] %v4966_v61  ;;  %7231 = vst [vmem:[#allocation140_spill] sm:$0xff] %v4969_v48  ;;  %v4985_v36 = vadd.s32 272, %v4954_v35  ;;  %v4988_v34 = vadd.s32 48, %v4954_v35  ;;  %v4991_v12 = vadd.s32 280, %v4954_v35 }
 0x1ef   : > { %v1656_v6 = vmin.f32 %v1626_v2, %v1655_v53  ;;  %7232 = vst [vmem:[#allocation141_spill] sm:$0xff] %v4972_v4  ;;  %7233 = vst [vmem:[#allocation142_spill] sm:$0xff] %v4975_v26  ;;  %v4994_v54 = vadd.s32 288, %v4954_v35  ;;  %v4997_v53 = vadd.s32 56, %v4954_v35  ;;  %v5000_v2 = vadd.s32 296, %v4954_v35 }
 0x1f0   : > { %v1595_v9 = vrot.slane %v1594_v18, 2  ;;  %7234 = vst [vmem:[#allocation143_spill] sm:$0xff] %v4978_v21  ;;  %7235 = vst [vmem:[#allocation144_spill] sm:$0xff] %v4982_v45  ;;  %v5003_v49 = vadd.s32 304, %v4954_v35  ;;  %v5018_v22 = vadd.s32 80, %v4954_v35  ;;  %v5024_v17 = vadd.s32 88, %v4954_v35 }
 0x1f1   : > { %v1657_v27 = vmin.f32 %v1656_v6, %v4950_v57  ;;  %7236 = vst [vmem:[#allocation145_spill] sm:$0xff] %v4985_v36  ;;  %7237 = vst [vmem:[#allocation146_spill] sm:$0xff] %v4988_v34  ;;  %v5006_v6 = vadd.s32 64, %v4954_v35  ;;  %v5027_v60 = vadd.s32 336, %v4954_v35  ;;  %v5030_v58 = vadd.s32 96, %v4954_v35 }
 0x1f2   : > { %v1596_v5 = vmin.f32 %v1594_v18, %v1595_v9  ;;  %7238 = vst [vmem:[#allocation147_spill] sm:$0xff] %v4991_v12  ;;  %7239 = vst [vmem:[#allocation148_spill] sm:$0xff] %v4994_v54  ;;  %v5009_v18 = vadd.s32 312, %v4954_v35  ;;  %v5033_v25 = vadd.s32 344, %v4954_v35  ;;  %v5036_v37 = vadd.s32 104, %v4954_v35 }
 0x1f3   : > { %v1658_v30 = vmin.f32 %v4867_v13, %v1657_v27  ;;  %7240 = vst [vmem:[#allocation149_spill] sm:$0xff] %v4997_v53  ;;  %7241 = vst [vmem:[#allocation150_spill] sm:$0xff] %v5000_v2  ;;  %v5012_v27 = vadd.s32 72, %v4954_v35  ;;  %v5039_v20 = vadd.s32 352, %v4954_v35  ;;  %v5042_v7 = vadd.s32 112, %v4954_v35 }
 0x1f4   : > { %7242 = vst [vmem:[#allocation151_spill] sm:$0xff] %v5003_v49  ;;  %7243 = vst [vmem:[#allocation152_spill] sm:$0xff] %v5006_v6  ;;  %v1597_v9 = vrot.slane %v1596_v5, 1  ;;  %v5045_v13 = vadd.s32 360, %v4954_v35  ;;  %v5048_v46 = vadd.s32 120, %v4954_v35  ;;  %v5051_v10 = vadd.s32 368, %v4954_v35 }
 0x1f5   : > { %v1659_v55 = vmin.f32 %v4960_v16, %v1658_v30  ;;  %7244 = vst [vmem:[#allocation153_spill] sm:$0xff] %v5009_v18  ;;  %7245 = vst [vmem:[#allocation154_spill] sm:$0xff] %v5012_v27  ;;  %v5015_v30 = vadd.s32 320, %v4954_v35  ;;  %v5021_v16 = vadd.s32 328, %v4954_v35  ;;  %v5054_v38 = vadd.s32 128, %v4954_v35  ;;  %v7286_v18 = vld [vmem:[#allocation41_spill] sm:$0xff] }
 0x1f6   : > { %7247 = vst [vmem:[#allocation156_spill] sm:$0xff] %v5018_v22  ;;  %7249 = vst [vmem:[#allocation158_spill] sm:$0xff] %v5024_v17  ;;  %v5056_v1 = vmin.f32 %v1596_v5, %v1597_v9  ;;  %v5059_v24 = vadd.s32 376, %v4954_v35  ;;  %v5062_v44 = vadd.s32 136, %v4954_v35  ;;  %v5065_v32 = vadd.s32 384, %v4954_v35 }
 0x1f7   : > { %7246 = vst [vmem:[#allocation155_spill] sm:$0xff] %v5015_v30  ;;  %7248 = vst [vmem:[#allocation157_spill] sm:$0xff] %v5021_v16  ;;  %v1660_v57 = vrot.slane %v1659_v55, 4  ;;  %v5068_v40 = vadd.s32 144, %v4954_v35  ;;  %v5071_v62 = vadd.s32 392, %v4954_v35  ;;  %v5074_v63 = vadd.s32 152, %v4954_v35 }
 0x1f8   : > { %7250 = vst [vmem:[#allocation159_spill] sm:$0xff] %v5027_v60  ;;  %7251 = vst [vmem:[#allocation160_spill] sm:$0xff] %v5030_v58  ;;  %v5077_v5 = vadd.s32 400, %v4954_v35  ;;  %v5080_v9 = vadd.s32 160, %v4954_v35  ;;  %v5083_v47 = vadd.s32 408, %v4954_v35  ;;  %vm1666_vm0 = vcmp.le.f32.partialorder %v7266_v8, %v5056_v1  ;;  %v7285_v60 = vld [vmem:[#allocation110_spill] sm:$0xff] }
 0x1f9   : > { %7252 = vst [vmem:[#allocation161_spill] sm:$0xff] %v5033_v25  ;;  %7253 = vst [vmem:[#allocation162_spill] sm:$0xff] %v5039_v20  ;;  %v1661_v0 = vmin.f32 %v1659_v55, %v1660_v57  ;;  %v5086_v57 = vadd.s32 168, %v4954_v35  ;;  %v5089_v55 = vadd.s32 416, %v4954_v35  ;;  %vm1668_vm1 = vcmp.le.f32.partialorder %v7267_v15, %v5056_v1  ;;  %v7284_v25 = vld [vmem:[#allocation106_spill] sm:$0xff] }
 0x1fa   : > { %7254 = vst [vmem:[#allocation163_spill] sm:$0xff] %v5045_v13  ;;  %7255 = vst [vmem:[#allocation164_spill] sm:$0xff] %v5051_v10  ;;  %vm1670_vm2 = vcmp.le.f32.partialorder %v7268_v41, %v5056_v1  ;;  %vm1672_vm3 = vcmp.le.f32.partialorder %v7269_v59, %v5056_v1  ;;  %v5100_v33 = vadd.s32 176, %v4954_v35  ;;  %v5109_v8 = vadd.s32 432, %v4954_v35  ;;  %v7279_v13 = vld [vmem:[#allocation100_spill] sm:$0xff] }
 0x1fb   : > { %7256 = vst [vmem:[#allocation165_spill] sm:$0xff] %v5054_v38  ;;  %7257 = vst [vmem:[#allocation166_spill] sm:$0xff] %v5056_v1  ;;  %v5112_v15 = vadd.s32 192, %v4954_v35  ;;  %v5115_v41 = vadd.s32 440, %v4954_v35  ;;  %v5118_v59 = vadd.s32 200, %v4954_v35  ;;  %v5125_v10 = vadd.s32 208, %v4954_v35 }
 0x1fc   : > { %7258 = vst [vmem:[#allocation167_spill] sm:$0xff] %v5059_v24  ;;  %7259 = vst [vmem:[#allocation168_spill] sm:$0xff] %v5062_v44  ;;  %v1796_v24 = vsel %vm1672_vm3, %v4966_v61, 496  ;;  %vm1674_vm4 = vcmp.le.f32.partialorder %v7279_v13, %v5056_v1  ;;  %v5135_v20 = vadd.s32 224, %v4954_v35  ;;  %v5141_v61 = vadd.s32 240, %v4954_v35 }
 0x1fd   : > { %7260 = vst [vmem:[#allocation169_spill] sm:$0xff] %v5065_v32  ;;  %7261 = vst [vmem:[#allocation170_spill] sm:$0xff] %v5071_v62  ;;  %v1790_v62 = vsel %vm1666_vm0, %v4954_v35, 496  ;;  %v1794_v32 = vsel %vm1670_vm2, %v4963_v39, 496  ;;  %vm1678_vm6 = vcmp.le.f32.partialorder %v7284_v25, %v5056_v1  ;;  %vm1680_vm7 = vcmp.le.f32.partialorder %v7285_v60, %v5056_v1 }
 0x1fe   : > { %7262 = vst [vmem:[#allocation171_spill] sm:$0xff] %v5077_v5  ;;  %7263 = vst [vmem:[#allocation172_spill] sm:$0xff] %v5080_v9  ;;  %v1662_v5 = vrot.slane %v1661_v0, 2  ;;  %vm1914_vm8 = vcmp.lt.s32.totalorder %v1790_v62, %v1794_v32  ;;  %vm1682_vm10 = vcmp.le.f32.partialorder %v7286_v18, %v5056_v1  ;;  %v1804_v60 = vsel %vm1680_vm7, %v4997_v53, 496  ;;  %v7332_v18 = vld [vmem:[#allocation23_spill] sm:$0xff] }
 0x1ff   : > { %7264 = vst [vmem:[#allocation173_spill] sm:$0xff] %v5083_v47  ;;  %7265 = vst [vmem:[#allocation174_spill] sm:$0xff] %v5089_v55  ;;  %v5103_v47 = vadd.s32 424, %v4954_v35  ;;  %v5106_v55 = vadd.s32 184, %v4954_v35  ;;  %v1915_v16 = vsel %vm1914_vm8, %v1790_v62, %v1794_v32  ;;  %v7289_v62 = vld [vmem:[#allocation40_spill] sm:$0xff]  ;;  %vm1690_vm2 = vcmp.le.f32.partialorder %v4596_v43, %v5056_v1 }
 0x200   : > { %7270 = vst [vmem:[#allocation175_spill] sm:$0xff] %v5100_v33  ;;  %7273 = vst [vmem:[#allocation178_spill] sm:$0xff] %v5109_v8  ;;  %v5128_v8 = vadd.s32 216, %v4954_v35  ;;  %v5143_v39 = vmin.f32 %v1661_v0, %v1662_v5  ;;  %v7287_v0 = vld [vmem:[#allocation12_spill] sm:$0xff]  ;;  %v1802_v5 = vsel %vm1678_vm6, %v4988_v34, 496  ;;  %vm1688_vm15 = vcmp.le.f32.partialorder %v7289_v62, %v5056_v1 }
 0x201   : > { %7271 = vst [vmem:[#allocation176_spill] sm:$0xff] %v5103_v47  ;;  %7272 = vst [vmem:[#allocation177_spill] sm:$0xff] %v5106_v55  ;;  %v1792_v47 = vsel %vm1668_vm1, %v4958_v50, 496  ;;  %v5138_v50 = vadd.s32 232, %v4954_v35  ;;  %vm1684_vm11 = vcmp.le.f32.partialorder %v7287_v0, %v5056_v1 }
 0x202   : > { %7274 = vst [vmem:[#allocation179_spill] sm:$0xff] %v5112_v15  ;;  %7275 = vst [vmem:[#allocation180_spill] sm:$0xff] %v5115_v41  ;;  %v7280_v41 = vld [vmem:[#allocation103_spill] sm:$0xff]  ;;  %vm1916_vm9 = vcmp.lt.s32.totalorder %v1792_v47, %v1796_v24 }
 0x203   : > { %7276 = vst [vmem:[#allocation181_spill] sm:$0xff] %v5118_v59  ;;  %7277 = vst [vmem:[#allocation182_spill] sm:$0xff] %v5125_v10  ;;  %vm1676_vm5 = vcmp.le.f32.partialorder %v7280_v41, %v5056_v1  ;;  %v1798_v41 = vsel %vm1674_vm4, %v4969_v48, 496  ;;  %v1917_v30 = vsel %vm1916_vm9, %v1792_v47, %v1796_v24  ;;  %v7288_v48 = vld [vmem:[#allocation39_spill] sm:$0xff]  ;;  %v1806_v24 = vsel %vm1682_vm10, %v5006_v6, 496 }
 0x204   : > { %7278 = vst [vmem:[#allocation183_spill] sm:$0xff] %v5128_v8  ;;  %7281 = vst [vmem:[#allocation184_spill] sm:$0xff] %v5135_v20  ;;  %v1800_v13 = vsel %vm1676_vm5, %v4978_v21, 496  ;;  %vm1918_vm12 = vcmp.lt.s32.totalorder %v1915_v16, %v1798_v41  ;;  %vm1686_vm14 = vcmp.le.f32.partialorder %v7288_v48, %v5056_v1  ;;  %v1808_v47 = vsel %vm1684_vm11, %v5012_v27, 496  ;;  %v7291_v48 = vld [vmem:[#allocation49_spill] sm:$0xff] }
 0x205   : > { %7282 = vst [vmem:[#allocation185_spill] sm:$0xff] %v5138_v50  ;;  %7283 = vst [vmem:[#allocation186_spill] sm:$0xff] %v5141_v61  ;;  %vm1920_vm13 = vcmp.lt.s32.totalorder %v1917_v30, %v1800_v13  ;;  %v1919_v25 = vsel %vm1918_vm12, %v1915_v16, %v1798_v41  ;;  %v7290_v41 = vld [vmem:[#allocation68_spill] sm:$0xff]  ;;  %v1812_v16 = vsel %vm1688_vm15, %v5024_v17, 496  ;;  %vm1694_vm6 = vcmp.le.f32.partialorder %v7291_v48, %v5056_v1  ;;  %v7328_v48 = vld [vmem:[#allocation63_spill] sm:$0xff] }
 0x206   : > { %v1921_v35 = vsel %vm1920_vm13, %v1917_v30, %v1800_v13  ;;  %vm1922_vm0 = vcmp.lt.s32.totalorder %v1919_v25, %v1802_v5  ;;  %vm1692_vm3 = vcmp.le.f32.partialorder %v7290_v41, %v5056_v1  ;;  %v1810_v13 = vsel %vm1686_vm14, %v5018_v22, 496 }
 0x207   : > { %vm1924_vm1 = vcmp.lt.s32.totalorder %v1921_v35, %v1804_v60  ;;  %v1923_v32 = vsel %vm1922_vm0, %v1919_v25, %v1802_v5  ;;  %v7292_v25 = vld [vmem:[#allocation59_spill] sm:$0xff]  ;;  %vm1698_vm10 = vcmp.le.f32.partialorder %v4705_v11, %v5056_v1  ;;  %vm1702_vm14 = vcmp.le.f32.partialorder %v4748_v31, %v5056_v1  ;;  %v7324_v31 = vld [vmem:[#allocation56_spill] sm:$0xff] }
 0x208   : > { %v1925_v0 = vsel %vm1924_vm1, %v1921_v35, %v1804_v60  ;;  %vm1926_vm4 = vcmp.lt.s32.totalorder %v1923_v32, %v1806_v24  ;;  %vm1696_vm7 = vcmp.le.f32.partialorder %v7292_v25, %v5056_v1  ;;  %v1814_v60 = vsel %vm1690_vm2, %v5030_v58, 496 }
 0x209   : > { %vm1928_vm5 = vcmp.lt.s32.totalorder %v1925_v0, %v1808_v47  ;;  %v1927_v30 = vsel %vm1926_vm4, %v1923_v32, %v1806_v24  ;;  %v1816_v35 = vsel %vm1692_vm3, %v5036_v37, 496  ;;  %v7293_v24 = vld [vmem:[#allocation19_spill] sm:$0xff]  ;;  %vm1706_vm2 = vcmp.le.f32.partialorder %v4793_v56, %v5056_v1 }
 0x20a   : > { %v1929_v62 = vsel %vm1928_vm5, %v1925_v0, %v1808_v47  ;;  %vm1930_vm8 = vcmp.lt.s32.totalorder %v1927_v30, %v1810_v13  ;;  %vm1700_vm11 = vcmp.le.f32.partialorder %v7293_v24, %v5056_v1  ;;  %v1818_v0 = vsel %vm1694_vm6, %v5042_v7, 496 }
 0x20b   : > { %vm1932_vm9 = vcmp.lt.s32.totalorder %v1929_v62, %v1812_v16  ;;  %v1931_v5 = vsel %vm1930_vm8, %v1927_v30, %v1810_v13  ;;  %v1820_v47 = vsel %vm1696_vm7, %v5048_v46, 496  ;;  %v7294_v13 = vld [vmem:[#allocation74_spill] sm:$0xff]  ;;  %vm1710_vm6 = vcmp.le.f32.partialorder %v4813_v3, %v5056_v1 }
 0x20c   : > { %v1933_v41 = vsel %vm1932_vm9, %v1929_v62, %v1812_v16  ;;  %vm1934_vm12 = vcmp.lt.s32.totalorder %v1931_v5, %v1814_v60  ;;  %vm1704_vm15 = vcmp.le.f32.partialorder %v7294_v13, %v5056_v1  ;;  %v1822_v62 = vsel %vm1698_vm10, %v5054_v38, 496 }
 0x20d   : > { %vm1936_vm13 = vcmp.lt.s32.totalorder %v1933_v41, %v1816_v35  ;;  %v1935_v32 = vsel %vm1934_vm12, %v1931_v5, %v1814_v60  ;;  %v1824_v16 = vsel %vm1700_vm11, %v5062_v44, 496  ;;  %v7295_v60 = vld [vmem:[#allocation67_spill] sm:$0xff]  ;;  %vm1712_vm7 = vcmp.le.f32.partialorder %v4758_v29, %v5056_v1  ;;  %v7316_v29 = vld [vmem:[#allocation42_spill] sm:$0xff] }
 0x20e   : > { %v1937_v25 = vsel %vm1936_vm13, %v1933_v41, %v1816_v35  ;;  %vm1938_vm0 = vcmp.lt.s32.totalorder %v1935_v32, %v1818_v0  ;;  %vm1708_vm3 = vcmp.le.f32.partialorder %v7295_v60, %v5056_v1  ;;  %v1826_v41 = vsel %vm1702_vm14, %v5068_v40, 496  ;;  %v7320_v60 = vld [vmem:[#allocation48_spill] sm:$0xff] }
 0x20f   : > { %vm1940_vm1 = vcmp.lt.s32.totalorder %v1937_v25, %v1820_v47  ;;  %v1939_v30 = vsel %vm1938_vm0, %v1935_v32, %v1818_v0  ;;  %v1828_v35 = vsel %vm1704_vm15, %v5074_v63, 496  ;;  %v1832_v0 = vsel %vm1708_vm3, %v5086_v57, 496 }
 0x210   : > { %v1941_v24 = vsel %vm1940_vm1, %v1937_v25, %v1820_v47  ;;  %vm1942_vm4 = vcmp.lt.s32.totalorder %v1939_v30, %v1822_v62  ;;  %v1830_v25 = vsel %vm1706_vm2, %v5080_v9, 496  ;;  %vm1714_vm10 = vcmp.le.f32.partialorder %v4841_v23, %v5056_v1 }
 0x211   : > { %vm1944_vm5 = vcmp.lt.s32.totalorder %v1941_v24, %v1824_v16  ;;  %v1943_v5 = vsel %vm1942_vm4, %v1939_v30, %v1822_v62  ;;  %vm1716_vm11 = vcmp.le.f32.partialorder %v4631_v51, %v5056_v1  ;;  %v1836_v62 = vsel %vm1712_vm7, %v5106_v55, 496  ;;  %v7312_v51 = vld [vmem:[#allocation50_spill] sm:$0xff] }
 0x212   : > { %v1945_v13 = vsel %vm1944_vm5, %v1941_v24, %v1824_v16  ;;  %vm1946_vm8 = vcmp.lt.s32.totalorder %v1943_v5, %v1826_v41  ;;  %v1834_v24 = vsel %vm1710_vm6, %v5100_v33, 496  ;;  %vm1718_vm14 = vcmp.le.f32.partialorder %v4862_v28, %v5056_v1 }
 0x213   : > { %vm1948_vm9 = vcmp.lt.s32.totalorder %v1945_v13, %v1828_v35  ;;  %v1947_v47 = vsel %vm1946_vm8, %v1943_v5, %v1826_v41  ;;  %vm1720_vm15 = vcmp.le.f32.partialorder %v4723_v42, %v5056_v1  ;;  %v1840_v41 = vsel %vm1716_vm11, %v5118_v59, 496  ;;  %v7308_v42 = vld [vmem:[#allocation53_spill] sm:$0xff] }
 0x214   : > { %v1949_v32 = vsel %vm1948_vm9, %v1945_v13, %v1828_v35  ;;  %vm1950_vm12 = vcmp.lt.s32.totalorder %v1947_v47, %v1830_v25  ;;  %v1838_v13 = vsel %vm1714_vm10, %v5112_v15, 496  ;;  %vm1722_vm2 = vcmp.le.f32.partialorder %v4774_v14, %v5056_v1  ;;  %v7297_v14 = vld [vmem:[#allocation71_spill] sm:$0xff] }
 0x215   : > { %vm1952_vm13 = vcmp.lt.s32.totalorder %v1949_v32, %v1832_v0  ;;  %v1951_v16 = vsel %vm1950_vm12, %v1947_v47, %v1830_v25  ;;  %vm1724_vm3 = vcmp.le.f32.partialorder %v4825_v19, %v5056_v1  ;;  %v1842_v25 = vsel %vm1718_vm14, %v5125_v10, 496 }
 0x216   : > { %v1953_v30 = vsel %vm1952_vm13, %v1949_v32, %v1832_v0  ;;  %vm1954_vm0 = vcmp.lt.s32.totalorder %v1951_v16, %v1834_v24  ;;  %v1844_v0 = vsel %vm1720_vm15, %v5128_v8, 496  ;;  %vm1726_vm6 = vcmp.le.f32.partialorder %v4858_v52, %v5056_v1  ;;  %v7299_v52 = vld [vmem:[#allocation78_spill] sm:$0xff] }
 0x217   : > { %vm1956_vm1 = vcmp.lt.s32.totalorder %v1953_v30, %v1836_v62  ;;  %v1955_v35 = vsel %vm1954_vm0, %v1951_v16, %v1834_v24  ;;  %v7296_v24 = vld [vmem:[#allocation72_spill] sm:$0xff]  ;;  %v1848_v16 = vsel %vm1724_vm3, %v5138_v50, 496  ;;  %vm1730_vm10 = vcmp.le.f32.partialorder %v7297_v14, %v5056_v1  ;;  %v7301_v14 = vld [vmem:[#allocation82_spill] sm:$0xff] }
 0x218   : > { %v1957_v5 = vsel %vm1956_vm1, %v1953_v30, %v1836_v62  ;;  %vm1958_vm4 = vcmp.lt.s32.totalorder %v1955_v35, %v1838_v13  ;;  %vm1728_vm7 = vcmp.le.f32.partialorder %v7296_v24, %v5056_v1  ;;  %v1846_v62 = vsel %vm1722_vm2, %v5135_v20, 496 }
 0x219   : > { %vm1960_vm5 = vcmp.lt.s32.totalorder %v1957_v5, %v1840_v41  ;;  %v1959_v47 = vsel %vm1958_vm4, %v1955_v35, %v1838_v13  ;;  %v7298_v13 = vld [vmem:[#allocation73_spill] sm:$0xff]  ;;  %v1852_v35 = vsel %vm1728_vm7, %v4972_v4, 496  ;;  %vm1734_vm14 = vcmp.le.f32.partialorder %v7299_v52, %v5056_v1  ;;  %v7303_v52 = vld [vmem:[#allocation90_spill] sm:$0xff] }
 0x21a   : > { %v1961_v32 = vsel %vm1960_vm5, %v1957_v5, %v1840_v41  ;;  %vm1962_vm8 = vcmp.lt.s32.totalorder %v1959_v47, %v1842_v25  ;;  %vm1732_vm11 = vcmp.le.f32.partialorder %v7298_v13, %v5056_v1  ;;  %v1850_v41 = vsel %vm1726_vm6, %v5141_v61, 496 }
 0x21b   : > { %vm1964_vm9 = vcmp.lt.s32.totalorder %v1961_v32, %v1844_v0  ;;  %v1963_v30 = vsel %vm1962_vm8, %v1959_v47, %v1842_v25  ;;  %v7300_v25 = vld [vmem:[#allocation79_spill] sm:$0xff]  ;;  %v1856_v47 = vsel %vm1732_vm11, %v4982_v45, 496  ;;  %vm1738_vm2 = vcmp.le.f32.partialorder %v7301_v14, %v5056_v1 }
 0x21c   : > { %v1965_v19 = vsel %vm1964_vm9, %v1961_v32, %v1844_v0  ;;  %vm1966_vm12 = vcmp.lt.s32.totalorder %v1963_v30, %v1846_v62  ;;  %vm1736_vm15 = vcmp.le.f32.partialorder %v7300_v25, %v5056_v1  ;;  %v1854_v0 = vsel %vm1730_vm10, %v4975_v26, 496  ;;  %v7305_v14 = vld [vmem:[#allocation99_spill] sm:$0xff] }
 0x21d   : > { %vm1968_vm13 = vcmp.lt.s32.totalorder %v1965_v19, %v1848_v16  ;;  %v1967_v5 = vsel %vm1966_vm12, %v1963_v30, %v1846_v62  ;;  %v7302_v62 = vld [vmem:[#allocation85_spill] sm:$0xff]  ;;  %vm1742_vm6 = vcmp.le.f32.partialorder %v7303_v52, %v5056_v1  ;;  %vm1746_vm10 = vcmp.le.f32.partialorder %v7305_v14, %v5056_v1 }
 0x21e   : > { %v1969_v24 = vsel %vm1968_vm13, %v1965_v19, %v1848_v16  ;;  %vm1970_vm0 = vcmp.lt.s32.totalorder %v1967_v5, %v1850_v41  ;;  %vm1740_vm3 = vcmp.le.f32.partialorder %v7302_v62, %v5056_v1  ;;  %v1858_v19 = vsel %vm1734_vm14, %v4985_v36, 496 }
 0x21f   : > { %vm1972_vm1 = vcmp.lt.s32.totalorder %v1969_v24, %v1852_v35  ;;  %v1971_v32 = vsel %vm1970_vm0, %v1967_v5, %v1850_v41  ;;  %v1860_v16 = vsel %vm1736_vm15, %v4991_v12, 496  ;;  %v7304_v41 = vld [vmem:[#allocation96_spill] sm:$0xff]  ;;  %vm1750_vm14 = vcmp.le.f32.partialorder %v7308_v42, %v5056_v1  ;;  %v7398_v12 = vld [vmem:[#allocation46_spill] sm:$0xff] }
 0x220   : > { %v1973_v13 = vsel %vm1972_vm1, %v1969_v24, %v1852_v35  ;;  %vm1974_vm4 = vcmp.lt.s32.totalorder %v1971_v32, %v1854_v0  ;;  %vm1744_vm7 = vcmp.le.f32.partialorder %v7304_v41, %v5056_v1  ;;  %v1862_v24 = vsel %vm1738_vm2, %v4994_v54, 496 }
 0x221   : > { %vm1976_vm5 = vcmp.lt.s32.totalorder %v1973_v13, %v1856_v47  ;;  %v1975_v30 = vsel %vm1974_vm4, %v1971_v32, %v1854_v0  ;;  %v1864_v35 = vsel %vm1740_vm3, %v5000_v2, 496  ;;  %v7306_v0 = vld [vmem:[#allocation104_spill] sm:$0xff]  ;;  %vm1754_vm2 = vcmp.le.f32.partialorder %v7312_v51, %v5056_v1 }
 0x222   : > { %v1977_v25 = vsel %vm1976_vm5, %v1973_v13, %v1856_v47  ;;  %vm1978_vm8 = vcmp.lt.s32.totalorder %v1975_v30, %v1858_v19  ;;  %vm1748_vm11 = vcmp.le.f32.partialorder %v7306_v0, %v5056_v1  ;;  %v1866_v13 = vsel %vm1742_vm6, %v5003_v49, 496  ;;  %v7307_v47 = vld [vmem:[#allocation153_spill] sm:$0xff]  ;;  %v7397_v49 = vld [vmem:[#allocation107_spill] sm:$0xff] }
 0x223   : > { %vm1980_vm9 = vcmp.lt.s32.totalorder %v1977_v25, %v1860_v16  ;;  %v1979_v5 = vsel %vm1978_vm8, %v1975_v30, %v1858_v19  ;;  %v1868_v32 = vsel %vm1744_vm7, %v7307_v47, 496  ;;  %v7309_v19 = vld [vmem:[#allocation35_spill] sm:$0xff]  ;;  %v7311_v30 = vld [vmem:[#allocation157_spill] sm:$0xff]  ;;  %vm1758_vm6 = vcmp.le.f32.partialorder %v7316_v29, %v5056_v1  ;;  %v7401_v47 = vld [vmem:[#allocation14_spill] sm:$0xff] }
 0x224   : > { %v1981_v62 = vsel %vm1980_vm9, %v1977_v25, %v1860_v16  ;;  %vm1982_vm12 = vcmp.lt.s32.totalorder %v1979_v5, %v1862_v24  ;;  %vm1752_vm15 = vcmp.le.f32.partialorder %v7309_v19, %v5056_v1  ;;  %v7310_v25 = vld [vmem:[#allocation155_spill] sm:$0xff]  ;;  %v1872_v0 = vsel %vm1748_vm11, %v7311_v30, 496 }
 0x225   : > { %vm1984_vm13 = vcmp.lt.s32.totalorder %v1981_v62, %v1864_v35  ;;  %v1983_v41 = vsel %vm1982_vm12, %v1979_v5, %v1862_v24  ;;  %v1870_v16 = vsel %vm1746_vm10, %v7310_v25, 496  ;;  %v7313_v24 = vld [vmem:[#allocation37_spill] sm:$0xff]  ;;  %vm1762_vm10 = vcmp.le.f32.partialorder %v7320_v60, %v5056_v1 }
 0x226   : > { %v1985_v52 = vsel %vm1984_vm13, %v1981_v62, %v1864_v35  ;;  %vm1986_vm0 = vcmp.lt.s32.totalorder %v1983_v41, %v1866_v13  ;;  %vm1756_vm3 = vcmp.le.f32.partialorder %v7313_v24, %v5056_v1  ;;  %v7314_v62 = vld [vmem:[#allocation159_spill] sm:$0xff]  ;;  %v7315_v5 = vld [vmem:[#allocation161_spill] sm:$0xff] }
 0x227   : > { %vm1988_vm1 = vcmp.lt.s32.totalorder %v1985_v52, %v1868_v32  ;;  %v1987_v14 = vsel %vm1986_vm0, %v1983_v41, %v1866_v13  ;;  %v1874_v35 = vsel %vm1750_vm14, %v7314_v62, 496  ;;  %v1876_v19 = vsel %vm1752_vm15, %v7315_v5, 496  ;;  %v7317_v41 = vld [vmem:[#allocation45_spill] sm:$0xff]  ;;  %v7389_v5 = vld [vmem:[#allocation122_spill] sm:$0xff] }
 0x228   : > { %v1989_v28 = vsel %vm1988_vm1, %v1985_v52, %v1868_v32  ;;  %vm1990_vm4 = vcmp.lt.s32.totalorder %v1987_v14, %v1870_v16  ;;  %vm1760_vm7 = vcmp.le.f32.partialorder %v7317_v41, %v5056_v1  ;;  %v7318_v52 = vld [vmem:[#allocation162_spill] sm:$0xff]  ;;  %v7319_v32 = vld [vmem:[#allocation163_spill] sm:$0xff]  ;;  %vm1766_vm14 = vcmp.le.f32.partialorder %v7324_v31, %v5056_v1 }
 0x229   : > { %vm1992_vm5 = vcmp.lt.s32.totalorder %v1989_v28, %v1872_v0  ;;  %v1991_v42 = vsel %vm1990_vm4, %v1987_v14, %v1870_v16  ;;  %v1878_v13 = vsel %vm1754_vm2, %v7318_v52, 496  ;;  %v1880_v24 = vsel %vm1756_vm3, %v7319_v32, 496  ;;  %v7321_v14 = vld [vmem:[#allocation75_spill] sm:$0xff] }
 0x22a   : > { %v1993_v23 = vsel %vm1992_vm5, %v1989_v28, %v1872_v0  ;;  %vm1994_vm8 = vcmp.lt.s32.totalorder %v1991_v42, %v1874_v35  ;;  %vm1764_vm11 = vcmp.le.f32.partialorder %v7321_v14, %v5056_v1  ;;  %v7322_v28 = vld [vmem:[#allocation164_spill] sm:$0xff]  ;;  %v7323_v16 = vld [vmem:[#allocation167_spill] sm:$0xff]  ;;  %vm1770_vm2 = vcmp.le.f32.partialorder %v7328_v48, %v5056_v1 }
 0x22b   : > { %vm1996_vm9 = vcmp.lt.s32.totalorder %v1993_v23, %v1876_v19  ;;  %v1995_v51 = vsel %vm1994_vm8, %v1991_v42, %v1874_v35  ;;  %v1882_v0 = vsel %vm1758_vm6, %v7322_v28, 496  ;;  %v1884_v41 = vsel %vm1760_vm7, %v7323_v16, 496  ;;  %v7325_v42 = vld [vmem:[#allocation29_spill] sm:$0xff]  ;;  %v7327_v35 = vld [vmem:[#allocation170_spill] sm:$0xff] }
 0x22c   : > { %v1997_v3 = vsel %vm1996_vm9, %v1993_v23, %v1876_v19  ;;  %vm1998_vm12 = vcmp.lt.s32.totalorder %v1995_v51, %v1878_v13  ;;  %vm1768_vm15 = vcmp.le.f32.partialorder %v7325_v42, %v5056_v1  ;;  %v7326_v23 = vld [vmem:[#allocation169_spill] sm:$0xff]  ;;  %v1888_v14 = vsel %vm1764_vm11, %v7327_v35, 496 }
 0x22d   : > { %vm2000_vm13 = vcmp.lt.s32.totalorder %v1997_v3, %v1880_v24  ;;  %v1999_v29 = vsel %vm1998_vm12, %v1995_v51, %v1878_v13  ;;  %v1886_v19 = vsel %vm1762_vm10, %v7326_v23, 496  ;;  %v7329_v51 = vld [vmem:[#allocation65_spill] sm:$0xff]  ;;  %vm1774_vm6 = vcmp.le.f32.partialorder %v7332_v18, %v5056_v1 }
 0x22e   : > { %v2001_v56 = vsel %vm2000_vm13, %v1997_v3, %v1880_v24  ;;  %vm2002_vm0 = vcmp.lt.s32.totalorder %v1999_v29, %v1882_v0  ;;  %vm1772_vm3 = vcmp.le.f32.partialorder %v7329_v51, %v5056_v1  ;;  %v7330_v3 = vld [vmem:[#allocation171_spill] sm:$0xff]  ;;  %v7331_v13 = vld [vmem:[#allocation173_spill] sm:$0xff]  ;;  %v7355_v28 = vmov 0 }
 0x22f   : > { %vm2004_vm1 = vcmp.lt.s32.totalorder %v2001_v56, %v1884_v41  ;;  %v2003_v60 = vsel %vm2002_vm0, %v1999_v29, %v1882_v0  ;;  %v1890_v24 = vsel %vm1766_vm14, %v7330_v3, 496  ;;  %v1892_v42 = vsel %vm1768_vm15, %v7331_v13, 496  ;;  %v7333_v29 = vld [vmem:[#allocation111_spill] sm:$0xff]  ;;  %v7335_v0 = vld [vmem:[#allocation176_spill] sm:$0xff] }
 0x230   : > { %v2005_v11 = vsel %vm2004_vm1, %v2001_v56, %v1884_v41  ;;  %vm2006_vm4 = vcmp.lt.s32.totalorder %v2003_v60, %v1886_v19  ;;  %vm1776_vm7 = vcmp.le.f32.partialorder %v7333_v29, %v5056_v1  ;;  %v7334_v56 = vld [vmem:[#allocation174_spill] sm:$0xff]  ;;  %v1896_v51 = vsel %vm1772_vm3, %v7335_v0, 496  ;;  %v7338_v29 = vld [vmem:[#allocation135_spill] sm:$0xff] }
 0x231   : > { %vm2008_vm5 = vcmp.lt.s32.totalorder %v2005_v11, %v1888_v14  ;;  %v2007_v31 = vsel %vm2006_vm4, %v2003_v60, %v1886_v19  ;;  %v1894_v41 = vsel %vm1770_vm2, %v7334_v56, 496  ;;  %v7336_v60 = vld [vmem:[#allocation178_spill] sm:$0xff]  ;;  %v7337_v19 = vld [vmem:[#allocation180_spill] sm:$0xff]  ;;  %v5299_v23 = vadd.s32 448, %v7338_v29  ;;  %v7353_v0 = vld [vmem:[#allocation139_spill] sm:$0xff] }
 0x232   : > { %v2009_v43 = vsel %vm2008_vm5, %v2005_v11, %v1888_v14  ;;  %vm2010_vm8 = vcmp.lt.s32.totalorder %v2007_v31, %v1890_v24  ;;  %v1664_v11 = vrot.slane %v5143_v39, 1  ;;  %v1898_v14 = vsel %vm1774_vm6, %v7336_v60, 496  ;;  %v7352_v60 = vld [vmem:[#allocation138_spill] sm:$0xff] }
 0x233   : > { %vm2012_vm9 = vcmp.lt.s32.totalorder %v2009_v43, %v1892_v42  ;;  %v2011_v48 = vsel %vm2010_vm8, %v2007_v31, %v1890_v24  ;;  %v1900_v18 = vsel %vm1776_vm7, %v7337_v19, 496  ;;  %7339 = vst [vmem:[#allocation135_spill] sm:$0xff] %v5299_v23  ;;  %v5302_v56 = vadd.s32 456, %v7338_v29  ;;  %v7342_v31 = vld [vmem:[#allocation115_spill] sm:$0xff]  ;;  %v7344_v19 = vld [vmem:[#allocation92_spill] sm:$0xff] }
 0x234   : > { %v2013_v35 = vsel %vm2012_vm9, %v2009_v43, %v1892_v42  ;;  %vm2014_vm10 = vcmp.lt.s32.totalorder %v2011_v48, %v1894_v41  ;;  %v7341_v43 = vld [vmem:[#allocation113_spill] sm:$0xff]  ;;  %vm1780_vm15 = vcmp.le.f32.partialorder %v7342_v31, %v5056_v1  ;;  %v3155_v62 = vmov 1966171168  }
 0x235   : > { %vm2016_vm11 = vcmp.lt.s32.totalorder %v2013_v35, %v1896_v51  ;;  %v2015_v3 = vsel %vm2014_vm10, %v2011_v48, %v1894_v41  ;;  %7340 = vst [vmem:[#allocation187_spill] sm:$0xff] %v5302_v56  ;;  %vm1778_vm14 = vcmp.le.f32.partialorder %v7341_v43, %v5056_v1  ;;  %v5309_v48 = vmin.f32 %v5143_v39, %v1664_v11  ;;  %v7346_v39 = vld [vmem:[#allocation97_spill] sm:$0xff]  ;;  %v7350_v11 = vld [vmem:[#allocation119_spill] sm:$0xff] }
 0x236   : > { %v2017_v13 = vsel %vm2016_vm11, %v2013_v35, %v1896_v51  ;;  %vm2018_vm12 = vcmp.lt.s32.totalorder %v2015_v3, %v1898_v14  ;;  %v1902_v51 = vsel %vm1778_vm14, %v5299_v23, 496  ;;  %v1904_v24 = vsel %vm1780_vm15, %v5302_v56, 496  ;;  %v7351_v56 = vld [vmem:[#allocation136_spill] sm:$0xff] }
 0x237   : > { %vm2020_vm13 = vcmp.lt.s32.totalorder %v2017_v13, %v1900_v18  ;;  %v2019_v42 = vsel %vm2018_vm12, %v2015_v3, %v1898_v14  ;;  %v5314_v41 = vadd.s32 464, %v7338_v29  ;;  %vm1667_vm2 = vcmp.le.f32.partialorder %v7344_v19, %v5309_v48  ;;  %v7348_v3 = vld [vmem:[#allocation95_spill] sm:$0xff] }
 0x238   : > { %v2021_v35 = vsel %vm2020_vm13, %v2017_v13, %v1900_v18  ;;  %vm2022_vm0 = vcmp.lt.s32.totalorder %v2019_v42, %v1902_v51  ;;  %v5319_v43 = vadd.s32 472, %v7338_v29  ;;  %vm1669_vm3 = vcmp.le.f32.partialorder %v7346_v39, %v5309_v48  ;;  %v7347_v18 = vld [vmem:[#allocation88_spill] sm:$0xff] }
 0x239   : > { %7343 = vst [vmem:[#allocation188_spill] sm:$0xff] %v5314_v41  ;;  %vm2024_vm1 = vcmp.lt.s32.totalorder %v2021_v35, %v1904_v24  ;;  %vm1671_vm4 = vcmp.le.f32.partialorder %v7347_v18, %v5309_v48  ;;  %vm1673_vm5 = vcmp.le.f32.partialorder %v7348_v3, %v5309_v48  ;;  %v7349_v13 = vld [vmem:[#allocation116_spill] sm:$0xff]  ;;  %vm1784_vm7 = vcmp.le.f32.partialorder %v7350_v11, %v5056_v1 }
 0x23a   : > { %7345 = vst [vmem:[#allocation189_spill] sm:$0xff] %v5319_v43  ;;  %vm1782_vm6 = vcmp.le.f32.partialorder %v7349_v13, %v5056_v1  ;;  %v2023_v14 = vsel %vm2022_vm0, %v2019_v42, %v1902_v51  ;;  %v2025_v31 = vsel %vm2024_vm1, %v2021_v35, %v1904_v24  ;;  %v1791_v19 = vsel %vm1667_vm2, %v7338_v29, 496  ;;  %v7360_v24 = vld [vmem:[#allocation129_spill] sm:$0xff] }
 0x23b   : > { %v1793_v23 = vsel %vm1669_vm3, %v7351_v56, 496  ;;  %v1795_v39 = vsel %vm1671_vm4, %v7352_v60, 496  ;;  %v1797_v16 = vsel %vm1673_vm5, %v7353_v0, 496  ;;  %v7354_v18 = vlaneseq  ;;  %v7362_v0 = vld [vmem:[#allocation101_spill] sm:$0xff] }
 0x23c   : > { %v1906_v13 = vsel %vm1782_vm6, %v5314_v41, 496  ;;  %v1908_v3 = vsel %vm1784_vm7, %v5319_v43, 496  ;;  %v5343_v42 = vadd.s32 480, %v7338_v29  ;;  %v3153_v35 = vmov inf  }
 0x23d   : > { %vm5336_vm8 = vcmp.lt.s32.totalorder %v7354_v18, 256  ;;  %vm2026_vm9 = vcmp.lt.s32.totalorder %v2023_v14, %v1906_v13  ;;  %vm2028_vm10 = vcmp.lt.s32.totalorder %v2025_v31, %v1908_v3  ;;  %v5350_v51 = vadd.s32 488, %v7338_v29  ;;  %v7361_v18 = vld [vmem:[#allocation132_spill] sm:$0xff] }
 0x23e   : > { %v7356_v28 = vsel %vm5336_vm8, 4294967295, %v7355_v28  ;;  %7358 = vst [vmem:[#allocation191_spill] sm:$0xff] %v5343_v42  ;;  %469 = vst.msk [vmem:[#allocation2] sm:$0x3] %vm5336_vm8, %v3153_v35  ;;  %vm2045_vm11 = vcmp.lt.s32.totalorder %v1791_v19, %v1795_v39  ;;  %vm2047_vm12 = vcmp.lt.s32.totalorder %v1793_v23, %v1797_v16  ;;  %vm1786_vm13 = vcmp.le.f32.partialorder %v7360_v24, %v5056_v1 }
 0x23f   : > { %7357 = vst [vmem:[#allocation190_spill] sm:$0xff] %v7356_v28  ;;  %470 = vst.msk [vmem:[#allocation3] sm:$0x3] %vm5336_vm8, %v3153_v35  ;;  %vm1788_vm14 = vcmp.le.f32.partialorder %v7361_v18, %v5056_v1  ;;  %v3154_v11 = vmov 4294967295   ;;  %v2027_v43 = vsel %vm2026_vm9, %v2023_v14, %v1906_v13  ;;  %v2029_v41 = vsel %vm2028_vm10, %v2025_v31, %v1908_v3  ;;  %v7363_v35 = vld [vmem:[#allocation105_spill] sm:$0xff]  ;;  %v7364_v18 = vld [vmem:[#allocation140_spill] sm:$0xff] }
 0x240   : > { %7359 = vst [vmem:[#allocation192_spill] sm:$0xff] %v5350_v51  ;;  %471 = vst.msk [vmem:[#allocation4] sm:$0x3] %vm5336_vm8, %v3154_v11  ;;  %vm1675_vm15 = vcmp.le.f32.partialorder %v7362_v0, %v5309_v48  ;;  %vm1677_vm0 = vcmp.le.f32.partialorder %v7363_v35, %v5309_v48  ;;  %v2046_v56 = vsel %vm2045_vm11, %v1791_v19, %v1795_v39  ;;  %v1910_v32 = vsel %vm1786_vm13, %v5343_v42, 496  ;;  %v7365_v13 = vld [vmem:[#allocation109_spill] sm:$0xff]  ;;  %v7366_v19 = vld [vmem:[#allocation38_spill] sm:$0xff] }
 0x241   : > { %v2048_v60 = vsel %vm2047_vm12, %v1793_v23, %v1797_v16  ;;  %v1912_v24 = vsel %vm1788_vm14, %v5350_v51, 496  ;;  %vm2030_vm1 = vcmp.lt.s32.totalorder %v2027_v43, %v1910_v32  ;;  %v1799_v52 = vsel %vm1675_vm15, %v7364_v18, 496  ;;  %v7367_v0 = vld [vmem:[#allocation55_spill] sm:$0xff]  ;;  %v7381_v51 = vld [vmem:[#allocation120_spill] sm:$0xff] }
 0x242   : > { %vm2032_vm2 = vcmp.lt.s32.totalorder %v2029_v41, %v1912_v24  ;;  %v1801_v11 = vsel %vm1677_vm0, %v4978_v21, 496  ;;  %vm2049_vm3 = vcmp.lt.s32.totalorder %v2046_v56, %v1799_v52  ;;  %v2031_v31 = vsel %vm2030_vm1, %v2027_v43, %v1910_v32  ;;  %v7368_v32 = vld [vmem:[#allocation13_spill] sm:$0xff]  ;;  %v7385_v21 = vld [vmem:[#allocation126_spill] sm:$0xff]  ;;  %v7386_v18 = vld [vmem:[#allocation31_spill] sm:$0xff] }
 0x243   : > { %vm2051_vm4 = vcmp.lt.s32.totalorder %v2048_v60, %v1801_v11  ;;  %v2033_v3 = vsel %vm2032_vm2, %v2029_v41, %v1912_v24  ;;  %vm1679_vm5 = vcmp.le.f32.partialorder %v7365_v13, %v5309_v48  ;;  %vm1681_vm6 = vcmp.le.f32.partialorder %v7366_v19, %v5309_v48  ;;  %v7379_v19 = vld [vmem:[#allocation117_spill] sm:$0xff]  ;;  %v7380_v13 = vld [vmem:[#allocation108_spill] sm:$0xff]  ;;  %v7388_v28 = vld [vmem:[#allocation131_spill] sm:$0xff] }
 0x244   : > { %v2050_v16 = vsel %vm2049_vm3, %v2046_v56, %v1799_v52  ;;  %v2052_v23 = vsel %vm2051_vm4, %v2048_v60, %v1801_v11  ;;  %vm2034_vm7 = vcmp.lt.s32.totalorder %v2031_v31, %v2033_v3  ;;  %v1803_v39 = vsel %vm1679_vm5, %v4988_v34, 496  ;;  %v7369_v52 = vld [vmem:[#allocation44_spill] sm:$0xff]  ;;  %v7370_v11 = vld [vmem:[#allocation43_spill] sm:$0xff]  ;;  %v7384_v34 = vld [vmem:[#allocation18_spill] sm:$0xff] }
 0x245   : > { %v1805_v14 = vsel %vm1681_vm6, %v4997_v53, 496  ;;  %vm2053_vm9 = vcmp.lt.s32.totalorder %v2050_v16, %v1803_v39  ;;  %v2035_v35 = vsel %vm2034_vm7, %v2031_v31, %v2033_v3  ;;  %vm1683_vm11 = vcmp.le.f32.partialorder %v7367_v0, %v5309_v48  ;;  %v7371_v31 = vld [vmem:[#allocation47_spill] sm:$0xff]  ;;  %v7372_v3 = vld [vmem:[#allocation16_spill] sm:$0xff]  ;;  %v7378_v0 = vld [vmem:[#allocation125_spill] sm:$0xff] }
 0x246   : > { %vm2055_vm10 = vcmp.lt.s32.totalorder %v2052_v23, %v1805_v14  ;;  %vm1685_vm12 = vcmp.le.f32.partialorder %v7368_v32, %v5309_v48  ;;  %v2054_v43 = vsel %vm2053_vm9, %v2050_v16, %v1803_v39  ;;  %v2036_v24 = vrot.slane %v2035_v35, 4  ;;  %v7373_v16 = vld [vmem:[#allocation54_spill] sm:$0xff]  ;;  %v7375_v39 = vld [vmem:[#allocation25_spill] sm:$0xff]  ;;  %v7383_v53 = vld [vmem:[#allocation123_spill] sm:$0xff] }
 0x247   : > { %v2056_v41 = vsel %vm2055_vm10, %v2052_v23, %v1805_v14  ;;  %vm1687_vm13 = vcmp.le.f32.partialorder %v7369_v52, %v5309_v48  ;;  %v1807_v56 = vsel %vm1683_vm11, %v5006_v6, 496  ;;  %v1809_v60 = vsel %vm1685_vm12, %v5012_v27, 496  ;;  %v7374_v23 = vld [vmem:[#allocation66_spill] sm:$0xff]  ;;  %v7376_v14 = vld [vmem:[#allocation76_spill] sm:$0xff]  ;;  %v7377_v32 = vld [vmem:[#allocation81_spill] sm:$0xff] }
 0x248   : > { %vm1689_vm14 = vcmp.le.f32.partialorder %v7370_v11, %v5309_v48  ;;  %vm1691_vm15 = vcmp.le.f32.partialorder %v7371_v31, %v5309_v48  ;;  %vm2057_vm0 = vcmp.lt.s32.totalorder %v2054_v43, %v1807_v56  ;;  %vm2059_vm1 = vcmp.lt.s32.totalorder %v2056_v41, %v1809_v60  ;;  %v7382_v6 = vld [vmem:[#allocation60_spill] sm:$0xff]  ;;  %v7390_v52 = vld [vmem:[#allocation83_spill] sm:$0xff] }
 0x249   : > { %vm1693_vm2 = vcmp.le.f32.partialorder %v7372_v3, %v5309_v48  ;;  %vm1695_vm3 = vcmp.le.f32.partialorder %v7373_v16, %v5309_v48  ;;  %vm1699_vm5 = vcmp.le.f32.partialorder %v7375_v39, %v5309_v48  ;;  %vm2037_vm11 = vcmp.lt.s32.totalorder %v2035_v35, %v2036_v24  ;;  %v7392_v11 = vld [vmem:[#allocation84_spill] sm:$0xff] }
 0x24a   : > { %vm1711_vm4 = vcmp.le.f32.partialorder %v7381_v51, %v5309_v48  ;;  %v2058_v42 = vsel %vm2057_vm0, %v2054_v43, %v1807_v56  ;;  %v2060_v27 = vsel %vm2059_vm1, %v2056_v41, %v1809_v60  ;;  %vm1713_vm6 = vcmp.le.f32.partialorder %v7382_v6, %v5309_v48  ;;  %v7387_v60 = vld [vmem:[#allocation128_spill] sm:$0xff] }
 0x24b   : > { %v1811_v43 = vsel %vm1687_vm13, %v5018_v22, 496  ;;  %v1813_v41 = vsel %vm1689_vm14, %v5024_v17, 496  ;;  %v2038_v56 = vsel %vm2037_vm11, %v2035_v35, %v2036_v24  ;;  %vm1727_vm12 = vcmp.le.f32.partialorder %v7389_v5, %v5309_v48  ;;  %v7391_v22 = vld [vmem:[#allocation80_spill] sm:$0xff]  ;;  %v7395_v17 = vld [vmem:[#allocation98_spill] sm:$0xff] }
 0x24c   : > { %vm2061_vm10 = vcmp.lt.s32.totalorder %v2058_v42, %v1811_v43  ;;  %vm2063_vm9 = vcmp.lt.s32.totalorder %v2060_v27, %v1813_v41  ;;  %vm1733_vm14 = vcmp.le.f32.partialorder %v7392_v11, %v5309_v48  ;;  %v2582_v30 = vunpack.c.l.s4 %v3155_v62  ;;  %v7399_v35 = vld [vmem:[#allocation58_spill] sm:$0xff]  ;;  %v7400_v24 = vld [vmem:[#allocation36_spill] sm:$0xff] }
 0x24d   : > { %v2039_v25 = vrot.slane %v2038_v56, 2  ;;  %vm1743_vm7 = vcmp.le.f32.partialorder %v7397_v49, %v5309_v48  ;;  %v2062_v2 = vsel %vm2061_vm10, %v2058_v42, %v1811_v43  ;;  %v2064_v54 = vsel %vm2063_vm9, %v2060_v27, %v1813_v41  ;;  %v7402_v42 = vld [vmem:[#allocation15_spill] sm:$0xff] }
 0x24e   : > { %vm1745_vm11 = vcmp.le.f32.partialorder %v7398_v12, %v5309_v48  ;;  %vm1747_vm1 = vcmp.le.f32.partialorder %v7399_v35, %v5309_v48  ;;  %v1815_v62 = vsel %vm1691_vm15, %v5030_v58, 496  ;;  %v1817_v27 = vsel %vm1693_vm2, %v5036_v37, 496  ;;  %v7404_v58 = vld [vmem:[#allocation52_spill] sm:$0xff] }
 0x24f   : > { %v1819_v43 = vsel %vm1695_vm3, %v5042_v7, 496  ;;  %vm7403_vm15 = vcmp.le.f32.partialorder %v7374_v23, %v5309_v48  ;;  %v1823_v31 = vsel %vm1699_vm5, %v5054_v38, 496  ;;  %vm7405_vm2 = vcmp.le.f32.partialorder %v7376_v14, %v5309_v48  ;;  %v7406_v23 = vld [vmem:[#allocation51_spill] sm:$0xff] }
 0x250   : > { %v1821_v41 = vsel %vm7403_vm15, %v5048_v46, 496  ;;  %v1825_v3 = vsel %vm7405_vm2, %v5062_v44, 496  ;;  %vm2065_vm9 = vcmp.lt.s32.totalorder %v2062_v2, %v1815_v62  ;;  %vm2067_vm3 = vcmp.lt.s32.totalorder %v2064_v54, %v1817_v27  ;;  %v7411_v44 = vld [vmem:[#allocation61_spill] sm:$0xff] }
 0x251   : > { %v2583_v16 = vunpack.c.0.s8 %v2582_v30  ;;  %vm2040_vm13 = vcmp.lt.s32.totalorder %v2038_v56, %v2039_v25  ;;  %vm7407_vm0 = vcmp.le.f32.partialorder %v7377_v32, %v5309_v48  ;;  %vm7408_vm5 = vcmp.le.f32.partialorder %v7378_v0, %v5309_v48  ;;  %v7410_v30 = vld [vmem:[#allocation62_spill] sm:$0xff] }
 0x252   : > { %v1827_v39 = vsel %vm7407_vm0, %v5068_v40, 496  ;;  %v1829_v38 = vsel %vm7408_vm5, %v5074_v63, 496  ;;  %vm7409_vm2 = vcmp.le.f32.partialorder %v7379_v19, %v5309_v48  ;;  %vm1759_vm10 = vcmp.le.f32.partialorder %v7410_v30, %v5309_v48  ;;  %v7460_v30 = vld [vmem:[#allocation171_spill] sm:$0xff] }
 0x253   : > { %v5494_v14 = vsel %vm7409_vm2, %v5080_v9, 496  ;;  %vm1761_vm15 = vcmp.le.f32.partialorder %v7411_v44, %v5309_v48  ;;  %vm7412_vm0 = vcmp.le.f32.partialorder %v7380_v13, %v5309_v48  ;;  %v5510_v0 = vsel %vm1711_vm4, %v5100_v33, 496 }
 0x254   : > { %v5504_v32 = vsel %vm7412_vm0, %v5086_v57, 496  ;;  %v5516_v19 = vsel %vm1713_vm6, %v5106_v55, 496  ;;  %vm7413_vm5 = vcmp.le.f32.partialorder %v7383_v53, %v5309_v48  ;;  %vm7414_vm2 = vcmp.le.f32.partialorder %v7384_v34, %v5309_v48  ;;  %v7416_v53 = vld [vmem:[#allocation70_spill] sm:$0xff] }
 0x255   : > { %v5522_v9 = vsel %vm7413_vm5, %v5112_v15, 496  ;;  %v5528_v13 = vsel %vm7414_vm2, %v5118_v59, 496  ;;  %vm7415_vm4 = vcmp.le.f32.partialorder %v7385_v21, %v5309_v48  ;;  %v2066_v6 = vsel %vm2065_vm9, %v2062_v2, %v1815_v62  ;;  %v7417_v15 = vld [vmem:[#allocation77_spill] sm:$0xff] }
 0x256   : > { %v5534_v51 = vsel %vm7415_vm4, %v5125_v10, 496  ;;  %v2068_v55 = vsel %vm2067_vm3, %v2064_v54, %v1817_v27  ;;  %v2041_v33 = vsel %vm2040_vm13, %v2038_v56, %v2039_v25  ;;  %vm1763_vm6 = vcmp.le.f32.partialorder %v7416_v53, %v5309_v48  ;;  %v7420_v54 = vld [vmem:[#allocation22_spill] sm:$0xff]  ;;  %v7421_v25 = vld [vmem:[#allocation112_spill] sm:$0xff]  ;;  %v7446_v59 = vld [vmem:[#allocation161_spill] sm:$0xff] }
 0x257   : > { %vm1765_vm0 = vcmp.le.f32.partialorder %v7417_v15, %v5309_v48  ;;  %vm7418_vm5 = vcmp.le.f32.partialorder %v7386_v18, %v5309_v48  ;;  %v5549_v21 = vsub.s32 %v2583_v16, %v7338_v29  ;;  %v2580_v2 = vcombine.low %v5056_v1, %v5309_v48  ;;  %v7427_v18 = vld [vmem:[#allocation87_spill] sm:$0xff]  ;;  %v7461_v53 = vld [vmem:[#allocation173_spill] sm:$0xff] }
 0x258   : > { %v5546_v34 = vsel %vm7418_vm5, %v5128_v8, 496  ;;  %vm1767_vm13 = vcmp.le.f32.partialorder %v7420_v54, %v5309_v48  ;;  %vm1769_vm9 = vcmp.le.f32.partialorder %v7421_v25, %v5309_v48  ;;  %vm7422_vm3 = vcmp.le.f32.partialorder %v7387_v60, %v5309_v48  ;;  %v7425_v60 = vld [vmem:[#allocation114_spill] sm:$0xff]  ;;  %v7444_v8 = vld [vmem:[#allocation159_spill] sm:$0xff] }
 0x259   : > { %7419 = vst [vmem:[#allocation193_spill] sm:$0xff] %v5549_v21  ;;  %v5561_v56 = vsel %vm7422_vm3, %v5135_v20, 496  ;;  %vm7423_vm2 = vcmp.le.f32.partialorder %v7388_v28, %v5309_v48  ;;  %v5573_v62 = vsel %vm1727_vm12, %v5141_v61, 496  ;;  %vm7424_vm4 = vcmp.le.f32.partialorder %v7390_v52, %v5309_v48  ;;  %v7430_v61 = vld [vmem:[#allocation93_spill] sm:$0xff]  ;;  %v7439_v20 = vld [vmem:[#allocation118_spill] sm:$0xff] }
 0x25a   : > { %v5567_v16 = vsel %vm7423_vm2, %v5138_v50, 496  ;;  %v5579_v27 = vsel %vm7424_vm4, %v4972_v4, 496  ;;  %vm7426_vm3 = vcmp.le.f32.partialorder %v7391_v22, %v5309_v48  ;;  %v5593_v5 = vsel %vm1733_vm14, %v4982_v45, 496  ;;  %v7429_v4 = vld [vmem:[#allocation147_spill] sm:$0xff]  ;;  %v7434_v45 = vld [vmem:[#allocation150_spill] sm:$0xff] }
 0x25b   : > { %v5587_v28 = vsel %vm7426_vm3, %v4975_v26, 496  ;;  %vm2069_vm12 = vcmp.lt.s32.totalorder %v2066_v6, %v1819_v43  ;;  %vm2071_vm2 = vcmp.lt.s32.totalorder %v2068_v55, %v1821_v41  ;;  %v2042_v52 = vrot.slane %v2041_v33, 1  ;;  %v7432_v26 = vld [vmem:[#allocation148_spill] sm:$0xff]  ;;  %v7435_v50 = vld [vmem:[#allocation102_spill] sm:$0xff] }
 0x25c   : > { %vm7428_vm4 = vcmp.le.f32.partialorder %v7427_v18, %v5309_v48  ;;  %vm7431_vm3 = vcmp.le.f32.partialorder %v7430_v61, %v5309_v48  ;;  %vm7433_vm14 = vcmp.le.f32.partialorder %v7395_v17, %v5309_v48  ;;  %vm7436_vm5 = vcmp.le.f32.partialorder %v7435_v50, %v5309_v48  ;;  %v7440_v50 = vld [vmem:[#allocation121_spill] sm:$0xff]  ;;  %v7465_v25 = vld [vmem:[#allocation138_spill] sm:$0xff] }
 0x25d   : > { %v5599_v1 = vsel %vm7428_vm4, %v4985_v36, 496  ;;  %v5605_v22 = vsel %vm7431_vm3, %v7429_v4, 496  ;;  %v5611_v11 = vsel %vm7433_vm14, %v7432_v26, 496  ;;  %v5618_v18 = vsel %vm7436_vm5, %v7434_v45, 496  ;;  %v7437_v36 = vld [vmem:[#allocation151_spill] sm:$0xff]  ;;  %v7438_v4 = vld [vmem:[#allocation153_spill] sm:$0xff] }
 0x25e   : > { %v5624_v61 = vsel %vm1743_vm7, %v7437_v36, 496  ;;  %v5630_v17 = vsel %vm1745_vm11, %v7438_v4, 496  ;;  %v2587_v26 = vrot.slane %v2580_v2, %v5549_v21  ;;  %vm1773_vm4 = vcmp.le.f32.partialorder %v7439_v20, %v5309_v48  ;;  %v7441_v45 = vld [vmem:[#allocation155_spill] sm:$0xff]  ;;  %v7442_v36 = vld [vmem:[#allocation157_spill] sm:$0xff]  ;;  %v5794_v20 = vld [vmem:[%s457_s24] sm:$0x3] }
 0x25f   : > { %vm1775_vm5 = vcmp.le.f32.partialorder %v7440_v50, %v5309_v48  ;;  %v5641_v49 = vsel %vm1747_vm1, %v7441_v45, 496  ;;  %vm7443_vm7 = vcmp.le.f32.partialorder %v7400_v24, %v5309_v48  ;;  %v2070_v4 = vsel %vm2069_vm12, %v2066_v6, %v1819_v43  ;;  %v7449_v6 = vld [vmem:[#allocation162_spill] sm:$0xff]  ;;  %7474 = vst [vmem:[#allocation190_spill] sm:$0xff] %v5794_v20 }
 0x260   : > { %v5647_v12 = vsel %vm7443_vm7, %v7442_v36, 496  ;;  %v2072_v2 = vsel %vm2071_vm2, %v2068_v55, %v1821_v41  ;;  %vm7445_vm11 = vcmp.le.f32.partialorder %v7401_v47, %v5309_v48  ;;  %vm7447_vm3 = vcmp.le.f32.partialorder %v7402_v42, %v5309_v48  ;;  %v7451_v42 = vld [vmem:[#allocation163_spill] sm:$0xff] }
 0x261   : > { %v5653_v10 = vsel %vm7445_vm11, %v7444_v8, 496  ;;  %v5659_v35 = vsel %vm7447_vm3, %v7446_v59, 496  ;;  %vm2073_vm1 = vcmp.lt.s32.totalorder %v2070_v4, %v1823_v31  ;;  %vm2075_vm14 = vcmp.lt.s32.totalorder %v2072_v2, %v1825_v3  ;;  %v7454_v59 = vld [vmem:[#allocation164_spill] sm:$0xff] }
 0x262   : > { %vm2043_vm12 = vcmp.lt.s32.totalorder %v2041_v33, %v2042_v52  ;;  %vm7450_vm2 = vcmp.le.f32.partialorder %v7404_v58, %v5309_v48  ;;  %v2074_v43 = vsel %vm2073_vm1, %v2070_v4, %v1823_v31  ;;  %v2076_v41 = vsel %vm2075_vm14, %v2072_v2, %v1825_v3  ;;  %v5694_v2 = vld [vmem:[#allocation2] sm:$0x3] }
 0x263   : > { %v5671_v55 = vsel %vm7450_vm2, %v7449_v6, 496  ;;  %vm7452_vm7 = vcmp.le.f32.partialorder %v7406_v23, %v5309_v48  ;;  %vm2077_vm11 = vcmp.lt.s32.totalorder %v2074_v43, %v1827_v39  ;;  %vm2079_vm3 = vcmp.lt.s32.totalorder %v2076_v41, %v1829_v38  ;;  %v7455_v6 = vld [vmem:[#allocation167_spill] sm:$0xff]  ;;  %7456 = vst [vmem:[#allocation194_spill] sm:$0xff] %v5694_v2 }
 0x264   : > { %v5677_v47 = vsel %vm7452_vm7, %v7451_v42, 496  ;;  %v5680_v24 = vrot.slane %v2587_v26, %v5549_v21  ;;  %v5686_v58 = vsel %vm1759_vm10, %v7454_v59, 496  ;;  %v5692_v4 = vsel %vm1761_vm15, %v7455_v6, 496  ;;  %v7457_v26 = vld [vmem:[#allocation124_spill] sm:$0xff]  ;;  %v7478_v59 = vld [vmem:[#allocation143_spill] sm:$0xff] }
 0x265   : > { %v2078_v31 = vsel %vm2077_vm11, %v2074_v43, %v1827_v39  ;;  %v2080_v3 = vsel %vm2079_vm3, %v2076_v41, %v1829_v38  ;;  %v5696_v23 = vsel %vm2043_vm12, %v2041_v33, %v2042_v52  ;;  %vm1777_vm1 = vcmp.le.f32.partialorder %v7457_v26, %v5309_v48  ;;  %v7458_v39 = vld [vmem:[#allocation169_spill] sm:$0xff]  ;;  %v7459_v33 = vld [vmem:[#allocation170_spill] sm:$0xff] }
 0x266   : > { %7453 = vst [vmem:[#allocation159_spill] sm:$0xff] %v5680_v24  ;;  %vm2081_vm14 = vcmp.lt.s32.totalorder %v2078_v31, %v5494_v14  ;;  %vm2083_vm10 = vcmp.lt.s32.totalorder %v2080_v3, %v5504_v32  ;;  %v2596_v44 = vmin.f32 %v5694_v2, %v5680_v24  ;;  %v5714_v38 = vsel %vm1763_vm6, %v7458_v39, 496  ;;  %v7471_v24 = vld [vmem:[#allocation178_spill] sm:$0xff] }
 0x267   : > { %v5720_v52 = vsel %vm1765_vm0, %v7459_v33, 496  ;;  %v2082_v43 = vsel %vm2081_vm14, %v2078_v31, %v5494_v14  ;;  %v2084_v41 = vsel %vm2083_vm10, %v2080_v3, %v5504_v32  ;;  %v5728_v21 = vsel %vm1767_vm13, %v7460_v30, 496  ;;  %v7463_v32 = vld [vmem:[#allocation174_spill] sm:$0xff]  ;;  %v7472_v30 = vld [vmem:[#allocation91_spill] sm:$0xff]  ;;  %v7476_v33 = vld [vmem:[#allocation89_spill] sm:$0xff] }
 0x268   : > { %v5734_v39 = vsel %vm1769_vm9, %v7461_v53, 496  ;;  %vm2085_vm15 = vcmp.lt.s32.totalorder %v2082_v43, %v5510_v0  ;;  %vm2087_vm6 = vcmp.lt.s32.totalorder %v2084_v41, %v5516_v19  ;;  %2601 = vst.msk [vmem:[#allocation2] sm:$0x3] %vm5336_vm8, %v2596_v44  ;;  %vm2180_vm0 = vcmp.eq.s32.totalorder %v7338_v29, %v5696_v23 }
 0x269   : > { %vm7464_vm13 = vcmp.le.f32.partialorder %v7425_v60, %v5309_v48  ;;  %v2086_v31 = vsel %vm2085_vm15, %v2082_v43, %v5510_v0  ;;  %v2088_v3 = vsel %vm2087_vm6, %v2084_v41, %v5516_v19  ;;  %vm2184_vm9 = vcmp.eq.s32.totalorder %v7465_v25, %v5696_v23  ;;  %v7466_v60 = vld [vmem:[#allocation136_spill] sm:$0xff]  ;;  %v7467_v0 = vld [vmem:[#allocation139_spill] sm:$0xff]  ;;  %v7468_v19 = vld [vmem:[#allocation17_spill] sm:$0xff] }
 0x26a   : > { %v5746_v14 = vsel %vm7464_vm13, %v7463_v32, 496  ;;  %vm2089_vm12 = vcmp.lt.s32.totalorder %v2086_v31, %v5522_v9  ;;  %vm2091_vm2 = vcmp.lt.s32.totalorder %v2088_v3, %v5528_v13  ;;  %vm2182_vm7 = vcmp.eq.s32.totalorder %v7466_v60, %v5696_v23  ;;  %v7469_v43 = vld [vmem:[#allocation127_spill] sm:$0xff]  ;;  %v7470_v32 = vld [vmem:[#allocation176_spill] sm:$0xff] }
 0x26b   : > { %vm2186_vm11 = vcmp.eq.s32.totalorder %v7467_v0, %v5696_v23  ;;  %vm1779_vm3 = vcmp.le.f32.partialorder %v7468_v19, %v5309_v48  ;;  %vm1781_vm14 = vcmp.le.f32.partialorder %v7469_v43, %v5309_v48  ;;  %v2090_v41 = vsel %vm2089_vm12, %v2086_v31, %v5522_v9 }
 0x26c   : > { %v2092_v54 = vsel %vm2091_vm2, %v2088_v3, %v5528_v13  ;;  %v5774_v44 = vsel %vm1773_vm4, %v7470_v32, 496  ;;  %v5780_v53 = vsel %vm1775_vm5, %v7471_v24, 496  ;;  %vm2093_vm10 = vcmp.lt.s32.totalorder %v2090_v41, %v5534_v51  ;;  %v7473_v13 = vld [vmem:[#allocation86_spill] sm:$0xff] }
 0x26d   : > { %vm2095_vm15 = vcmp.lt.s32.totalorder %v2092_v54, %v5546_v34  ;;  %v2304_v9 = vsel %vm2180_vm0, inf, %v7472_v30  ;;  %v2308_v31 = vsel %vm2184_vm9, inf, %v7473_v13  ;;  %v2094_v3 = vsel %vm2093_vm10, %v2090_v41, %v5534_v51  ;;  %v7475_v24 = vld [vmem:[#allocation94_spill] sm:$0xff]  ;;  %v7477_v30 = vld [vmem:[#allocation140_spill] sm:$0xff] }
 0x26e   : > { %v2096_v50 = vsel %vm2095_vm15, %v2092_v54, %v5546_v34  ;;  %v2306_v32 = vsel %vm2182_vm7, inf, %v7475_v24  ;;  %v2310_v6 = vsel %vm2186_vm11, inf, %v7476_v33  ;;  %vm2097_vm4 = vcmp.lt.s32.totalorder %v2094_v3, %v5561_v56  ;;  %v7479_v13 = vld [vmem:[#allocation180_spill] sm:$0xff] }
 0x26f   : > { %vm2099_vm5 = vcmp.lt.s32.totalorder %v2096_v50, %v5567_v16  ;;  %vm2188_vm6 = vcmp.eq.s32.totalorder %v7477_v30, %v5696_v23  ;;  %vm2190_vm0 = vcmp.eq.s32.totalorder %v7478_v59, %v5696_v23  ;;  %v2098_v51 = vsel %vm2097_vm4, %v2094_v3, %v5561_v56  ;;  %v2654_v54 = vld [vmem:[#allocation2] sm:$0x3] }
 0x270   : > { %v2100_v34 = vsel %vm2099_vm5, %v2096_v50, %v5567_v16  ;;  %v2428_v41 = vmin.f32 %v2304_v9, %v2308_v31  ;;  %vm2101_vm13 = vcmp.lt.s32.totalorder %v2098_v51, %v5573_v62  ;;  %v2655_v24 = vadd.f32 %v2654_v54, %v5794_v20  ;;  %v7480_v50 = vld [vmem:[#allocation146_spill] sm:$0xff]  ;;  %v7483_v9 = vld [vmem:[#allocation103_spill] sm:$0xff] }
 0x271   : > { %vm2103_vm9 = vcmp.lt.s32.totalorder %v2100_v34, %v5579_v27  ;;  %v2429_v33 = vmin.f32 %v2306_v32, %v2310_v6  ;;  %v5813_v42 = vsel %vm1777_vm1, %v7479_v13, 496  ;;  %v2102_v0 = vsel %vm2101_vm13, %v2098_v51, %v5573_v62  ;;  %v7482_v6 = vld [vmem:[#allocation100_spill] sm:$0xff]  ;;  %v7484_v51 = vld [vmem:[#allocation149_spill] sm:$0xff] }
 0x272   : > { %v2104_v56 = vsel %vm2103_vm9, %v2100_v34, %v5579_v27  ;;  %vm2192_vm12 = vcmp.eq.s32.totalorder %v7480_v50, %v5696_v23  ;;  %vm2105_vm2 = vcmp.lt.s32.totalorder %v2102_v0, %v5587_v28  ;;  %v5821_v16 = vmax.f32 %v2655_v24, 0.0 }
 0x273   : > { %vm2107_vm7 = vcmp.lt.s32.totalorder %v2104_v56, %v5593_v5  ;;  %v2312_v32 = vsel %vm2188_vm6, inf, %v7482_v6  ;;  %v2314_v62 = vsel %vm2190_vm0, inf, %v7483_v9  ;;  %v2106_v27 = vsel %vm2105_vm2, %v2102_v0, %v5587_v28  ;;  %v7485_v6 = vld [vmem:[#allocation135_spill] sm:$0xff] }
 0x274   : > { %7481 = vst [vmem:[#allocation138_spill] sm:$0xff] %v5821_v16  ;;  %v2108_v31 = vsel %vm2107_vm7, %v2104_v56, %v5593_v5  ;;  %v2430_v3 = vmin.f32 %v2428_v41, %v2312_v32  ;;  %vm2109_vm1 = vcmp.lt.s32.totalorder %v2106_v27, %v5599_v1  ;;  %3038 = vrsqrt.f32 %v5821_v16  ;;  %v7486_v28 = vld [vmem:[#allocation187_spill] sm:$0xff]  ;;  %v7489_v32 = vld [vmem:[#allocation110_spill] sm:$0xff] }
 0x275   : > { %vm2111_vm11 = vcmp.lt.s32.totalorder %v2108_v31, %v5605_v22  ;;  %vm2194_vm10 = vcmp.eq.s32.totalorder %v7484_v51, %v5696_v23  ;;  %v2431_v34 = vmin.f32 %v2429_v33, %v2314_v62  ;;  %v2110_v54 = vsel %vm2109_vm1, %v2106_v27, %v5599_v1  ;;  %v7487_v1 = vld [vmem:[#allocation152_spill] sm:$0xff]  ;;  %v7490_v27 = vld [vmem:[#allocation154_spill] sm:$0xff] }
 0x276   : > { %v2112_v24 = vsel %vm2111_vm11, %v2108_v31, %v5605_v22  ;;  %v5844_v5 = vsel %vm1779_vm3, %v7485_v6, 496  ;;  %v5850_v0 = vsel %vm1781_vm14, %v7486_v28, 496  ;;  %vm2113_vm15 = vcmp.lt.s32.totalorder %v2110_v54, %v5611_v11  ;;  %v7488_v22 = vld [vmem:[#allocation106_spill] sm:$0xff] }
 0x277   : > { %vm2115_vm4 = vcmp.lt.s32.totalorder %v2112_v24, %v5618_v18  ;;  %vm2196_vm5 = vcmp.eq.s32.totalorder %v7487_v1, %v5696_v23  ;;  %v2316_v41 = vsel %vm2192_vm12, inf, %v7488_v22  ;;  %v2114_v33 = vsel %vm2113_vm15, %v2110_v54, %v5611_v11  ;;  %v7491_v22 = vld [vmem:[#allocation156_spill] sm:$0xff] }
 0x278   : > { %v2116_v56 = vsel %vm2115_vm4, %v2112_v24, %v5618_v18  ;;  %v2318_v9 = vsel %vm2194_vm10, inf, %v7489_v32  ;;  %v2432_v62 = vmin.f32 %v2430_v3, %v2316_v41  ;;  %vm2117_vm3 = vcmp.lt.s32.totalorder %v2114_v33, %v5624_v61  ;;  %v7492_v18 = vld [vmem:[#allocation158_spill] sm:$0xff]  ;;  %v7493_v11 = vld [vmem:[#allocation160_spill] sm:$0xff]  ;;  %v7494_v3 = vld [vmem:[#allocation41_spill] sm:$0xff] }
 0x279   : > { %vm2119_vm14 = vcmp.lt.s32.totalorder %v2116_v56, %v5630_v17  ;;  %vm2198_vm6 = vcmp.eq.s32.totalorder %v7490_v27, %v5696_v23  ;;  %v2433_v31 = vmin.f32 %v2431_v34, %v2318_v9  ;;  %v2118_v20 = vsel %vm2117_vm3, %v2114_v33, %v5624_v61  ;;  %v7496_v34 = vld [vmem:[#allocation133_spill] sm:$0xff]  ;;  %v7497_v41 = vld [vmem:[#allocation12_spill] sm:$0xff] }
 0x27a   : > { %v2120_v43 = vsel %vm2119_vm14, %v2116_v56, %v5630_v17  ;;  %vm2200_vm0 = vcmp.eq.s32.totalorder %v7491_v22, %v5696_v23  ;;  %vm2202_vm13 = vcmp.eq.s32.totalorder %v7492_v18, %v5696_v23  ;;  %vm2121_vm9 = vcmp.lt.s32.totalorder %v2118_v20, %v5641_v49  ;;  %v7495_v17 = vld [vmem:[#allocation130_spill] sm:$0xff] }
 0x27b   : > { %vm2123_vm12 = vcmp.lt.s32.totalorder %v2120_v43, %v5647_v12  ;;  %vm2204_vm2 = vcmp.eq.s32.totalorder %v7493_v11, %v5696_v23  ;;  %v2320_v61 = vsel %vm2196_vm5, inf, %v7494_v3  ;;  %vm1783_vm7 = vcmp.le.f32.partialorder %v7495_v17, %v5309_v48 }
 0x27c   : > { %vm1785_vm1 = vcmp.le.f32.partialorder %v7496_v34, %v5309_v48  ;;  %v2122_v54 = vsel %vm2121_vm9, %v2118_v20, %v5641_v49  ;;  %v2124_v24 = vsel %vm2123_vm12, %v2120_v43, %v5647_v12  ;;  %v2322_v33 = vsel %vm2198_vm6, inf, %v7497_v41  ;;  %v7498_v20 = vld [vmem:[#allocation39_spill] sm:$0xff]  ;;  %v7499_v49 = vld [vmem:[#allocation40_spill] sm:$0xff]  ;;  %v7501_v43 = vld [vmem:[#allocation137_spill] sm:$0xff] }
 0x27d   : > { %v2434_v56 = vmin.f32 %v2432_v62, %v2320_v61  ;;  %vm2125_vm11 = vcmp.lt.s32.totalorder %v2122_v54, %v5653_v10  ;;  %vm2127_vm10 = vcmp.lt.s32.totalorder %v2124_v24, %v5659_v35  ;;  %vm2206_vm15 = vcmp.eq.s32.totalorder %v5036_v37, %v5696_v23 }
 0x27e   : > { %v2435_v32 = vmin.f32 %v2433_v31, %v2322_v33  ;;  %v2126_v9 = vsel %vm2125_vm11, %v2122_v54, %v5653_v10  ;;  %v2128_v3 = vsel %vm2127_vm10, %v2124_v24, %v5659_v35  ;;  %v3039_v19 = vpop.eup %3038  ;;  %vm2208_vm4 = vcmp.eq.s32.totalorder %v5042_v7, %v5696_v23  ;;  %v7500_v35 = vld [vmem:[#allocation134_spill] sm:$0xff] }
 0x27f   : > { %vm2210_vm5 = vcmp.eq.s32.totalorder %v5048_v46, %v5696_v23  ;;  %vm2129_vm3 = vcmp.lt.s32.totalorder %v2126_v9, %v5671_v55  ;;  %vm2131_vm14 = vcmp.lt.s32.totalorder %v2128_v3, %v5677_v47  ;;  %v2324_v12 = vsel %vm2200_vm0, inf, %v7498_v20 }
 0x280   : > { %v2326_v10 = vsel %vm2202_vm13, inf, %v7499_v49  ;;  %vm1787_vm6 = vcmp.le.f32.partialorder %v7500_v35, %v5309_v48  ;;  %vm1789_vm9 = vcmp.le.f32.partialorder %v7501_v43, %v5309_v48  ;;  %v2130_v62 = vsel %vm2129_vm3, %v2126_v9, %v5671_v55  ;;  %v7535_v43 = vld [vmem:[#allocation186_spill] sm:$0xff] }
 0x281   : > { %v2132_v31 = vsel %vm2131_vm14, %v2128_v3, %v5677_v47  ;;  %v2436_v61 = vmin.f32 %v2434_v56, %v2324_v12  ;;  %vm2133_vm12 = vcmp.lt.s32.totalorder %v2130_v62, %v5686_v58  ;;  %v2666_v54 = vmul.f32 %v3039_v19, %v5821_v16  ;;  %v7502_v56 = vld [vmem:[#allocation64_spill] sm:$0xff] }
 0x282   : > { %vm2135_vm0 = vcmp.lt.s32.totalorder %v2132_v31, %v5692_v4  ;;  %v2437_v24 = vmin.f32 %v2435_v32, %v2326_v10  ;;  %v2134_v41 = vsel %vm2133_vm12, %v2130_v62, %v5686_v58  ;;  %vm2667_vm13 = vcmp.eq.f32.partialorder %v5821_v16, inf  ;;  %v7503_v32 = vld [vmem:[#allocation68_spill] sm:$0xff]  ;;  %v7505_v62 = vld [vmem:[#allocation189_spill] sm:$0xff] }
 0x283   : > { %v2136_v33 = vsel %vm2135_vm0, %v2132_v31, %v5692_v4  ;;  %vm2137_vm11 = vcmp.lt.s32.totalorder %v2134_v41, %v5714_v38  ;;  %v2668_v47 = vsel %vm2667_vm13, %v5821_v16, %v2666_v54  ;;  %v2670_v55 = vand.u32 2147483648, %v5821_v16 }
 0x284   : > { %vm2139_vm10 = vcmp.lt.s32.totalorder %v2136_v33, %v5720_v52  ;;  %v2328_v19 = vsel %vm2204_vm2, inf, %v7502_v56  ;;  %v2138_v58 = vsel %vm2137_vm11, %v2134_v41, %v5714_v38  ;;  %vm2669_vm3 = vcmp.eq.f32.partialorder %v5821_v16, 0.0 }
 0x285   : > { %v2140_v4 = vsel %vm2139_vm10, %v2136_v33, %v5720_v52  ;;  %v2330_v9 = vsel %vm2206_vm15, inf, %v7503_v32  ;;  %vm2141_vm14 = vcmp.lt.s32.totalorder %v2138_v58, %v5728_v21  ;;  %v2671_v3 = vsel %vm2669_vm3, %v2670_v55, %v2668_v47  ;;  %v7504_v52 = vld [vmem:[#allocation188_spill] sm:$0xff]  ;;  %v7509_v33 = vld [vmem:[#allocation59_spill] sm:$0xff] }
 0x286   : > { %vm2143_vm12 = vcmp.lt.s32.totalorder %v2140_v4, %v5734_v39  ;;  %v2438_v20 = vmin.f32 %v2436_v61, %v2328_v19  ;;  %v2439_v12 = vmin.f32 %v2437_v24, %v2330_v9  ;;  %v2142_v49 = vsel %vm2141_vm14, %v2138_v58, %v5728_v21  ;;  %2672 = vst.msk [vmem:[%s5942_s27] sm:$0x3] %vm5336_vm8, %v2671_v3  ;;  %v7506_v21 = vld [vmem:[#allocation165_spill] sm:$0xff]  ;;  %v7510_v19 = vld [vmem:[#allocation191_spill] sm:$0xff] }
 0x287   : > { %v2144_v38 = vsel %vm2143_vm12, %v2140_v4, %v5734_v39  ;;  %v1907_v10 = vsel %vm1783_vm7, %v7504_v52, 496  ;;  %v1909_v31 = vsel %vm1785_vm1, %v7505_v62, 496  ;;  %vm2145_vm2 = vcmp.lt.s32.totalorder %v2142_v49, %v5746_v14  ;;  %v7507_v39 = vld [vmem:[#allocation168_spill] sm:$0xff]  ;;  %v7508_v24 = vld [vmem:[#allocation49_spill] sm:$0xff] }
 0x288   : > { %vm2147_vm15 = vcmp.lt.s32.totalorder %v2144_v38, %v5774_v44  ;;  %vm2212_vm0 = vcmp.eq.s32.totalorder %v7506_v21, %v5696_v23  ;;  %vm2214_vm13 = vcmp.eq.s32.totalorder %v7507_v39, %v5696_v23  ;;  %v2146_v61 = vsel %vm2145_vm2, %v2142_v49, %v5746_v14  ;;  %v7511_v4 = vld [vmem:[#allocation192_spill] sm:$0xff]  ;;  %v7512_v9 = vld [vmem:[#allocation21_spill] sm:$0xff] }
 0x289   : > { %v2148_v54 = vsel %vm2147_vm15, %v2144_v38, %v5774_v44  ;;  %v2332_v41 = vsel %vm2208_vm4, inf, %v7508_v24  ;;  %v2334_v47 = vsel %vm2210_vm5, inf, %v7509_v33  ;;  %vm2149_vm7 = vcmp.lt.s32.totalorder %v2146_v61, %v5780_v53 }
 0x28a   : > { %vm2151_vm1 = vcmp.lt.s32.totalorder %v2148_v54, %v5813_v42  ;;  %v2440_v55 = vmin.f32 %v2438_v20, %v2332_v41  ;;  %v2441_v56 = vmin.f32 %v2439_v12, %v2334_v47  ;;  %v2150_v14 = vsel %vm2149_vm7, %v2146_v61, %v5780_v53  ;;  %v7513_v20 = vld [vmem:[#allocation19_spill] sm:$0xff]  ;;  %v7516_v41 = vld [vmem:[#allocation74_spill] sm:$0xff] }
 0x28b   : > { %v2152_v44 = vsel %vm2151_vm1, %v2148_v54, %v5813_v42  ;;  %v1911_v58 = vsel %vm1787_vm6, %v7510_v19, 496  ;;  %v1913_v32 = vsel %vm1789_vm9, %v7511_v4, 496  ;;  %vm2153_vm4 = vcmp.lt.s32.totalorder %v2150_v14, %v5844_v5 }
 0x28c   : > { %vm2155_vm5 = vcmp.lt.s32.totalorder %v2152_v44, %v5850_v0  ;;  %vm2216_vm11 = vcmp.eq.s32.totalorder %v5068_v40, %v5696_v23  ;;  %vm2218_vm10 = vcmp.eq.s32.totalorder %v5074_v63, %v5696_v23  ;;  %v2154_v53 = vsel %vm2153_vm4, %v2150_v14, %v5844_v5  ;;  %v7514_v5 = vld [vmem:[#allocation172_spill] sm:$0xff] }
 0x28d   : > { %v2156_v42 = vsel %vm2155_vm5, %v2152_v44, %v5850_v0  ;;  %v2336_v3 = vsel %vm2212_vm0, inf, %v7512_v9  ;;  %v2338_v12 = vsel %vm2214_vm13, inf, %v7513_v20  ;;  %vm2157_vm6 = vcmp.lt.s32.totalorder %v2154_v53, %v1907_v10  ;;  %v7515_v0 = vld [vmem:[#allocation69_spill] sm:$0xff]  ;;  %v7518_v44 = vld [vmem:[#allocation67_spill] sm:$0xff] }
 0x28e   : > { %vm2159_vm9 = vcmp.lt.s32.totalorder %v2156_v42, %v1909_v31  ;;  %v2442_v49 = vmin.f32 %v2440_v55, %v2336_v3  ;;  %v2443_v38 = vmin.f32 %v2441_v56, %v2338_v12  ;;  %v2158_v61 = vsel %vm2157_vm6, %v2154_v53, %v1907_v10  ;;  %v7517_v56 = vld [vmem:[#allocation24_spill] sm:$0xff]  ;;  %v7520_v9 = vld [vmem:[#allocation177_spill] sm:$0xff] }
 0x28f   : > { %v2160_v54 = vsel %vm2159_vm9, %v2156_v42, %v1909_v31  ;;  %vm2161_vm3 = vcmp.lt.s32.totalorder %v2158_v61, %v1911_v58  ;;  %vm2220_vm12 = vcmp.eq.s32.totalorder %v7514_v5, %v5696_v23  ;;  %vm2222_vm2 = vcmp.eq.s32.totalorder %v5086_v57, %v5696_v23  ;;  %v7519_v42 = vld [vmem:[#allocation175_spill] sm:$0xff] }
 0x290   : > { %vm2163_vm14 = vcmp.lt.s32.totalorder %v2160_v54, %v1913_v32  ;;  %v2340_v24 = vsel %vm2216_vm11, inf, %v7515_v0  ;;  %v2342_v33 = vsel %vm2218_vm10, inf, %v7516_v41  ;;  %v2162_v47 = vsel %vm2161_vm3, %v2158_v61, %v1911_v58  ;;  %v7521_v0 = vld [vmem:[#allocation26_spill] sm:$0xff]  ;;  %v7523_v58 = vld [vmem:[#allocation179_spill] sm:$0xff] }
 0x291   : > { %v2444_v10 = vmin.f32 %v2442_v49, %v2340_v24  ;;  %v2445_v31 = vmin.f32 %v2443_v38, %v2342_v33  ;;  %v2164_v55 = vsel %vm2163_vm14, %v2160_v54, %v1913_v32  ;;  %v2344_v14 = vsel %vm2220_vm12, inf, %v7517_v56  ;;  %v7522_v49 = vld [vmem:[#allocation27_spill] sm:$0xff]  ;;  %v7524_v32 = vld [vmem:[#allocation181_spill] sm:$0xff]  ;;  %v7525_v33 = vld [vmem:[#allocation28_spill] sm:$0xff] }
 0x292   : > { %v2346_v53 = vsel %vm2222_vm2, inf, %v7518_v44  ;;  %vm2165_vm15 = vcmp.lt.s32.totalorder %v2162_v47, %v2164_v55  ;;  %vm2224_vm0 = vcmp.eq.s32.totalorder %v7519_v42, %v5696_v23  ;;  %vm2226_vm13 = vcmp.eq.s32.totalorder %v7520_v9, %v5696_v23  ;;  %v7526_v44 = vld [vmem:[#allocation57_spill] sm:$0xff] }
 0x293   : > { %v2446_v3 = vmin.f32 %v2444_v10, %v2344_v14  ;;  %v2447_v20 = vmin.f32 %v2445_v31, %v2346_v53  ;;  %v2166_v12 = vsel %vm2165_vm15, %v2162_v47, %v2164_v55  ;;  %v2348_v41 = vsel %vm2224_vm0, inf, %v7521_v0  ;;  %v7527_v31 = vld [vmem:[#allocation182_spill] sm:$0xff]  ;;  %v7528_v47 = vld [vmem:[#allocation183_spill] sm:$0xff]  ;;  %v7529_v53 = vld [vmem:[#allocation184_spill] sm:$0xff] }
 0x294   : > { %v2350_v38 = vsel %vm2226_vm13, inf, %v7522_v49  ;;  %vm2228_vm7 = vcmp.eq.s32.totalorder %v7523_v58, %v5696_v23  ;;  %vm2230_vm1 = vcmp.eq.s32.totalorder %v7524_v32, %v5696_v23  ;;  %v2167_v24 = vrot.slane %v2166_v12, 4  ;;  %v7531_v0 = vld [vmem:[#allocation20_spill] sm:$0xff]  ;;  %v7532_v49 = vld [vmem:[#allocation185_spill] sm:$0xff] }
 0x295   : > { %v2448_v61 = vmin.f32 %v2446_v3, %v2348_v41  ;;  %v2449_v54 = vmin.f32 %v2447_v20, %v2350_v38  ;;  %v2352_v56 = vsel %vm2228_vm7, inf, %v7525_v33  ;;  %v2354_v10 = vsel %vm2230_vm1, inf, %v7526_v44  ;;  %v7530_v3 = vld [vmem:[#allocation30_spill] sm:$0xff] }
 0x296   : > { %vm2232_vm4 = vcmp.eq.s32.totalorder %v7527_v31, %v5696_v23  ;;  %vm2234_vm5 = vcmp.eq.s32.totalorder %v7528_v47, %v5696_v23  ;;  %vm2168_vm11 = vcmp.lt.s32.totalorder %v2166_v12, %v2167_v24  ;;  %vm2236_vm10 = vcmp.eq.s32.totalorder %v7529_v53, %v5696_v23 }
 0x297   : > { %v2450_v55 = vmin.f32 %v2448_v61, %v2352_v56  ;;  %v2451_v14 = vmin.f32 %v2449_v54, %v2354_v10  ;;  %v2356_v20 = vsel %vm2232_vm4, inf, %v7530_v3  ;;  %v2358_v41 = vsel %vm2234_vm5, inf, %v7531_v0  ;;  %v7533_v61 = vld [vmem:[#allocation32_spill] sm:$0xff]  ;;  %v7534_v56 = vld [vmem:[#allocation33_spill] sm:$0xff] }
 0x298   : > { %vm2238_vm6 = vcmp.eq.s32.totalorder %v7532_v49, %v5696_v23  ;;  %v2169_v44 = vsel %vm2168_vm11, %v2166_v12, %v2167_v24  ;;  %v2360_v54 = vsel %vm2236_vm10, inf, %v7533_v61  ;;  %vm2240_vm9 = vcmp.eq.s32.totalorder %v7535_v43, %v5696_v23  ;;  %v7536_v3 = vld [vmem:[#allocation141_spill] sm:$0xff] }
 0x299   : > { %v2452_v38 = vmin.f32 %v2450_v55, %v2356_v20  ;;  %v2453_v33 = vmin.f32 %v2451_v14, %v2358_v41  ;;  %v2362_v10 = vsel %vm2238_vm6, inf, %v7534_v56  ;;  %v2170_v16 = vrot.slane %v2169_v44, 2 }
 0x29a   : > { %vm2242_vm3 = vcmp.eq.s32.totalorder %v7536_v3, %v5696_v23 }
 0x29b   : > { %v2454_v0 = vmin.f32 %v2452_v38, %v2360_v54  ;;  %v2455_v35 = vmin.f32 %v2453_v33, %v2362_v10 }
 0x29c   : > { %3053 = shalt.err (!%p3050_p8)
}
 0x29d   : > { %s3054_s17 = scalar_lea.hbm %s6047_s8, 32  ;;  %s3058_s9 = scalar_lea.hbm %s6549_s5, 64 }
 0x29e   : > { %p3055_p11 = scmp.ne.s32.totalorder %s6047_s8, %s3054_s17  ;;  %p3059_p0 = scmp.lt.u32.totalorder %s6047_s8, %s6549_s5 }
 0x29f   : > { %p3060_p1 = scmp.lt.u32.totalorder %s3058_s9, %s3054_s17  ;;  %p3062_p3 = scmp.lt.u32.totalorder %s3054_s17, %s6047_s8 }
 0x2a0   : > { %p3056_p12 = pnand %p3055_p11, %p3227_p5 }
 0x2a1   : > { %p3061_p2 = por %p3060_p1, %p3059_p0 }
 0x2a2   : > { %p3057_p13 = pneg %p3056_p12 }
 0x2a3   : > { %p3063_p4 = por %p3062_p3, %p3061_p2 }
 0x2a5   : > { %p3064_p6 = pnand %p3063_p4, %p3057_p13 }
 0x2a7   : > { %3067 = shalt.err (!%p3064_p6)
}
 0x2a8   : > { %2973 = dma.vmem_to_hbm [thread:$0]  (%p3227_p5), %s2708_s10, 32, %s6047_s8, %s2679_s11   ;;  %v7537_v12 = vld [vmem:[#allocation34_spill] sm:$0xff]  ;;  %v7538_v55 = vld [vmem:[#allocation72_spill] sm:$0xff]  ;;  %vm2171_vm14 = vcmp.lt.s32.totalorder %v2169_v44, %v2170_v16  ;;  %v7541_v54 = vld [vmem:[#allocation71_spill] sm:$0xff]  ;;  %vm2260_vm11 = vcmp.eq.s32.totalorder %v7441_v45, %v5696_v23  ;;  %vm2262_vm10 = vcmp.eq.s32.totalorder %v7442_v36, %v5696_v23  ;;  %vm2264_vm6 = vcmp.eq.s32.totalorder %v7444_v8, %v5696_v23 }
 0x2a9   : > { %v2364_v24 = vsel %vm2240_vm9, inf, %v7537_v12  ;;  %v2366_v14 = vsel %vm2242_vm3, inf, %v7538_v55  ;;  %v7539_v20 = vld [vmem:[#allocation142_spill] sm:$0xff]  ;;  %v7540_v41 = vld [vmem:[#allocation144_spill] sm:$0xff]  ;;  %v2172_v61 = vsel %vm2171_vm14, %v2169_v44, %v2170_v16  ;;  %v7542_v10 = vld [vmem:[#allocation73_spill] sm:$0xff]  ;;  %s432_s8 = scalar_lea.vmem [#allocation6], %s2862_s25  ;;  %s6493_s15 = scalar_lea.hbm %s6548_s4, %s2874_s29 }
 0x2aa   : > { %vm2244_vm12 = vcmp.eq.s32.totalorder %v7539_v20, %v5696_v23  ;;  %vm2246_vm2 = vcmp.eq.s32.totalorder %v7540_v41, %v5696_v23  ;;  %v2456_v38 = vmin.f32 %v2454_v0, %v2364_v24  ;;  %v2457_v33 = vmin.f32 %v2455_v35, %v2366_v14  ;;  %v7543_v12 = vld [vmem:[#allocation145_spill] sm:$0xff]  ;;  %v7544_v17 = vld [vmem:[#allocation147_spill] sm:$0xff]  ;;  %v7545_v19 = vld [vmem:[#allocation78_spill] sm:$0xff]  ;;  %s2693_s10 = sshll.u32 %s432_s8, 4  ;;  %s2674_s25 = scalar_lea.sflag [#allocation7], %s3385_s14  ;;  %s6495_s10 = int_to_ptr.vmem [resolvable:$true] %s2693_s10 }
 0x2ab   : > { %v2368_v56 = vsel %vm2244_vm12, inf, %v7541_v54  ;;  %v2370_v34 = vsel %vm2246_vm2, inf, %v7542_v10  ;;  %vm2248_vm15 = vcmp.eq.s32.totalorder %v7543_v12, %v5696_v23  ;;  %vm2250_vm0 = vcmp.eq.s32.totalorder %v7544_v17, %v5696_v23  ;;  %v7546_v3 = vld [vmem:[#allocation79_spill] sm:$0xff]  ;;  %v7547_v35 = vld [vmem:[#allocation148_spill] sm:$0xff]  ;;  %v7548_v16 = vld [vmem:[#allocation150_spill] sm:$0xff]  ;;  %s3068_s16 = scalar_lea.vmem %s6495_s10, 32 }
 0x2ac   : > { %v2458_v55 = vmin.f32 %v2456_v38, %v2368_v56  ;;  %v2459_v26 = vmin.f32 %v2457_v33, %v2370_v34  ;;  %v2173_v4 = vrot.slane %v2172_v61, 1  ;;  %v2372_v20 = vsel %vm2248_vm15, inf, %v7545_v19  ;;  %v7549_v14 = vld [vmem:[#allocation151_spill] sm:$0xff]  ;;  %v7550_v34 = vld [vmem:[#allocation153_spill] sm:$0xff]  ;;  %v7551_v19 = vld [vmem:[#allocation82_spill] sm:$0xff]  ;;  %p3069_p7 = scmp.ne.s32.totalorder %s6495_s10, %s3068_s16  ;;  %s3157_s21 = smov [#allocation6]  }
 0x2ad   : > { %v2374_v41 = vsel %vm2250_vm0, inf, %v7546_v3  ;;  %vm2252_vm13 = vcmp.eq.s32.totalorder %v7547_v35, %v5696_v23  ;;  %vm2254_vm7 = vcmp.eq.s32.totalorder %v7548_v16, %v5696_v23  ;;  %v2568_v24 = vsub.s32 0, %v7338_v29  ;;  %v7552_v3 = vld [vmem:[#allocation85_spill] sm:$0xff]  ;;  %v7564_v16 = vld [vmem:[#allocation88_spill] sm:$0xff]  ;;  %v7565_v17 = vld [vmem:[#allocation95_spill] sm:$0xff]  ;;  %s3072_s17 = sshll.u32 %s3157_s21, 4  ;;  %s3073_s17 = int_to_ptr.vmem [resolvable:$false] %s3072_s17 }
 0x2ae   : > { %v2460_v44 = vmin.f32 %v2458_v55, %v2372_v20  ;;  %v2461_v0 = vmin.f32 %v2459_v26, %v2374_v41  ;;  %vm2174_vm1 = vcmp.lt.s32.totalorder %v2172_v61, %v2173_v4  ;;  %vm2256_vm4 = vcmp.eq.s32.totalorder %v7549_v14, %v5696_v23  ;;  %v2564_v26 = vld [vmem:[#allocation4] sm:$0x3]  ;;  %v7553_v55 = vld [vmem:[#allocation161_spill] sm:$0xff]  ;;  %p3070_p8 = pnand %p3069_p7, %p3227_p5  ;;  %s3074_s29 = scalar_lea.vmem %s3073_s17, 64 }
 0x2af   : > { %vm2258_vm5 = vcmp.eq.s32.totalorder %v7550_v34, %v5696_v23  ;;  %v2376_v38 = vsel %vm2252_vm13, inf, %v7551_v19  ;;  %v2378_v33 = vsel %vm2254_vm7, inf, %v7552_v3  ;;  %v6099_v10 = vsel %vm2174_vm1, %v2172_v61, %v2173_v4  ;;  %v7555_v61 = vld [vmem:[#allocation96_spill] sm:$0xff]  ;;  %v7556_v19 = vld [vmem:[#allocation139_spill] sm:$0xff]  ;;  %p3075_p12 = scmp.lt.s32.totalorder %s6495_s10, %s3073_s17  ;;  %p3076_p13 = scmp.lt.s32.totalorder %s3074_s29, %s3068_s16 }
 0x2b0   : > { %v2462_v54 = vmin.f32 %v2460_v44, %v2376_v38  ;;  %v2463_v56 = vmin.f32 %v2461_v0, %v2378_v33  ;;  %v2572_v20 = vsub.s32 1, %v7338_v29  ;;  %v2569_v41 = vrot.slane %v5694_v2, %v2568_v24  ;;  %v7554_v44 = vld [vmem:[#allocation90_spill] sm:$0xff]  ;;  %p3071_p11 = pneg %p3070_p8 }
 0x2b1   : > { %vm2266_vm9 = vcmp.eq.s32.totalorder %v7553_v55, %v5696_v23  ;;  %v2380_v4 = vsel %vm2256_vm4, inf, %v7554_v44  ;;  %v2382_v0 = vsel %vm2258_vm5, inf, %v7555_v61  ;;  %vm2181_vm3 = vcmp.eq.s32.totalorder %v7338_v29, %v6099_v10  ;;  %v7557_v44 = vld [vmem:[#allocation162_spill] sm:$0xff]  ;;  %v7558_v61 = vld [vmem:[#allocation163_spill] sm:$0xff]  ;;  %p3077_p0 = por %p3076_p13, %p3075_p12 }
 0x2b2   : > { %vm2183_vm14 = vcmp.eq.s32.totalorder %v7466_v60, %v6099_v10  ;;  %vm2185_vm12 = vcmp.eq.s32.totalorder %v7465_v25, %v6099_v10  ;;  %vm2187_vm2 = vcmp.eq.s32.totalorder %v7556_v19, %v6099_v10  ;;  %v2464_v38 = vmin.f32 %v2462_v54, %v2380_v4  ;;  %v7559_v29 = vld [vmem:[#allocation99_spill] sm:$0xff]  ;;  %v7560_v25 = vld [vmem:[#allocation104_spill] sm:$0xff] }
 0x2b3   : > { %v2465_v3 = vmin.f32 %v2463_v56, %v2382_v0  ;;  %v2573_v33 = vrot.slane %v5694_v2, %v2572_v20  ;;  %v2605_v34 = vrot.slane %v2564_v26, %v2568_v24  ;;  %vm2268_vm15 = vcmp.eq.s32.totalorder %v7557_v44, %v5696_v23  ;;  %v7561_v56 = vld [vmem:[#allocation53_spill] sm:$0xff]  ;;  %v7562_v0 = vld [vmem:[#allocation92_spill] sm:$0xff]  ;;  %p3078_p1 = pnand %p3077_p0, %p3071_p11 }
 0x2b4   : > { %vm2270_vm0 = vcmp.eq.s32.totalorder %v7558_v61, %v5696_v23  ;;  %v2384_v60 = vsel %vm2260_vm11, inf, %v7559_v29  ;;  %v2386_v54 = vsel %vm2262_vm10, inf, %v7560_v25  ;;  %v2388_v24 = vsel %vm2264_vm6, inf, %v7561_v56  ;;  %v7563_v2 = vld [vmem:[#allocation97_spill] sm:$0xff]  ;;  %v7566_v29 = vld [vmem:[#allocation35_spill] sm:$0xff] }
 0x2b5   : > { %v2609_v4 = vrot.slane %v2564_v26, %v2572_v20  ;;  %v2305_v19 = vsel %vm2181_vm3, inf, %v7562_v0  ;;  %v2307_v14 = vsel %vm2183_vm14, inf, %v7563_v2  ;;  %v2309_v35 = vsel %vm2185_vm12, inf, %v7564_v16  ;;  %v7567_v20 = vld [vmem:[#allocation166_spill] sm:$0xff]  ;;  %v7569_v16 = vld [vmem:[#allocation167_spill] sm:$0xff]  ;;  %v7574_v56 = vld [vmem:[#allocation169_spill] sm:$0xff] }
 0x2b6   : > { %v2311_v45 = vsel %vm2187_vm2, inf, %v7565_v17  ;;  %v2390_v36 = vsel %vm2266_vm9, inf, %v7566_v29  ;;  %vm2189_vm13 = vcmp.eq.s32.totalorder %v7477_v30, %v6099_v10  ;;  %vm2191_vm7 = vcmp.eq.s32.totalorder %v7478_v59, %v6099_v10  ;;  %v7568_v17 = vld [vmem:[#allocation164_spill] sm:$0xff]  ;;  %v7575_v0 = vld [vmem:[#allocation170_spill] sm:$0xff]  ;;  %v7576_v29 = vld [vmem:[#allocation193_spill] sm:$0xff] }
 0x2b7   : > { %vm2576_vm1 = vcmp.lt.f32.partialorder %v7567_v20, %v2569_v41  ;;  %v2466_v26 = vmin.f32 %v2464_v38, %v2384_v60  ;;  %v2467_v25 = vmin.f32 %v2465_v3, %v2386_v54  ;;  %vm2577_vm4 = vcmp.lt.f32.partialorder %v5309_v48, %v2573_v33  ;;  %v7570_v48 = vld [vmem:[#allocation101_spill] sm:$0xff] }
 0x2b8   : > { %v2610_v2 = vsel %vm2576_vm1, %v5696_v23, %v2605_v34  ;;  %vm2272_vm5 = vcmp.eq.s32.totalorder %v7568_v17, %v5696_v23  ;;  %vm2274_vm11 = vcmp.eq.s32.totalorder %v7569_v16, %v5696_v23  ;;  %vm2193_vm10 = vcmp.eq.s32.totalorder %v7480_v50, %v6099_v10  ;;  %v7571_v34 = vld [vmem:[#allocation105_spill] sm:$0xff] }
 0x2b9   : > { %vm2195_vm6 = vcmp.eq.s32.totalorder %v7484_v51, %v6099_v10  ;;  %v2495_v59 = vmin.f32 %v2305_v19, %v2309_v35  ;;  %v2496_v30 = vmin.f32 %v2307_v14, %v2311_v45  ;;  %vm2197_vm9 = vcmp.eq.s32.totalorder %v7487_v1, %v6099_v10  ;;  %v7572_v45 = vld [vmem:[#allocation109_spill] sm:$0xff]  ;;  %v7573_v35 = vld [vmem:[#allocation38_spill] sm:$0xff] }
 0x2ba   : > { %v2313_v41 = vsel %vm2189_vm13, inf, %v7570_v48  ;;  %v2315_v38 = vsel %vm2191_vm7, inf, %v7571_v34  ;;  %v2611_v3 = vsel %vm2577_vm4, %v6099_v10, %v2609_v4  ;;  %vm2199_vm3 = vcmp.eq.s32.totalorder %v7490_v27, %v6099_v10  ;;  %v7580_v34 = vld [vmem:[#allocation37_spill] sm:$0xff] }
 0x2bb   : > { %v2497_v33 = vmin.f32 %v2495_v59, %v2313_v41  ;;  %v2498_v60 = vmin.f32 %v2496_v30, %v2315_v38  ;;  %v2612_v50 = vcombine.low %v2610_v2, %v2611_v3  ;;  %v2468_v54 = vmin.f32 %v2466_v26, %v2388_v24  ;;  %v7577_v26 = vld [vmem:[#allocation55_spill] sm:$0xff]  ;;  %v7578_v59 = vld [vmem:[#allocation13_spill] sm:$0xff]  ;;  %v7581_v38 = vld [vmem:[#allocation44_spill] sm:$0xff] }
 0x2bc   : > { %vm2201_vm14 = vcmp.eq.s32.totalorder %v7491_v22, %v6099_v10  ;;  %v2317_v51 = vsel %vm2193_vm10, inf, %v7572_v45  ;;  %v2319_v14 = vsel %vm2195_vm6, inf, %v7573_v35  ;;  %vm2276_vm12 = vcmp.eq.s32.totalorder %v7574_v56, %v5696_v23  ;;  %v7582_v3 = vld [vmem:[#allocation43_spill] sm:$0xff] }
 0x2bd   : > { %vm2278_vm2 = vcmp.eq.s32.totalorder %v7575_v0, %v5696_v23  ;;  %vm2203_vm13 = vcmp.eq.s32.totalorder %v7492_v18, %v6099_v10  ;;  %v2499_v4 = vmin.f32 %v2497_v33, %v2317_v51  ;;  %v2500_v19 = vmin.f32 %v2498_v60, %v2319_v14  ;;  %v7583_v60 = vld [vmem:[#allocation171_spill] sm:$0xff] }
 0x2be   : > { %v2619_v24 = vrot.slane %v2612_v50, %v7576_v29  ;;  %v2469_v20 = vmin.f32 %v2467_v25, %v2390_v36  ;;  %vm2205_vm7 = vcmp.eq.s32.totalorder %v7493_v11, %v6099_v10  ;;  %v2321_v2 = vsel %vm2197_vm9, inf, %v7577_v26  ;;  %v7579_v25 = vld [vmem:[#allocation50_spill] sm:$0xff]  ;;  %v7584_v50 = vld [vmem:[#allocation173_spill] sm:$0xff]  ;;  %v7585_v14 = vld [vmem:[#allocation47_spill] sm:$0xff] }
 0x2bf   : > { %v2323_v30 = vsel %vm2199_vm3, inf, %v7578_v59  ;;  %vm2207_vm1 = vcmp.eq.s32.totalorder %v5036_v37, %v6099_v10  ;;  %v2501_v18 = vmin.f32 %v2499_v4, %v2321_v2  ;;  %v2392_v41 = vsel %vm2268_vm15, inf, %v7579_v25  ;;  %v7588_v11 = vld [vmem:[#allocation45_spill] sm:$0xff]  ;;  %v7589_v37 = vld [vmem:[#allocation54_spill] sm:$0xff] }
 0x2c0   : > { %v2502_v48 = vmin.f32 %v2500_v19, %v2323_v30  ;;  %v2626_v36 = vrot.slane %v2619_v24, %v7576_v29  ;;  %v2394_v1 = vsel %vm2270_vm0, inf, %v7580_v34  ;;  %v2325_v27 = vsel %vm2201_vm14, inf, %v7581_v38  ;;  %v7586_v19 = vld [vmem:[#allocation16_spill] sm:$0xff]  ;;  %v7590_v59 = vld [vmem:[#allocation66_spill] sm:$0xff] }
 0x2c1   : > { %v2327_v33 = vsel %vm2203_vm13, inf, %v7582_v3  ;;  %vm2280_vm4 = vcmp.eq.s32.totalorder %v7583_v60, %v5696_v23  ;;  %vm2282_vm10 = vcmp.eq.s32.totalorder %v7584_v50, %v5696_v23  ;;  %vm2209_vm15 = vcmp.eq.s32.totalorder %v5042_v7, %v6099_v10 }
 0x2c2   : > { %vm2211_vm6 = vcmp.eq.s32.totalorder %v5048_v46, %v6099_v10  ;;  %v2503_v45 = vmin.f32 %v2501_v18, %v2325_v27  ;;  %v2504_v51 = vmin.f32 %v2502_v48, %v2327_v33  ;;  %2627 = vst.msk [vmem:[#allocation4] sm:$0x3] %vm5336_vm8, %v2626_v36  ;;  %v2470_v22 = vmin.f32 %v2468_v54, %v2392_v41  ;;  %v7587_v54 = vld [vmem:[#allocation42_spill] sm:$0xff]  ;;  %v7592_v48 = vld [vmem:[#allocation176_spill] sm:$0xff] }
 0x2c3   : > { %v2471_v35 = vmin.f32 %v2469_v20, %v2394_v1  ;;  %v2329_v4 = vsel %vm2205_vm7, inf, %v7585_v14  ;;  %v2331_v7 = vsel %vm2207_vm1, inf, %v7586_v19  ;;  %vm2213_vm0 = vcmp.eq.s32.totalorder %v7506_v21, %v6099_v10  ;;  %v7591_v18 = vld [vmem:[#allocation174_spill] sm:$0xff]  ;;  %v7593_v1 = vld [vmem:[#allocation25_spill] sm:$0xff]  ;;  %v7594_v27 = vld [vmem:[#allocation76_spill] sm:$0xff] }
 0x2c4   : > { %vm2215_vm9 = vcmp.eq.s32.totalorder %v7507_v39, %v6099_v10  ;;  %v2505_v46 = vmin.f32 %v2503_v45, %v2329_v4  ;;  %v2506_v24 = vmin.f32 %v2504_v51, %v2331_v7  ;;  %v2396_v20 = vsel %vm2272_vm5, inf, %v7587_v54  ;;  %v7595_v33 = vld [vmem:[#allocation48_spill] sm:$0xff]  ;;  %v7596_v21 = vld [vmem:[#allocation75_spill] sm:$0xff]  ;;  %v7597_v39 = vld [vmem:[#allocation81_spill] sm:$0xff] }
 0x2c5   : > { %v2398_v26 = vsel %vm2274_vm11, inf, %v7588_v11  ;;  %v2333_v2 = vsel %vm2209_vm15, inf, %v7589_v37  ;;  %v2335_v30 = vsel %vm2211_vm6, inf, %v7590_v59  ;;  %vm2284_vm3 = vcmp.eq.s32.totalorder %v7591_v18, %v5696_v23  ;;  %v7599_v4 = vld [vmem:[#allocation178_spill] sm:$0xff]  ;;  %v7600_v54 = vld [vmem:[#allocation117_spill] sm:$0xff]  ;;  %v7601_v11 = vld [vmem:[#allocation108_spill] sm:$0xff] }
 0x2c6   : > { %vm2286_vm14 = vcmp.eq.s32.totalorder %v7592_v48, %v5696_v23  ;;  %vm2217_vm13 = vcmp.eq.s32.totalorder %v5068_v40, %v6099_v10  ;;  %vm2219_vm5 = vcmp.eq.s32.totalorder %v5074_v63, %v6099_v10  ;;  %v2507_v36 = vmin.f32 %v2505_v46, %v2333_v2  ;;  %v7602_v37 = vld [vmem:[#allocation56_spill] sm:$0xff] }
 0x2c7   : > { %v2508_v25 = vmin.f32 %v2506_v24, %v2335_v30  ;;  %v2472_v41 = vmin.f32 %v2470_v22, %v2396_v20  ;;  %v2473_v34 = vmin.f32 %v2471_v35, %v2398_v26  ;;  %v2337_v38 = vsel %vm2213_vm0, inf, %v7593_v1  ;;  %v7598_v35 = vld [vmem:[#allocation125_spill] sm:$0xff] }
 0x2c8   : > { %v2339_v3 = vsel %vm2215_vm9, inf, %v7594_v27  ;;  %vm2221_vm11 = vcmp.eq.s32.totalorder %v7514_v5, %v6099_v10  ;;  %vm2223_vm7 = vcmp.eq.s32.totalorder %v5086_v57, %v6099_v10  ;;  %v2509_v63 = vmin.f32 %v2507_v36, %v2337_v38  ;;  %v7603_v5 = vld [vmem:[#allocation29_spill] sm:$0xff]  ;;  %v7604_v57 = vld [vmem:[#allocation120_spill] sm:$0xff]  ;;  %v7606_v27 = vld [vmem:[#allocation123_spill] sm:$0xff] }
 0x2c9   : > { %v2510_v40 = vmin.f32 %v2508_v25, %v2339_v3  ;;  %v2400_v45 = vsel %vm2276_vm12, inf, %v7595_v33  ;;  %v2402_v51 = vsel %vm2278_vm2, inf, %v7596_v21  ;;  %v2341_v22 = vsel %vm2217_vm13, inf, %v7597_v39  ;;  %v7605_v36 = vld [vmem:[#allocation60_spill] sm:$0xff]  ;;  %v7608_v33 = vld [vmem:[#allocation63_spill] sm:$0xff] }
 0x2ca   : > { %v2343_v14 = vsel %vm2219_vm5, inf, %v7598_v35  ;;  %vm2288_vm1 = vcmp.eq.s32.totalorder %v7599_v4, %v5696_v23  ;;  %vm2290_vm15 = vcmp.eq.s32.totalorder %v7479_v13, %v5696_v23  ;;  %vm2225_vm6 = vcmp.eq.s32.totalorder %v7519_v42, %v6099_v10  ;;  %v7611_v39 = vld [vmem:[#allocation31_spill] sm:$0xff]  ;;  %v7612_v35 = vld [vmem:[#allocation141_spill] sm:$0xff] }
 0x2cb   : > { %vm2227_vm12 = vcmp.eq.s32.totalorder %v7520_v9, %v6099_v10  ;;  %v2511_v19 = vmin.f32 %v2509_v63, %v2341_v22  ;;  %v2512_v7 = vmin.f32 %v2510_v40, %v2343_v14  ;;  %v2474_v46 = vmin.f32 %v2472_v41, %v2400_v45  ;;  %v7607_v63 = vld [vmem:[#allocation18_spill] sm:$0xff] }
 0x2cc   : > { %v2475_v24 = vmin.f32 %v2473_v34, %v2402_v51  ;;  %v2345_v20 = vsel %vm2221_vm11, inf, %v7600_v54  ;;  %v2347_v26 = vsel %vm2223_vm7, inf, %v7601_v11  ;;  %vm2229_vm2 = vcmp.eq.s32.totalorder %v7523_v58, %v6099_v10  ;;  %v7609_v58 = vld [vmem:[#allocation65_spill] sm:$0xff] }
 0x2cd   : > { %vm2231_vm0 = vcmp.eq.s32.totalorder %v7524_v32, %v6099_v10  ;;  %v2513_v42 = vmin.f32 %v2511_v19, %v2345_v20  ;;  %v2514_v9 = vmin.f32 %v2512_v7, %v2347_v26  ;;  %v2404_v2 = vsel %vm2280_vm4, inf, %v7602_v37  ;;  %v7610_v32 = vld [vmem:[#allocation126_spill] sm:$0xff]  ;;  %v7614_v20 = vld [vmem:[#allocation131_spill] sm:$0xff] }
 0x2ce   : > { %v2406_v59 = vsel %vm2282_vm10, inf, %v7603_v5  ;;  %v2349_v30 = vsel %vm2225_vm6, inf, %v7604_v57  ;;  %v2351_v25 = vsel %vm2227_vm12, inf, %v7605_v36  ;;  %vm2292_vm9 = vcmp.eq.s32.totalorder %v7485_v6, %v5696_v23  ;;  %v7615_v26 = vld [vmem:[#allocation142_spill] sm:$0xff]  ;;  %v7617_v37 = vld [vmem:[#allocation23_spill] sm:$0xff] }
 0x2cf   : > { %vm2294_vm13 = vcmp.eq.s32.totalorder %v7486_v28, %v5696_v23  ;;  %vm2233_vm5 = vcmp.eq.s32.totalorder %v7527_v31, %v6099_v10  ;;  %vm2235_vm4 = vcmp.eq.s32.totalorder %v7528_v47, %v6099_v10  ;;  %v2515_v41 = vmin.f32 %v2513_v42, %v2349_v30  ;;  %v7620_v57 = vld [vmem:[#allocation83_spill] sm:$0xff] }
 0x2d0   : > { %v2516_v34 = vmin.f32 %v2514_v9, %v2351_v25  ;;  %v2476_v1 = vmin.f32 %v2474_v46, %v2404_v2  ;;  %v2477_v38 = vmin.f32 %v2475_v24, %v2406_v59  ;;  %v2353_v3 = vsel %vm2229_vm2, inf, %v7606_v27  ;;  %v7613_v24 = vld [vmem:[#allocation128_spill] sm:$0xff]  ;;  %v7621_v36 = vld [vmem:[#allocation191_spill] sm:$0xff] }
 0x2d1   : > { %v2355_v40 = vsel %vm2231_vm0, inf, %v7607_v63  ;;  %vm2237_vm10 = vcmp.eq.s32.totalorder %v7529_v53, %v6099_v10  ;;  %vm2239_vm11 = vcmp.eq.s32.totalorder %v7532_v49, %v6099_v10  ;;  %v2517_v31 = vmin.f32 %v2515_v41, %v2353_v3  ;;  %v7618_v53 = vld [vmem:[#allocation111_spill] sm:$0xff]  ;;  %v7619_v49 = vld [vmem:[#allocation122_spill] sm:$0xff]  ;;  %v7622_v25 = vld [vmem:[#allocation192_spill] sm:$0xff] }
 0x2d2   : > { %v2518_v47 = vmin.f32 %v2516_v34, %v2355_v40  ;;  %v2408_v45 = vsel %vm2284_vm3, inf, %v7608_v33  ;;  %v2410_v21 = vsel %vm2286_vm14, inf, %v7609_v58  ;;  %v2357_v51 = vsel %vm2233_vm5, inf, %v7610_v32  ;;  %v7623_v41 = vld [vmem:[#allocation147_spill] sm:$0xff]  ;;  %v7624_v3 = vld [vmem:[#allocation80_spill] sm:$0xff]  ;;  %v7628_v58 = vld [vmem:[#allocation113_spill] sm:$0xff] }
 0x2d3   : > { %v2359_v22 = vsel %vm2235_vm4, inf, %v7611_v39  ;;  %vm2296_vm7 = vcmp.eq.s32.totalorder %v7504_v52, %v5696_v23  ;;  %vm2298_vm6 = vcmp.eq.s32.totalorder %v7505_v62, %v5696_v23  ;;  %vm2241_vm12 = vcmp.eq.s32.totalorder %v7535_v43, %v6099_v10  ;;  %v7616_v43 = vld [vmem:[#allocation144_spill] sm:$0xff]  ;;  %v7629_v32 = vld [vmem:[#allocation115_spill] sm:$0xff] }
 0x2d4   : > { %vm2243_vm3 = vcmp.eq.s32.totalorder %v7612_v35, %v6099_v10  ;;  %v2519_v14 = vmin.f32 %v2517_v31, %v2357_v51  ;;  %v2520_v19 = vmin.f32 %v2518_v47, %v2359_v22  ;;  %v2478_v7 = vmin.f32 %v2476_v1, %v2408_v45  ;;  %v7625_v40 = vld [vmem:[#allocation84_spill] sm:$0xff]  ;;  %v7630_v39 = vld [vmem:[#allocation87_spill] sm:$0xff]  ;;  %v7631_v35 = vld [vmem:[#allocation93_spill] sm:$0xff] }
 0x2d5   : > { %v2479_v46 = vmin.f32 %v2477_v38, %v2410_v21  ;;  %v2361_v54 = vsel %vm2237_vm10, inf, %v7613_v24  ;;  %v2363_v11 = vsel %vm2239_vm11, inf, %v7614_v20  ;;  %vm2245_vm14 = vcmp.eq.s32.totalorder %v7615_v26, %v6099_v10  ;;  %v7626_v47 = vld [vmem:[#allocation148_spill] sm:$0xff] }
 0x2d6   : > { %vm2247_vm2 = vcmp.eq.s32.totalorder %v7616_v43, %v6099_v10  ;;  %v2521_v42 = vmin.f32 %v2519_v14, %v2361_v54  ;;  %v2522_v9 = vmin.f32 %v2520_v19, %v2363_v11  ;;  %v2412_v2 = vsel %vm2288_vm1, inf, %v7617_v37  ;;  %v7632_v19 = vld [vmem:[#allocation151_spill] sm:$0xff]  ;;  %v7634_v11 = vld [vmem:[#allocation98_spill] sm:$0xff]  ;;  %v7637_v37 = vld [vmem:[#allocation157_spill] sm:$0xff] }
 0x2d7   : > { %v2414_v5 = vsel %vm2290_vm15, inf, %v7618_v53  ;;  %v2365_v59 = vsel %vm2241_vm12, inf, %v7619_v49  ;;  %v2367_v30 = vsel %vm2243_vm3, inf, %v7620_v57  ;;  %vm2300_vm0 = vcmp.eq.s32.totalorder %v7621_v36, %v5696_v23  ;;  %v7635_v43 = vld [vmem:[#allocation102_spill] sm:$0xff] }
 0x2d8   : > { %vm2302_vm5 = vcmp.eq.s32.totalorder %v7622_v25, %v5696_v23  ;;  %vm2249_vm4 = vcmp.eq.s32.totalorder %v7543_v12, %v6099_v10  ;;  %vm2251_vm1 = vcmp.eq.s32.totalorder %v7623_v41, %v6099_v10  ;;  %v2523_v34 = vmin.f32 %v2521_v42, %v2365_v59  ;;  %v7627_v12 = vld [vmem:[#allocation150_spill] sm:$0xff]  ;;  %v7639_v59 = vld [vmem:[#allocation119_spill] sm:$0xff] }
 0x2d9   : > { %v2524_v1 = vmin.f32 %v2522_v9, %v2367_v30  ;;  %v2480_v38 = vmin.f32 %v2478_v7, %v2412_v2  ;;  %v2481_v27 = vmin.f32 %v2479_v46, %v2414_v5  ;;  %v2369_v63 = vsel %vm2245_vm14, inf, %v7624_v3  ;;  %v7633_v7 = vld [vmem:[#allocation153_spill] sm:$0xff]  ;;  %v7636_v9 = vld [vmem:[#allocation155_spill] sm:$0xff]  ;;  %v7638_v5 = vld [vmem:[#allocation116_spill] sm:$0xff] }
 0x2da   : > { %v2371_v31 = vsel %vm2247_vm2, inf, %v7625_v40  ;;  %vm2253_vm15 = vcmp.eq.s32.totalorder %v7626_v47, %v6099_v10  ;;  %vm2255_vm10 = vcmp.eq.s32.totalorder %v7627_v12, %v6099_v10  ;;  %v2525_v33 = vmin.f32 %v2523_v34, %v2369_v63  ;;  %v7640_v30 = vld [vmem:[#allocation107_spill] sm:$0xff]  ;;  %v7641_v34 = vld [vmem:[#allocation46_spill] sm:$0xff]  ;;  %v7643_v47 = vld [vmem:[#allocation36_spill] sm:$0xff] }
 0x2db   : > { %v2526_v45 = vmin.f32 %v2524_v1, %v2371_v31  ;;  %v2416_v21 = vsel %vm2292_vm9, inf, %v7628_v58  ;;  %v2418_v51 = vsel %vm2294_vm13, inf, %v7629_v32  ;;  %v2373_v22 = vsel %vm2249_vm4, inf, %v7630_v39  ;;  %v7642_v40 = vld [vmem:[#allocation58_spill] sm:$0xff]  ;;  %v7645_v58 = vld [vmem:[#allocation132_spill] sm:$0xff]  ;;  %v7647_v39 = vld [vmem:[#allocation15_spill] sm:$0xff] }
 0x2dc   : > { %v2375_v14 = vsel %vm2251_vm1, inf, %v7631_v35  ;;  %vm2257_vm11 = vcmp.eq.s32.totalorder %v7632_v19, %v6099_v10  ;;  %vm2259_vm12 = vcmp.eq.s32.totalorder %v7633_v7, %v6099_v10  ;;  %v2527_v46 = vmin.f32 %v2525_v33, %v2373_v22  ;;  %v7646_v32 = vld [vmem:[#allocation14_spill] sm:$0xff]  ;;  %v7648_v19 = vld [vmem:[#allocation52_spill] sm:$0xff] }
 0x2dd   : > { %v2528_v24 = vmin.f32 %v2526_v45, %v2375_v14  ;;  %v2482_v54 = vmin.f32 %v2480_v38, %v2416_v21  ;;  %v2483_v20 = vmin.f32 %v2481_v27, %v2418_v51  ;;  %v2377_v26 = vsel %vm2253_vm15, inf, %v7634_v11  ;;  %v7651_v11 = vld [vmem:[#allocation61_spill] sm:$0xff] }
 0x2de   : > { %v2379_v42 = vsel %vm2255_vm10, inf, %v7635_v43  ;;  %vm2261_vm9 = vcmp.eq.s32.totalorder %v7636_v9, %v6099_v10  ;;  %vm2263_vm13 = vcmp.eq.s32.totalorder %v7637_v37, %v6099_v10  ;;  %v2529_v2 = vmin.f32 %v2527_v46, %v2377_v26  ;;  %v7649_v46 = vld [vmem:[#allocation51_spill] sm:$0xff]  ;;  %v7652_v9 = vld [vmem:[#allocation70_spill] sm:$0xff]  ;;  %v7653_v37 = vld [vmem:[#allocation77_spill] sm:$0xff] }
 0x2df   : > { %v2530_v53 = vmin.f32 %v2528_v24, %v2379_v42  ;;  %v2420_v49 = vsel %vm2296_vm7, inf, %v7638_v5  ;;  %v2422_v57 = vsel %vm2298_vm6, inf, %v7639_v59  ;;  %v2381_v41 = vsel %vm2257_vm11, inf, %v7640_v30  ;;  %v7654_v5 = vld [vmem:[#allocation22_spill] sm:$0xff] }
 0x2e0   : > { %v2383_v1 = vsel %vm2259_vm12, inf, %v7641_v34  ;;  %vm2265_vm3 = vcmp.eq.s32.totalorder %v7444_v8, %v6099_v10  ;;  %vm2267_vm14 = vcmp.eq.s32.totalorder %v7553_v55, %v6099_v10  ;;  %v2531_v38 = vmin.f32 %v2529_v2, %v2381_v41  ;;  %v7644_v8 = vld [vmem:[#allocation129_spill] sm:$0xff]  ;;  %v7656_v41 = vld [vmem:[#allocation114_spill] sm:$0xff] }
 0x2e1   : > { %v2532_v27 = vmin.f32 %v2530_v53, %v2383_v1  ;;  %v2484_v3 = vmin.f32 %v2482_v54, %v2420_v49  ;;  %v2485_v63 = vmin.f32 %v2483_v20, %v2422_v57  ;;  %v2385_v31 = vsel %vm2261_vm9, inf, %v7642_v40  ;;  %v7655_v49 = vld [vmem:[#allocation112_spill] sm:$0xff]  ;;  %v7657_v34 = vld [vmem:[#allocation118_spill] sm:$0xff] }
 0x2e2   : > { %v2387_v12 = vsel %vm2263_vm13, inf, %v7643_v47  ;;  %vm2269_vm7 = vcmp.eq.s32.totalorder %v7557_v44, %v6099_v10  ;;  %vm2271_vm6 = vcmp.eq.s32.totalorder %v7558_v61, %v6099_v10  ;;  %v2533_v33 = vmin.f32 %v2531_v38, %v2385_v31  ;;  %v7660_v47 = vld [vmem:[#allocation17_spill] sm:$0xff] }
 0x2e3   : > { %v2534_v45 = vmin.f32 %v2532_v27, %v2387_v12  ;;  %v2424_v55 = vsel %vm2300_vm0, inf, %v7644_v8  ;;  %v2426_v21 = vsel %vm2302_vm5, inf, %v7645_v58  ;;  %v2389_v51 = vsel %vm2265_vm3, inf, %v7646_v32  ;;  %v7658_v27 = vld [vmem:[#allocation121_spill] sm:$0xff]  ;;  %v7661_v12 = vld [vmem:[#allocation127_spill] sm:$0xff]  ;;  %v7662_v8 = vld [vmem:[#allocation130_spill] sm:$0xff] }
 0x2e4   : > { %v2391_v22 = vsel %vm2267_vm14, inf, %v7647_v39  ;;  %vm2273_vm2 = vcmp.eq.s32.totalorder %v7568_v17, %v6099_v10  ;;  %vm2275_vm4 = vcmp.eq.s32.totalorder %v7569_v16, %v6099_v10  ;;  %v2535_v44 = vmin.f32 %v2533_v33, %v2389_v51  ;;  %v7650_v17 = vld [vmem:[#allocation62_spill] sm:$0xff]  ;;  %v7665_v39 = vld [vmem:[#allocation137_spill] sm:$0xff] }
 0x2e5   : > { %v2536_v61 = vmin.f32 %v2534_v45, %v2391_v22  ;;  %v2486_v35 = vmin.f32 %v2484_v3, %v2424_v55  ;;  %v2487_v14 = vmin.f32 %v2485_v63, %v2426_v21  ;;  %v2393_v7 = vsel %vm2269_vm7, inf, %v7648_v19  ;;  %v7659_v3 = vld [vmem:[#allocation124_spill] sm:$0xff]  ;;  %v7663_v55 = vld [vmem:[#allocation133_spill] sm:$0xff]  ;;  %v7664_v32 = vld [vmem:[#allocation134_spill] sm:$0xff] }
 0x2e6   : > { %v2395_v24 = vsel %vm2271_vm6, inf, %v7649_v46  ;;  %vm2277_vm0 = vcmp.eq.s32.totalorder %v7574_v56, %v6099_v10  ;;  %vm2279_vm5 = vcmp.eq.s32.totalorder %v7575_v0, %v6099_v10  ;;  %v2537_v23 = vmin.f32 %v2535_v44, %v2393_v7 }
 0x2e7   : > { %v2538_v54 = vmin.f32 %v2536_v61, %v2395_v24  ;;  %v2397_v20 = vsel %vm2273_vm2, inf, %v7650_v17  ;;  %v2399_v16 = vsel %vm2275_vm4, inf, %v7651_v11  ;;  %vm2281_vm1 = vcmp.eq.s32.totalorder %v7583_v60, %v6099_v10  ;;  %v2563_v11 = vld [vmem:[#allocation3] sm:$0x3] }
 0x2e8   : > { %vm2283_vm15 = vcmp.eq.s32.totalorder %v7584_v50, %v6099_v10  ;;  %v2539_v26 = vmin.f32 %v2537_v23, %v2397_v20  ;;  %v2488_v42 = vmin.f32 %v2486_v35, %v2487_v14  ;;  %v2401_v56 = vsel %vm2277_vm0, inf, %v7652_v9 }
 0x2e9   : > { %v2540_v43 = vmin.f32 %v2538_v54, %v2399_v16  ;;  %v2403_v2 = vsel %vm2279_vm5, inf, %v7653_v37  ;;  %vm2285_vm10 = vcmp.eq.s32.totalorder %v7591_v18, %v6099_v10  ;;  %vm2287_vm11 = vcmp.eq.s32.totalorder %v7592_v48, %v6099_v10 }
 0x2ea   : > { %v2541_v0 = vmin.f32 %v2539_v26, %v2401_v56  ;;  %v2405_v60 = vsel %vm2281_vm1, inf, %v7654_v5  ;;  %v2407_v59 = vsel %vm2283_vm15, inf, %v7655_v49  ;;  %vm2289_vm12 = vcmp.eq.s32.totalorder %v7599_v4, %v6099_v10 }
 0x2eb   : > { %v2542_v53 = vmin.f32 %v2540_v43, %v2403_v2  ;;  %vm2291_vm9 = vcmp.eq.s32.totalorder %v7479_v13, %v6099_v10  ;;  %v2489_v30 = vrot.slane %v2488_v42, 4  ;;  %v2409_v18 = vsel %vm2285_vm10, inf, %v7656_v41  ;;  %v7666_v43 = vld [vmem:[#allocation194_spill] sm:$0xff] }
 0x2ec   : > { %v2543_v50 = vmin.f32 %v2541_v0, %v2405_v60  ;;  %v2411_v1 = vsel %vm2287_vm11, inf, %v7657_v34  ;;  %vm2293_vm13 = vcmp.eq.s32.totalorder %v7485_v6, %v6099_v10  ;;  %vm2295_vm3 = vcmp.eq.s32.totalorder %v7486_v28, %v6099_v10  ;;  %v7669_v2 = vld [vmem:[#allocation190_spill] sm:$0xff] }
 0x2ed   : > { %v2544_v57 = vmin.f32 %v2542_v53, %v2407_v59  ;;  %v2413_v4 = vsel %vm2289_vm12, inf, %v7658_v27  ;;  %v2415_v63 = vsel %vm2291_vm9, inf, %v7659_v3  ;;  %vm2297_vm14 = vcmp.eq.s32.totalorder %v7504_v52, %v6099_v10  ;;  %v7670_v60 = vld [vmem:[#allocation138_spill] sm:$0xff] }
 0x2ee   : > { %v2545_v48 = vmin.f32 %v2543_v50, %v2409_v18  ;;  %vm2299_vm7 = vcmp.eq.s32.totalorder %v7505_v62, %v6099_v10  ;;  %v2490_v31 = vmin.f32 %v2488_v42, %v2489_v30  ;;  %v2417_v6 = vsel %vm2293_vm13, inf, %v7660_v47  ;;  %v7667_v42 = vld [vmem:[#allocation159_spill] sm:$0xff] }
 0x2ef   : > { %v2546_v38 = vmin.f32 %v2544_v57, %v2411_v1  ;;  %v2419_v33 = vsel %vm2295_vm3, inf, %v7661_v12  ;;  %vm2301_vm6 = vcmp.eq.s32.totalorder %v7621_v36, %v6099_v10  ;;  %vm2303_vm2 = vcmp.eq.s32.totalorder %v7622_v25, %v6099_v10 }
 0x2f0   : > { %v2547_v13 = vmin.f32 %v2545_v48, %v2413_v4  ;;  %v2421_v52 = vsel %vm2297_vm14, inf, %v7662_v8  ;;  %v2423_v58 = vsel %vm2299_vm7, inf, %v7663_v55  ;;  %v2425_v51 = vsel %vm2301_vm6, inf, %v7664_v32 }
 0x2f1   : > { %v2548_v40 = vmin.f32 %v2546_v38, %v2415_v63  ;;  %v2427_v22 = vsel %vm2303_vm2, inf, %v7665_v39  ;;  %v2491_v44 = vrot.slane %v2490_v31, 2  ;;  %v7668_v9 = vmax.f32 %v7666_v43, %v7667_v42 }
 0x2f2   : > { %v2549_v28 = vmin.f32 %v2547_v13, %v2417_v6 }
 0x2f3   : > { %v2550_v45 = vmin.f32 %v2548_v40, %v2419_v33  ;;  %v2492_v36 = vmin.f32 %v2490_v31, %v2491_v44 }
 0x2f4   : > { %v2551_v62 = vmin.f32 %v2549_v28, %v2421_v52 }
 0x2f5   : > { %v2552_v21 = vmin.f32 %v2550_v45, %v2423_v58  ;;  %v2493_v10 = vrot.slane %v2492_v36, 1 }
 0x2f6   : > { %v2553_v61 = vmin.f32 %v2551_v62, %v2425_v51 }
 0x2f7   : > { %v2554_v35 = vmin.f32 %v2552_v21, %v2427_v22  ;;  %v2494_v24 = vmin.f32 %v2492_v36, %v2493_v10 }
 0x2f9   : > { %v2555_v14 = vmin.f32 %v2553_v61, %v2554_v35 }
 0x2fb   : > { %v2556_v19 = vrot.slane %v2555_v14, 4 }
 0x2fd   : > { %v2557_v7 = vmin.f32 %v2555_v14, %v2556_v19 }
 0x2ff   : > { %v2558_v25 = vrot.slane %v2557_v7, 2 }
 0x301   : > { %v2559_v46 = vmin.f32 %v2557_v7, %v2558_v25 }
 0x303   : > { %v2560_v23 = vrot.slane %v2559_v46, 1 }
 0x305   : > { %v2561_v54 = vmin.f32 %v2559_v46, %v2560_v23 }
 0x307   : > { %v2631_v17 = vcombine.low %v2494_v24, %v2561_v54 }
 0x309   : > { %v2638_v20 = vrot.slane %v2631_v17, %v7576_v29 }
 0x30b   : > { %v2645_v16 = vrot.slane %v2638_v20, %v7576_v29  ;;  %v2662_v29 = vld [vmem:[#allocation4] sm:$0x3] }
 0x30d   : > { %v2647_v26 = vmin.f32 %v2563_v11, %v2645_v16 }
 0x30f   : > { %v2648_v56 = vmin.f32 %v7668_v9, %v2647_v26 }
 0x311   : > { %2649 = vst.msk [vmem:[#allocation3] sm:$0x3] %vm5336_vm8, %v2648_v56 }
 0x318   : > { %v2657_v37 = vld [vmem:[#allocation3] sm:$0x3] }
 0x319   : > { %v2658_v0 = vadd.f32 %v2657_v37, %v7669_v2 }
 0x31b   : > { %v2659_v53 = vmax.f32 %v2658_v0, 0.0 }
 0x31d   : > { %v2660_v5 = vmul.f32 0.64, %v2659_v53 }
 0x31f   : > { %vm2661_vm4 = vcmp.lt.f32.partialorder %v7670_v60, %v2660_v5 }
 0x320   : > { %v2663_v49 = vsel %vm2661_vm4, %v2662_v29, 4294967295 }
 0x321   : > { %2664 = vst.msk [vmem:[%s432_s8] sm:$0x3] %vm5336_vm8, %v2663_v49 }
 0x322   : > { %3081 = shalt.err (!%p3078_p1)
}
 0x323   : > { %s3082_s14 = scalar_lea.hbm %s6493_s15, 32  ;;  %s3086_s9 = scalar_lea.hbm %s6548_s4, 64 }
 0x324   : > { %p3083_p2 = scmp.ne.s32.totalorder %s6493_s15, %s3082_s14  ;;  %p3087_p6 = scmp.lt.u32.totalorder %s6493_s15, %s6548_s4 }
 0x325   : > { %p3088_p7 = scmp.lt.u32.totalorder %s3086_s9, %s3082_s14  ;;  %p3090_p11 = scmp.lt.u32.totalorder %s3082_s14, %s6493_s15 }
 0x326   : > { %p3084_p3 = pnand %p3083_p2, %p3227_p5 }
 0x327   : > { %p3089_p8 = por %p3088_p7, %p3087_p6 }
 0x328   : > { %p3085_p4 = pneg %p3084_p3 }
 0x329   : > { %p3091_p12 = por %p3090_p11, %p3089_p8 }
 0x32b   : > { %p3092_p13 = pnand %p3091_p12, %p3085_p4 }
 0x32d   : > { %3095 = shalt.err (!%p3092_p13)
}
 0x32e   : > { %2972 = dma.vmem_to_hbm [thread:$0]  (%p3227_p5), %s6495_s10, 32, %s6493_s15, %s2674_s25  }
 0x32f PF: > { %s2719_s8 = sand.u32 1, %s3130_s18   ;;  %p2977_p0 = pnand %p2856_p10, %p3238_p9 }
 0x330   : > { %s2720_s11 = scalar_lea.sflag [#allocation7], %s2719_s8 }
 0x331   : > { %3121 = dma.done.wait (!%p2977_p0), %s2720_s11, 32  }
 0x332   : > { %3123 = vsyncadd (!%p2977_p0), %s2720_s11, 4294967264  ;;  %s2729_s12 = scalar_lea.sflag [#allocation9], %s2719_s8 }
 0x333   : > { %3125 = dma.done.wait (!%p2977_p0), %s2729_s12, 32  }
 0x334   : > { %3127 = vsyncadd (!%p2977_p0), %s2729_s12, 4294967264  ;;  %s22_s23 = sadd.s32 1, %s3150_s23   ;;  %s7671_s18 = smov %s3134_s19 }
 0x335   : > { %p19_p1 = scmp.ge.s32.totalorder %s22_s23, 4   ;;  %s7672_s19 = smov %s3138_s20 }
 0x336   : > { %s7673_s20 = smov %s3236_s30  ;;  %s7674_s21 = smov %s3146_s22 }
 0x337   : > { %s7675_s22 = smov %s7677_s26  ;;  %21 = sbr.rel (!%p19_p1) target bundleno = 6 (0x6), region = 133 }
 0x33e   :  { %2734 = vsyncpa [#allocation7], 1 }
 0x33f   :  { %2736 = vsyncpa [#allocation7 + $0x1], 1 }
 0x340   :  { %2737 = vsyncpa [#allocation9], 1 }
 0x341   :  { %2739 = vsyncpa [#allocation9 + $0x1], 1 }

</bundles_post_ra>
